<compile_context>
chip_gen: v7x
topology: tpu7x:2x2x1
jax: 0.10.0
libtpu: 0.0.40
codegen_flags: <defaults>
</compile_context>

<pallas_src>
import functools

import jax
import jax.numpy as jnp
import numpy as np
from jax import lax
from jax.experimental import pallas as pl
from jax.experimental.pallas import tpu as pltpu

LRELU_SLOPE = 0.1
KW_SIZES = (3, 5, 5)  # per-stage conv kernel widths, as in the torch module


def get_padding(kernel_size, dilation=1):
    return int((kernel_size * dilation - dilation) / 2)


def _leaky_relu(x):
    return jnp.where(x > 0, x, LRELU_SLOPE * x)


# --------------------------- fused ResBlock Pallas kernel --------------------------- #

def _make_resblock_kernel(B, C, H, W, KH, kw_sizes, dilation):
    """Static config is closed over; the kernel is unrolled over the 6 convs x KH*KW
    taps (78 taps total at these kernel sizes)."""
    BC, HW = B * C, H * W

    def kernel(x_ref, w_ref, b_ref, o_ref):
        # x_ref : (B*C, H*W) f32          packed activation (sublane = b*C+c, lane = h*W+w)
        # w_ref : (6, maxT, B*C, B*C) f32 per-tap batch-block-diagonal channel mixes
        # b_ref : (6, B*C, 1) f32         per-sublane bias columns
        # o_ref : (B*C, H*W) f32

        # Flat lane index, decoded once; every tap mask is a compare against constants.
        pos = lax.broadcasted_iota(jnp.int32, (BC, HW), 1)
        if W & (W - 1) == 0:
            ww = jnp.bitwise_and(pos, W - 1)        # w = pos % W (power-of-two fast path)
        else:
            ww = pos % W

        # Edge masks, memoised per (dh, dw) at trace time -> built once, reused by every
        # conv that shares the offset (conv2 of all stages shares dh in {-1, 0, 1}).
        h_masks, w_masks, hw_masks = {}, {}, {}

        def edge_mask(dh, dw):
            if (dh, dw) in hw_masks:
                return hw_masks[(dh, dw)]
            if dh not in h_masks:
                # 0 <= h + dh < H   <=>   pos in [(-dh)*W, (H - dh)*W)
                if dh == 0:
                    h_masks[dh] = None
                elif dh > 0:
                    h_masks[dh] = pos < (H - dh) * W
                else:
                    h_masks[dh] = pos >= (-dh) * W
            if dw not in w_masks:
                if dw == 0:
                    w_masks[dw] = None
                elif dw > 0:
                    w_masks[dw] = ww < (W - dw)
                else:
                    w_masks[dw] = ww >= (-dw)
            mh, mw = h_masks[dh], w_masks[dw]
            m = mh if mw is None else (mw if mh is None else jnp.logical_and(mh, mw))
            hw_masks[(dh, dw)] = m
            return m

        def conv(a, j, dil_h, kw):
            """y = conv_j(a) + bias_j in the packed layout: roll + mask + tiny matmul."""
            pw = kw // 2
            acc = jnp.broadcast_to(b_ref[j], (BC, HW))   # bias as accumulator init
            t = 0
            for kh in range(KH):
                dh = (kh - KH // 2) * dil_h
                for kwi in range(kw):
                    dw = kwi - pw
                    off = dh * W + dw
                    # shifted[s, p] == a[s, p + off]; built ONCE per tap (hoisted out of
                    # the channel dimensions, which live inside the matmul).
                    shifted = a if off == 0 else pltpu.roll(a, (-off) % HW, axis=1)
                    m = edge_mask(dh, dw)
                    if m is not None:
                        shifted = jnp.where(m, shifted, 0.0)
                    # Per-batch 4x4 channel mix == (8,8) x (8,256) block-diag MXU matmul.
                    acc = acc + jnp.dot(w_ref[j, t], shifted,
                                        preferred_element_type=jnp.float32)
                    t += 1
            return acc

        x = x_ref[...]                                   # running residual: 2 vregs
        for stage in range(3):
            a = _leaky_relu(x)
            y = conv(a, 2 * stage, dilation[stage], kw_sizes[stage])
            a = _leaky_relu(y)
            y = conv(a, 2 * stage + 1, 1, kw_sizes[stage])
            x = x + y                                    # pre-activation residual
        o_ref[...] = x                                   # single unmasked lane-dense store

    return kernel


def _pack_tap_weights(params, B, C, KH, kw_sizes):
    """Per-tap batch-block-diagonal channel-mix matrices + per-sublane bias columns.

    (In a real model this packing would be done once at parameter-load time.)
    """
    max_t = KH * max(kw_sizes)
    eye_b = jnp.eye(B, dtype=jnp.float32)
    mats, biases = [], []
    for i in range(3):
        for w, b in (params["convs1"][i], params["convs2"][i]):
            t = w.shape[2] * w.shape[3]
            # torch OIHW -> (tap, c_out, c_in), tap = kh*KW + kw (matches kernel order)
            wt = jnp.transpose(w, (2, 3, 0, 1)).reshape(t, C, C)
            # kron(I_B, w_tap): M[b*C+co, b*C+ci] = w[co, ci, kh, kw]
            m = jnp.einsum("ab,tij->taibj", eye_b, wt).reshape(t, B * C, B * C)
            mats.append(jnp.pad(m, ((0, max_t - t), (0, 0), (0, 0))))
            biases.append(jnp.tile(b, B).reshape(B * C, 1))
    return jnp.stack(mats), jnp.stack(biases)     # (6, maxT, BC, BC), (6, BC, 1)


def resblock_forward_pallas(x, params, kernel_size, dilation):
    B, C, H, W = x.shape
    BC, HW = B * C, H * W
    kw_sizes = tuple(int(w.shape[3]) for w, _ in params["convs1"])

    w_all, b_all = _pack_tap_weights(params, B, C, kernel_size, kw_sizes)
    kernel = _make_resblock_kernel(B, C, H, W, kernel_size, kw_sizes, tuple(dilation))

    out = pl.pallas_call(
        kernel,
        out_shape=jax.ShapeDtypeStruct((BC, HW), x.dtype),
        grid=(1,),
        in_specs=[
            pl.BlockSpec((BC, HW), lambda i: (0, 0)),
            pl.BlockSpec(w_all.shape, lambda i: (0, 0, 0, 0)),
            pl.BlockSpec(b_all.shape, lambda i: (0, 0, 0)),
        ],
        out_specs=pl.BlockSpec((BC, HW), lambda i: (0, 0)),
        compiler_params=pltpu.CompilerParams(
            dimension_semantics=("arbitrary",),
            vmem_limit_bytes=32 * 1024 * 1024,
        ),
    )(x.reshape(BC, HW), w_all, b_all)
    return out.reshape(B, C, H, W)


# ------------------------------- parameter init --------------------------------- #

def init_resblock_params(key, channels, kernel_size):
    """Deterministic init mirroring weight_norm(Conv2d) + init_weights(std=0.01).

    weight_norm at init time is the identity on the effective weight (g = ||v||), so we
    store the folded conv weights directly (torch OIHW layout) plus biases.
    """
    params = {"convs1": [], "convs2": []}
    for group in ("convs1", "convs2"):
        for kw in KW_SIZES:
            key, k_w, k_b = jax.random.split(key, 3)
            w = 0.01 * jax.random.normal(
                k_w, (channels, channels, kernel_size, kw), jnp.float32)
            bound = 1.0 / np.sqrt(channels * kernel_size * kw)
            b = jax.random.uniform(k_b, (channels,), jnp.float32,
                                   minval=-bound, maxval=bound)
            params[group].append((w, b))
    return params


# ------------------------------ pure-JAX reference ------------------------------ #

def _ref_conv(x_nchw, w_oihw, b, dil_h, pad_h, pad_w):
    y = jax.lax.conv_general_dilated(
        x_nchw, w_oihw, window_strides=(1, 1),
        padding=((pad_h, pad_h), (pad_w, pad_w)),
        rhs_dilation=(dil_h, 1),
        dimension_numbers=("NCHW", "OIHW", "NCHW"),
        precision=jax.lax.Precision.HIGHEST,
    )
    return y + b[None, :, None, None]


def resblock_forward_ref(x, params, kernel_size, dilation):
    for i in range(3):
        w1, b1 = params["convs1"][i]
        w2, b2 = params["convs2"][i]
        d = dilation[i]
        pw = w1.shape[3] // 2
        xt = _leaky_relu(x)
        xt = _ref_conv(xt, w1, b1, d, get_padding(kernel_size, d), pw)
        xt = _leaky_relu(xt)
        xt = _ref_conv(xt, w2, b2, 1, get_padding(kernel_size, 1), pw)
        x = xt + x
    return x


# ------------------------------------- main ------------------------------------- #

if __name__ == "__main__":
    channels, kernel_size, dilation = 4, 3, (1, 3, 5)
    B, H, W = 2, 16, 16

    key = jax.random.PRNGKey(0)
    key, kx = jax.random.split(key)
    x = jax.random.normal(kx, (B, channels, H, W), jnp.float32)

    params = init_resblock_params(key, channels, kernel_size)

    fwd = jax.jit(functools.partial(
        resblock_forward_pallas, kernel_size=kernel_size, dilation=dilation))
    out = jax.block_until_ready(fwd(x, params))

    ref = resblock_forward_ref(x, params, kernel_size, dilation)
    # Tolerance allows for the MXU's multi-pass f32 accumulation of the tiny in-kernel
    # channel-mix matmuls; typical observed error is far smaller.
    np.testing.assert_allclose(np.asarray(out), np.asarray(ref), rtol=1e-3, atol=1e-3)

    print("KERNEL_OK")
</pallas_src>

<mosaic_0001>
module attributes {stable_mosaic.version = 11 : i64} {
  func.func @kernel(%arg0: i32, %arg1: memref<8x256xf32, #tpu.memory_space<vmem>>, %arg2: memref<6x15x8x8xf32, #tpu.memory_space<vmem>>, %arg3: memref<6x8x1xf32, #tpu.memory_space<vmem>>, %arg4: memref<8x256xf32, #tpu.memory_space<vmem>>) attributes {dimension_semantics = [#tpu.dimension_semantics<arbitrary>], iteration_bounds = array<i64: 1>, scalar_prefetch = 0 : i64, scratch_operands = 0 : i64, tpu.core_type = #tpu.core_type<tc>, window_params = [{pipeline_mode = #tpu.pipeline_mode<synchronous>, transform_indices = @transform_0, window_bounds = array<i64: 8, 256>}, {pipeline_mode = #tpu.pipeline_mode<synchronous>, transform_indices = @transform_1, window_bounds = array<i64: 6, 15, 8, 8>}, {pipeline_mode = #tpu.pipeline_mode<synchronous>, transform_indices = @transform_2, window_bounds = array<i64: 6, 8, 1>}, {pipeline_mode = #tpu.pipeline_mode<synchronous>, transform_indices = @transform_3, window_bounds = array<i64: 8, 256>}]} {
    %0 = tpu.iota {dimensions = array<i32: 1>} : vector<8x256xi32>
    %c15_i32 = arith.constant 15 : i32
    %1 = vector.broadcast %c15_i32 : i32 to vector<8x256xi32>
    %2 = arith.andi %0, %1 : vector<8x256xi32>
    %c0 = arith.constant 0 : index
    %c0_0 = arith.constant 0 : index
    %3 = vector.load %arg1[%c0, %c0_0] : memref<8x256xf32, #tpu.memory_space<vmem>>, vector<8x256xf32>
    %cst = arith.constant 0.000000e+00 : f32
    %4 = vector.broadcast %cst : f32 to vector<8x256xf32>
    %5 = arith.cmpf ogt, %3, %4 : vector<8x256xf32>
    %cst_1 = arith.constant 1.000000e-01 : f32
    %6 = vector.broadcast %cst_1 : f32 to vector<8x256xf32>
    %7 = arith.mulf %6, %3 : vector<8x256xf32>
    %8 = arith.select %5, %3, %7 : vector<8x256xi1>, vector<8x256xf32>
    %c0_2 = arith.constant 0 : index
    %c0_3 = arith.constant 0 : index
    %c0_4 = arith.constant 0 : index
    %9 = vector.load %arg3[%c0_2, %c0_3, %c0_4] : memref<6x8x1xf32, #tpu.memory_space<vmem>>, vector<1x8x1xf32>
    %10 = vector.shape_cast %9 : vector<1x8x1xf32> to vector<8x1xf32>
    %11 = vector.shape_cast %10 : vector<8x1xf32> to vector<8x1xf32>
    %12 = vector.broadcast %11 : vector<8x1xf32> to vector<8x256xf32>
    %c17_i32 = arith.constant 17 : i32
    %13 = tpu.dynamic_rotate %8 by %c17_i32 dim 1 : vector<8x256xf32>, i32 -> vector<8x256xf32>
    %c16_i32 = arith.constant 16 : i32
    %14 = vector.broadcast %c16_i32 : i32 to vector<8x256xi32>
    %15 = arith.cmpi sge, %0, %14 : vector<8x256xi32>
    %c1_i32 = arith.constant 1 : i32
    %16 = vector.broadcast %c1_i32 : i32 to vector<8x256xi32>
    %17 = arith.cmpi sge, %2, %16 : vector<8x256xi32>
    %18 = arith.andi %15, %17 : vector<8x256xi1>
    %cst_5 = arith.constant 0.000000e+00 : f32
    %19 = vector.broadcast %cst_5 : f32 to vector<8x256xf32>
    %20 = arith.select %18, %13, %19 : vector<8x256xi1>, vector<8x256xf32>
    %c0_6 = arith.constant 0 : index
    %c0_7 = arith.constant 0 : index
    %c0_8 = arith.constant 0 : index
    %c0_9 = arith.constant 0 : index
    %21 = vector.load %arg2[%c0_6, %c0_7, %c0_8, %c0_9] : memref<6x15x8x8xf32, #tpu.memory_space<vmem>>, vector<1x1x8x8xf32>
    %22 = vector.shape_cast %21 : vector<1x1x8x8xf32> to vector<8x8xf32>
    %cst_10 = arith.constant dense<0.000000e+00> : vector<8x256xf32>
    %23 = tpu.matmul %22, %20, %cst_10 {dimension_numbers = #tpu.dot_dimension_numbers<[1], [0], [0], [1], [0, 0, 1, 1], [], []>} : vector<8x8xf32>, vector<8x256xf32>, vector<8x256xf32> -> vector<8x256xf32>
    %24 = arith.addf %12, %23 : vector<8x256xf32>
    %c16_i32_11 = arith.constant 16 : i32
    %25 = tpu.dynamic_rotate %8 by %c16_i32_11 dim 1 : vector<8x256xf32>, i32 -> vector<8x256xf32>
    %cst_12 = arith.constant 0.000000e+00 : f32
    %26 = vector.broadcast %cst_12 : f32 to vector<8x256xf32>
    %27 = arith.select %15, %25, %26 : vector<8x256xi1>, vector<8x256xf32>
    %c0_13 = arith.constant 0 : index
    %c1 = arith.constant 1 : index
    %c0_14 = arith.constant 0 : index
    %c0_15 = arith.constant 0 : index
    %28 = vector.load %arg2[%c0_13, %c1, %c0_14, %c0_15] : memref<6x15x8x8xf32, #tpu.memory_space<vmem>>, vector<1x1x8x8xf32>
    %29 = vector.shape_cast %28 : vector<1x1x8x8xf32> to vector<8x8xf32>
    %cst_16 = arith.constant dense<0.000000e+00> : vector<8x256xf32>
    %30 = tpu.matmul %29, %27, %cst_16 {dimension_numbers = #tpu.dot_dimension_numbers<[1], [0], [0], [1], [0, 0, 1, 1], [], []>} : vector<8x8xf32>, vector<8x256xf32>, vector<8x256xf32> -> vector<8x256xf32>
    %31 = arith.addf %24, %30 : vector<8x256xf32>
    %c15_i32_17 = arith.constant 15 : i32
    %32 = tpu.dynamic_rotate %8 by %c15_i32_17 dim 1 : vector<8x256xf32>, i32 -> vector<8x256xf32>
    %c15_i32_18 = arith.constant 15 : i32
    %33 = vector.broadcast %c15_i32_18 : i32 to vector<8x256xi32>
    %34 = arith.cmpi slt, %2, %33 : vector<8x256xi32>
    %35 = arith.andi %15, %34 : vector<8x256xi1>
    %cst_19 = arith.constant 0.000000e+00 : f32
    %36 = vector.broadcast %cst_19 : f32 to vector<8x256xf32>
    %37 = arith.select %35, %32, %36 : vector<8x256xi1>, vector<8x256xf32>
    %c0_20 = arith.constant 0 : index
    %c2 = arith.constant 2 : index
    %c0_21 = arith.constant 0 : index
    %c0_22 = arith.constant 0 : index
    %38 = vector.load %arg2[%c0_20, %c2, %c0_21, %c0_22] : memref<6x15x8x8xf32, #tpu.memory_space<vmem>>, vector<1x1x8x8xf32>
    %39 = vector.shape_cast %38 : vector<1x1x8x8xf32> to vector<8x8xf32>
    %cst_23 = arith.constant dense<0.000000e+00> : vector<8x256xf32>
    %40 = tpu.matmul %39, %37, %cst_23 {dimension_numbers = #tpu.dot_dimension_numbers<[1], [0], [0], [1], [0, 0, 1, 1], [], []>} : vector<8x8xf32>, vector<8x256xf32>, vector<8x256xf32> -> vector<8x256xf32>
    %41 = arith.addf %31, %40 : vector<8x256xf32>
    %c1_i32_24 = arith.constant 1 : i32
    %42 = tpu.dynamic_rotate %8 by %c1_i32_24 dim 1 : vector<8x256xf32>, i32 -> vector<8x256xf32>
    %cst_25 = arith.constant 0.000000e+00 : f32
    %43 = vector.broadcast %cst_25 : f32 to vector<8x256xf32>
    %44 = arith.select %17, %42, %43 : vector<8x256xi1>, vector<8x256xf32>
    %c0_26 = arith.constant 0 : index
    %c3 = arith.constant 3 : index
    %c0_27 = arith.constant 0 : index
    %c0_28 = arith.constant 0 : index
    %45 = vector.load %arg2[%c0_26, %c3, %c0_27, %c0_28] : memref<6x15x8x8xf32, #tpu.memory_space<vmem>>, vector<1x1x8x8xf32>
    %46 = vector.shape_cast %45 : vector<1x1x8x8xf32> to vector<8x8xf32>
    %cst_29 = arith.constant dense<0.000000e+00> : vector<8x256xf32>
    %47 = tpu.matmul %46, %44, %cst_29 {dimension_numbers = #tpu.dot_dimension_numbers<[1], [0], [0], [1], [0, 0, 1, 1], [], []>} : vector<8x8xf32>, vector<8x256xf32>, vector<8x256xf32> -> vector<8x256xf32>
    %48 = arith.addf %41, %47 : vector<8x256xf32>
    %c0_30 = arith.constant 0 : index
    %c4 = arith.constant 4 : index
    %c0_31 = arith.constant 0 : index
    %c0_32 = arith.constant 0 : index
    %49 = vector.load %arg2[%c0_30, %c4, %c0_31, %c0_32] : memref<6x15x8x8xf32, #tpu.memory_space<vmem>>, vector<1x1x8x8xf32>
    %50 = vector.shape_cast %49 : vector<1x1x8x8xf32> to vector<8x8xf32>
    %cst_33 = arith.constant dense<0.000000e+00> : vector<8x256xf32>
    %51 = tpu.matmul %50, %8, %cst_33 {dimension_numbers = #tpu.dot_dimension_numbers<[1], [0], [0], [1], [0, 0, 1, 1], [], []>} : vector<8x8xf32>, vector<8x256xf32>, vector<8x256xf32> -> vector<8x256xf32>
    %52 = arith.addf %48, %51 : vector<8x256xf32>
    %c255_i32 = arith.constant 255 : i32
    %53 = tpu.dynamic_rotate %8 by %c255_i32 dim 1 : vector<8x256xf32>, i32 -> vector<8x256xf32>
    %cst_34 = arith.constant 0.000000e+00 : f32
    %54 = vector.broadcast %cst_34 : f32 to vector<8x256xf32>
    %55 = arith.select %34, %53, %54 : vector<8x256xi1>, vector<8x256xf32>
    %c0_35 = arith.constant 0 : index
    %c5 = arith.constant 5 : index
    %c0_36 = arith.constant 0 : index
    %c0_37 = arith.constant 0 : index
    %56 = vector.load %arg2[%c0_35, %c5, %c0_36, %c0_37] : memref<6x15x8x8xf32, #tpu.memory_space<vmem>>, vector<1x1x8x8xf32>
    %57 = vector.shape_cast %56 : vector<1x1x8x8xf32> to vector<8x8xf32>
    %cst_38 = arith.constant dense<0.000000e+00> : vector<8x256xf32>
    %58 = tpu.matmul %57, %55, %cst_38 {dimension_numbers = #tpu.dot_dimension_numbers<[1], [0], [0], [1], [0, 0, 1, 1], [], []>} : vector<8x8xf32>, vector<8x256xf32>, vector<8x256xf32> -> vector<8x256xf32>
    %59 = arith.addf %52, %58 : vector<8x256xf32>
    %c241_i32 = arith.constant 241 : i32
    %60 = tpu.dynamic_rotate %8 by %c241_i32 dim 1 : vector<8x256xf32>, i32 -> vector<8x256xf32>
    %c240_i32 = arith.constant 240 : i32
    %61 = vector.broadcast %c240_i32 : i32 to vector<8x256xi32>
    %62 = arith.cmpi slt, %0, %61 : vector<8x256xi32>
    %63 = arith.andi %62, %17 : vector<8x256xi1>
    %cst_39 = arith.constant 0.000000e+00 : f32
    %64 = vector.broadcast %cst_39 : f32 to vector<8x256xf32>
    %65 = arith.select %63, %60, %64 : vector<8x256xi1>, vector<8x256xf32>
    %c0_40 = arith.constant 0 : index
    %c6 = arith.constant 6 : index
    %c0_41 = arith.constant 0 : index
    %c0_42 = arith.constant 0 : index
    %66 = vector.load %arg2[%c0_40, %c6, %c0_41, %c0_42] : memref<6x15x8x8xf32, #tpu.memory_space<vmem>>, vector<1x1x8x8xf32>
    %67 = vector.shape_cast %66 : vector<1x1x8x8xf32> to vector<8x8xf32>
    %cst_43 = arith.constant dense<0.000000e+00> : vector<8x256xf32>
    %68 = tpu.matmul %67, %65, %cst_43 {dimension_numbers = #tpu.dot_dimension_numbers<[1], [0], [0], [1], [0, 0, 1, 1], [], []>} : vector<8x8xf32>, vector<8x256xf32>, vector<8x256xf32> -> vector<8x256xf32>
    %69 = arith.addf %59, %68 : vector<8x256xf32>
    %c240_i32_44 = arith.constant 240 : i32
    %70 = tpu.dynamic_rotate %8 by %c240_i32_44 dim 1 : vector<8x256xf32>, i32 -> vector<8x256xf32>
    %cst_45 = arith.constant 0.000000e+00 : f32
    %71 = vector.broadcast %cst_45 : f32 to vector<8x256xf32>
    %72 = arith.select %62, %70, %71 : vector<8x256xi1>, vector<8x256xf32>
    %c0_46 = arith.constant 0 : index
    %c7 = arith.constant 7 : index
    %c0_47 = arith.constant 0 : index
    %c0_48 = arith.constant 0 : index
    %73 = vector.load %arg2[%c0_46, %c7, %c0_47, %c0_48] : memref<6x15x8x8xf32, #tpu.memory_space<vmem>>, vector<1x1x8x8xf32>
    %74 = vector.shape_cast %73 : vector<1x1x8x8xf32> to vector<8x8xf32>
    %cst_49 = arith.constant dense<0.000000e+00> : vector<8x256xf32>
    %75 = tpu.matmul %74, %72, %cst_49 {dimension_numbers = #tpu.dot_dimension_numbers<[1], [0], [0], [1], [0, 0, 1, 1], [], []>} : vector<8x8xf32>, vector<8x256xf32>, vector<8x256xf32> -> vector<8x256xf32>
    %76 = arith.addf %69, %75 : vector<8x256xf32>
    %c239_i32 = arith.constant 239 : i32
    %77 = tpu.dynamic_rotate %8 by %c239_i32 dim 1 : vector<8x256xf32>, i32 -> vector<8x256xf32>
    %78 = arith.andi %62, %34 : vector<8x256xi1>
    %cst_50 = arith.constant 0.000000e+00 : f32
    %79 = vector.broadcast %cst_50 : f32 to vector<8x256xf32>
    %80 = arith.select %78, %77, %79 : vector<8x256xi1>, vector<8x256xf32>
    %c0_51 = arith.constant 0 : index
    %c8 = arith.constant 8 : index
    %c0_52 = arith.constant 0 : index
    %c0_53 = arith.constant 0 : index
    %81 = vector.load %arg2[%c0_51, %c8, %c0_52, %c0_53] : memref<6x15x8x8xf32, #tpu.memory_space<vmem>>, vector<1x1x8x8xf32>
    %82 = vector.shape_cast %81 : vector<1x1x8x8xf32> to vector<8x8xf32>
    %cst_54 = arith.constant dense<0.000000e+00> : vector<8x256xf32>
    %83 = tpu.matmul %82, %80, %cst_54 {dimension_numbers = #tpu.dot_dimension_numbers<[1], [0], [0], [1], [0, 0, 1, 1], [], []>} : vector<8x8xf32>, vector<8x256xf32>, vector<8x256xf32> -> vector<8x256xf32>
    %84 = arith.addf %76, %83 : vector<8x256xf32>
    %cst_55 = arith.constant 0.000000e+00 : f32
    %85 = vector.broadcast %cst_55 : f32 to vector<8x256xf32>
    %86 = arith.cmpf ogt, %84, %85 : vector<8x256xf32>
    %cst_56 = arith.constant 1.000000e-01 : f32
    %87 = vector.broadcast %cst_56 : f32 to vector<8x256xf32>
    %88 = arith.mulf %87, %84 : vector<8x256xf32>
    %89 = arith.select %86, %84, %88 : vector<8x256xi1>, vector<8x256xf32>
    %c1_57 = arith.constant 1 : index
    %c0_58 = arith.constant 0 : index
    %c0_59 = arith.constant 0 : index
    %90 = vector.load %arg3[%c1_57, %c0_58, %c0_59] : memref<6x8x1xf32, #tpu.memory_space<vmem>>, vector<1x8x1xf32>
    %91 = vector.shape_cast %90 : vector<1x8x1xf32> to vector<8x1xf32>
    %92 = vector.shape_cast %91 : vector<8x1xf32> to vector<8x1xf32>
    %93 = vector.broadcast %92 : vector<8x1xf32> to vector<8x256xf32>
    %c17_i32_60 = arith.constant 17 : i32
    %94 = tpu.dynamic_rotate %89 by %c17_i32_60 dim 1 : vector<8x256xf32>, i32 -> vector<8x256xf32>
    %cst_61 = arith.constant 0.000000e+00 : f32
    %95 = vector.broadcast %cst_61 : f32 to vector<8x256xf32>
    %96 = arith.select %18, %94, %95 : vector<8x256xi1>, vector<8x256xf32>
    %c1_62 = arith.constant 1 : index
    %c0_63 = arith.constant 0 : index
    %c0_64 = arith.constant 0 : index
    %c0_65 = arith.constant 0 : index
    %97 = vector.load %arg2[%c1_62, %c0_63, %c0_64, %c0_65] : memref<6x15x8x8xf32, #tpu.memory_space<vmem>>, vector<1x1x8x8xf32>
    %98 = vector.shape_cast %97 : vector<1x1x8x8xf32> to vector<8x8xf32>
    %cst_66 = arith.constant dense<0.000000e+00> : vector<8x256xf32>
    %99 = tpu.matmul %98, %96, %cst_66 {dimension_numbers = #tpu.dot_dimension_numbers<[1], [0], [0], [1], [0, 0, 1, 1], [], []>} : vector<8x8xf32>, vector<8x256xf32>, vector<8x256xf32> -> vector<8x256xf32>
    %100 = arith.addf %93, %99 : vector<8x256xf32>
    %c16_i32_67 = arith.constant 16 : i32
    %101 = tpu.dynamic_rotate %89 by %c16_i32_67 dim 1 : vector<8x256xf32>, i32 -> vector<8x256xf32>
    %cst_68 = arith.constant 0.000000e+00 : f32
    %102 = vector.broadcast %cst_68 : f32 to vector<8x256xf32>
    %103 = arith.select %15, %101, %102 : vector<8x256xi1>, vector<8x256xf32>
    %c1_69 = arith.constant 1 : index
    %c1_70 = arith.constant 1 : index
    %c0_71 = arith.constant 0 : index
    %c0_72 = arith.constant 0 : index
    %104 = vector.load %arg2[%c1_69, %c1_70, %c0_71, %c0_72] : memref<6x15x8x8xf32, #tpu.memory_space<vmem>>, vector<1x1x8x8xf32>
    %105 = vector.shape_cast %104 : vector<1x1x8x8xf32> to vector<8x8xf32>
    %cst_73 = arith.constant dense<0.000000e+00> : vector<8x256xf32>
    %106 = tpu.matmul %105, %103, %cst_73 {dimension_numbers = #tpu.dot_dimension_numbers<[1], [0], [0], [1], [0, 0, 1, 1], [], []>} : vector<8x8xf32>, vector<8x256xf32>, vector<8x256xf32> -> vector<8x256xf32>
    %107 = arith.addf %100, %106 : vector<8x256xf32>
    %c15_i32_74 = arith.constant 15 : i32
    %108 = tpu.dynamic_rotate %89 by %c15_i32_74 dim 1 : vector<8x256xf32>, i32 -> vector<8x256xf32>
    %cst_75 = arith.constant 0.000000e+00 : f32
    %109 = vector.broadcast %cst_75 : f32 to vector<8x256xf32>
    %110 = arith.select %35, %108, %109 : vector<8x256xi1>, vector<8x256xf32>
    %c1_76 = arith.constant 1 : index
    %c2_77 = arith.constant 2 : index
    %c0_78 = arith.constant 0 : index
    %c0_79 = arith.constant 0 : index
    %111 = vector.load %arg2[%c1_76, %c2_77, %c0_78, %c0_79] : memref<6x15x8x8xf32, #tpu.memory_space<vmem>>, vector<1x1x8x8xf32>
    %112 = vector.shape_cast %111 : vector<1x1x8x8xf32> to vector<8x8xf32>
    %cst_80 = arith.constant dense<0.000000e+00> : vector<8x256xf32>
    %113 = tpu.matmul %112, %110, %cst_80 {dimension_numbers = #tpu.dot_dimension_numbers<[1], [0], [0], [1], [0, 0, 1, 1], [], []>} : vector<8x8xf32>, vector<8x256xf32>, vector<8x256xf32> -> vector<8x256xf32>
    %114 = arith.addf %107, %113 : vector<8x256xf32>
    %c1_i32_81 = arith.constant 1 : i32
    %115 = tpu.dynamic_rotate %89 by %c1_i32_81 dim 1 : vector<8x256xf32>, i32 -> vector<8x256xf32>
    %cst_82 = arith.constant 0.000000e+00 : f32
    %116 = vector.broadcast %cst_82 : f32 to vector<8x256xf32>
    %117 = arith.select %17, %115, %116 : vector<8x256xi1>, vector<8x256xf32>
    %c1_83 = arith.constant 1 : index
    %c3_84 = arith.constant 3 : index
    %c0_85 = arith.constant 0 : index
    %c0_86 = arith.constant 0 : index
    %118 = vector.load %arg2[%c1_83, %c3_84, %c0_85, %c0_86] : memref<6x15x8x8xf32, #tpu.memory_space<vmem>>, vector<1x1x8x8xf32>
    %119 = vector.shape_cast %118 : vector<1x1x8x8xf32> to vector<8x8xf32>
    %cst_87 = arith.constant dense<0.000000e+00> : vector<8x256xf32>
    %120 = tpu.matmul %119, %117, %cst_87 {dimension_numbers = #tpu.dot_dimension_numbers<[1], [0], [0], [1], [0, 0, 1, 1], [], []>} : vector<8x8xf32>, vector<8x256xf32>, vector<8x256xf32> -> vector<8x256xf32>
    %121 = arith.addf %114, %120 : vector<8x256xf32>
    %c1_88 = arith.constant 1 : index
    %c4_89 = arith.constant 4 : index
    %c0_90 = arith.constant 0 : index
    %c0_91 = arith.constant 0 : index
    %122 = vector.load %arg2[%c1_88, %c4_89, %c0_90, %c0_91] : memref<6x15x8x8xf32, #tpu.memory_space<vmem>>, vector<1x1x8x8xf32>
    %123 = vector.shape_cast %122 : vector<1x1x8x8xf32> to vector<8x8xf32>
    %cst_92 = arith.constant dense<0.000000e+00> : vector<8x256xf32>
    %124 = tpu.matmul %123, %89, %cst_92 {dimension_numbers = #tpu.dot_dimension_numbers<[1], [0], [0], [1], [0, 0, 1, 1], [], []>} : vector<8x8xf32>, vector<8x256xf32>, vector<8x256xf32> -> vector<8x256xf32>
    %125 = arith.addf %121, %124 : vector<8x256xf32>
    %c255_i32_93 = arith.constant 255 : i32
    %126 = tpu.dynamic_rotate %89 by %c255_i32_93 dim 1 : vector<8x256xf32>, i32 -> vector<8x256xf32>
    %cst_94 = arith.constant 0.000000e+00 : f32
    %127 = vector.broadcast %cst_94 : f32 to vector<8x256xf32>
    %128 = arith.select %34, %126, %127 : vector<8x256xi1>, vector<8x256xf32>
    %c1_95 = arith.constant 1 : index
    %c5_96 = arith.constant 5 : index
    %c0_97 = arith.constant 0 : index
    %c0_98 = arith.constant 0 : index
    %129 = vector.load %arg2[%c1_95, %c5_96, %c0_97, %c0_98] : memref<6x15x8x8xf32, #tpu.memory_space<vmem>>, vector<1x1x8x8xf32>
    %130 = vector.shape_cast %129 : vector<1x1x8x8xf32> to vector<8x8xf32>
    %cst_99 = arith.constant dense<0.000000e+00> : vector<8x256xf32>
    %131 = tpu.matmul %130, %128, %cst_99 {dimension_numbers = #tpu.dot_dimension_numbers<[1], [0], [0], [1], [0, 0, 1, 1], [], []>} : vector<8x8xf32>, vector<8x256xf32>, vector<8x256xf32> -> vector<8x256xf32>
    %132 = arith.addf %125, %131 : vector<8x256xf32>
    %c241_i32_100 = arith.constant 241 : i32
    %133 = tpu.dynamic_rotate %89 by %c241_i32_100 dim 1 : vector<8x256xf32>, i32 -> vector<8x256xf32>
    %cst_101 = arith.constant 0.000000e+00 : f32
    %134 = vector.broadcast %cst_101 : f32 to vector<8x256xf32>
    %135 = arith.select %63, %133, %134 : vector<8x256xi1>, vector<8x256xf32>
    %c1_102 = arith.constant 1 : index
    %c6_103 = arith.constant 6 : index
    %c0_104 = arith.constant 0 : index
    %c0_105 = arith.constant 0 : index
    %136 = vector.load %arg2[%c1_102, %c6_103, %c0_104, %c0_105] : memref<6x15x8x8xf32, #tpu.memory_space<vmem>>, vector<1x1x8x8xf32>
    %137 = vector.shape_cast %136 : vector<1x1x8x8xf32> to vector<8x8xf32>
    %cst_106 = arith.constant dense<0.000000e+00> : vector<8x256xf32>
    %138 = tpu.matmul %137, %135, %cst_106 {dimension_numbers = #tpu.dot_dimension_numbers<[1], [0], [0], [1], [0, 0, 1, 1], [], []>} : vector<8x8xf32>, vector<8x256xf32>, vector<8x256xf32> -> vector<8x256xf32>
    %139 = arith.addf %132, %138 : vector<8x256xf32>
    %c240_i32_107 = arith.constant 240 : i32
    %140 = tpu.dynamic_rotate %89 by %c240_i32_107 dim 1 : vector<8x256xf32>, i32 -> vector<8x256xf32>
    %cst_108 = arith.constant 0.000000e+00 : f32
    %141 = vector.broadcast %cst_108 : f32 to vector<8x256xf32>
    %142 = arith.select %62, %140, %141 : vector<8x256xi1>, vector<8x256xf32>
    %c1_109 = arith.constant 1 : index
    %c7_110 = arith.constant 7 : index
    %c0_111 = arith.constant 0 : index
    %c0_112 = arith.constant 0 : index
    %143 = vector.load %arg2[%c1_109, %c7_110, %c0_111, %c0_112] : memref<6x15x8x8xf32, #tpu.memory_space<vmem>>, vector<1x1x8x8xf32>
    %144 = vector.shape_cast %143 : vector<1x1x8x8xf32> to vector<8x8xf32>
    %cst_113 = arith.constant dense<0.000000e+00> : vector<8x256xf32>
    %145 = tpu.matmul %144, %142, %cst_113 {dimension_numbers = #tpu.dot_dimension_numbers<[1], [0], [0], [1], [0, 0, 1, 1], [], []>} : vector<8x8xf32>, vector<8x256xf32>, vector<8x256xf32> -> vector<8x256xf32>
    %146 = arith.addf %139, %145 : vector<8x256xf32>
    %c239_i32_114 = arith.constant 239 : i32
    %147 = tpu.dynamic_rotate %89 by %c239_i32_114 dim 1 : vector<8x256xf32>, i32 -> vector<8x256xf32>
    %cst_115 = arith.constant 0.000000e+00 : f32
    %148 = vector.broadcast %cst_115 : f32 to vector<8x256xf32>
    %149 = arith.select %78, %147, %148 : vector<8x256xi1>, vector<8x256xf32>
    %c1_116 = arith.constant 1 : index
    %c8_117 = arith.constant 8 : index
    %c0_118 = arith.constant 0 : index
    %c0_119 = arith.constant 0 : index
    %150 = vector.load %arg2[%c1_116, %c8_117, %c0_118, %c0_119] : memref<6x15x8x8xf32, #tpu.memory_space<vmem>>, vector<1x1x8x8xf32>
    %151 = vector.shape_cast %150 : vector<1x1x8x8xf32> to vector<8x8xf32>
    %cst_120 = arith.constant dense<0.000000e+00> : vector<8x256xf32>
    %152 = tpu.matmul %151, %149, %cst_120 {dimension_numbers = #tpu.dot_dimension_numbers<[1], [0], [0], [1], [0, 0, 1, 1], [], []>} : vector<8x8xf32>, vector<8x256xf32>, vector<8x256xf32> -> vector<8x256xf32>
    %153 = arith.addf %146, %152 : vector<8x256xf32>
    %154 = arith.addf %3, %153 : vector<8x256xf32>
    %cst_121 = arith.constant 0.000000e+00 : f32
    %155 = vector.broadcast %cst_121 : f32 to vector<8x256xf32>
    %156 = arith.cmpf ogt, %154, %155 : vector<8x256xf32>
    %cst_122 = arith.constant 1.000000e-01 : f32
    %157 = vector.broadcast %cst_122 : f32 to vector<8x256xf32>
    %158 = arith.mulf %157, %154 : vector<8x256xf32>
    %159 = arith.select %156, %154, %158 : vector<8x256xi1>, vector<8x256xf32>
    %c2_123 = arith.constant 2 : index
    %c0_124 = arith.constant 0 : index
    %c0_125 = arith.constant 0 : index
    %160 = vector.load %arg3[%c2_123, %c0_124, %c0_125] : memref<6x8x1xf32, #tpu.memory_space<vmem>>, vector<1x8x1xf32>
    %161 = vector.shape_cast %160 : vector<1x8x1xf32> to vector<8x1xf32>
    %162 = vector.shape_cast %161 : vector<8x1xf32> to vector<8x1xf32>
    %163 = vector.broadcast %162 : vector<8x1xf32> to vector<8x256xf32>
    %c50_i32 = arith.constant 50 : i32
    %164 = tpu.dynamic_rotate %159 by %c50_i32 dim 1 : vector<8x256xf32>, i32 -> vector<8x256xf32>
    %c48_i32 = arith.constant 48 : i32
    %165 = vector.broadcast %c48_i32 : i32 to vector<8x256xi32>
    %166 = arith.cmpi sge, %0, %165 : vector<8x256xi32>
    %c2_i32 = arith.constant 2 : i32
    %167 = vector.broadcast %c2_i32 : i32 to vector<8x256xi32>
    %168 = arith.cmpi sge, %2, %167 : vector<8x256xi32>
    %169 = arith.andi %166, %168 : vector<8x256xi1>
    %cst_126 = arith.constant 0.000000e+00 : f32
    %170 = vector.broadcast %cst_126 : f32 to vector<8x256xf32>
    %171 = arith.select %169, %164, %170 : vector<8x256xi1>, vector<8x256xf32>
    %c2_127 = arith.constant 2 : index
    %c0_128 = arith.constant 0 : index
    %c0_129 = arith.constant 0 : index
    %c0_130 = arith.constant 0 : index
    %172 = vector.load %arg2[%c2_127, %c0_128, %c0_129, %c0_130] : memref<6x15x8x8xf32, #tpu.memory_space<vmem>>, vector<1x1x8x8xf32>
    %173 = vector.shape_cast %172 : vector<1x1x8x8xf32> to vector<8x8xf32>
    %cst_131 = arith.constant dense<0.000000e+00> : vector<8x256xf32>
    %174 = tpu.matmul %173, %171, %cst_131 {dimension_numbers = #tpu.dot_dimension_numbers<[1], [0], [0], [1], [0, 0, 1, 1], [], []>} : vector<8x8xf32>, vector<8x256xf32>, vector<8x256xf32> -> vector<8x256xf32>
    %175 = arith.addf %163, %174 : vector<8x256xf32>
    %c49_i32 = arith.constant 49 : i32
    %176 = tpu.dynamic_rotate %159 by %c49_i32 dim 1 : vector<8x256xf32>, i32 -> vector<8x256xf32>
    %177 = arith.andi %166, %17 : vector<8x256xi1>
    %cst_132 = arith.constant 0.000000e+00 : f32
    %178 = vector.broadcast %cst_132 : f32 to vector<8x256xf32>
    %179 = arith.select %177, %176, %178 : vector<8x256xi1>, vector<8x256xf32>
    %c2_133 = arith.constant 2 : index
    %c1_134 = arith.constant 1 : index
    %c0_135 = arith.constant 0 : index
    %c0_136 = arith.constant 0 : index
    %180 = vector.load %arg2[%c2_133, %c1_134, %c0_135, %c0_136] : memref<6x15x8x8xf32, #tpu.memory_space<vmem>>, vector<1x1x8x8xf32>
    %181 = vector.shape_cast %180 : vector<1x1x8x8xf32> to vector<8x8xf32>
    %cst_137 = arith.constant dense<0.000000e+00> : vector<8x256xf32>
    %182 = tpu.matmul %181, %179, %cst_137 {dimension_numbers = #tpu.dot_dimension_numbers<[1], [0], [0], [1], [0, 0, 1, 1], [], []>} : vector<8x8xf32>, vector<8x256xf32>, vector<8x256xf32> -> vector<8x256xf32>
    %183 = arith.addf %175, %182 : vector<8x256xf32>
    %c48_i32_138 = arith.constant 48 : i32
    %184 = tpu.dynamic_rotate %159 by %c48_i32_138 dim 1 : vector<8x256xf32>, i32 -> vector<8x256xf32>
    %cst_139 = arith.constant 0.000000e+00 : f32
    %185 = vector.broadcast %cst_139 : f32 to vector<8x256xf32>
    %186 = arith.select %166, %184, %185 : vector<8x256xi1>, vector<8x256xf32>
    %c2_140 = arith.constant 2 : index
    %c2_141 = arith.constant 2 : index
    %c0_142 = arith.constant 0 : index
    %c0_143 = arith.constant 0 : index
    %187 = vector.load %arg2[%c2_140, %c2_141, %c0_142, %c0_143] : memref<6x15x8x8xf32, #tpu.memory_space<vmem>>, vector<1x1x8x8xf32>
    %188 = vector.shape_cast %187 : vector<1x1x8x8xf32> to vector<8x8xf32>
    %cst_144 = arith.constant dense<0.000000e+00> : vector<8x256xf32>
    %189 = tpu.matmul %188, %186, %cst_144 {dimension_numbers = #tpu.dot_dimension_numbers<[1], [0], [0], [1], [0, 0, 1, 1], [], []>} : vector<8x8xf32>, vector<8x256xf32>, vector<8x256xf32> -> vector<8x256xf32>
    %190 = arith.addf %183, %189 : vector<8x256xf32>
    %c47_i32 = arith.constant 47 : i32
    %191 = tpu.dynamic_rotate %159 by %c47_i32 dim 1 : vector<8x256xf32>, i32 -> vector<8x256xf32>
    %192 = arith.andi %166, %34 : vector<8x256xi1>
    %cst_145 = arith.constant 0.000000e+00 : f32
    %193 = vector.broadcast %cst_145 : f32 to vector<8x256xf32>
    %194 = arith.select %192, %191, %193 : vector<8x256xi1>, vector<8x256xf32>
    %c2_146 = arith.constant 2 : index
    %c3_147 = arith.constant 3 : index
    %c0_148 = arith.constant 0 : index
    %c0_149 = arith.constant 0 : index
    %195 = vector.load %arg2[%c2_146, %c3_147, %c0_148, %c0_149] : memref<6x15x8x8xf32, #tpu.memory_space<vmem>>, vector<1x1x8x8xf32>
    %196 = vector.shape_cast %195 : vector<1x1x8x8xf32> to vector<8x8xf32>
    %cst_150 = arith.constant dense<0.000000e+00> : vector<8x256xf32>
    %197 = tpu.matmul %196, %194, %cst_150 {dimension_numbers = #tpu.dot_dimension_numbers<[1], [0], [0], [1], [0, 0, 1, 1], [], []>} : vector<8x8xf32>, vector<8x256xf32>, vector<8x256xf32> -> vector<8x256xf32>
    %198 = arith.addf %190, %197 : vector<8x256xf32>
    %c46_i32 = arith.constant 46 : i32
    %199 = tpu.dynamic_rotate %159 by %c46_i32 dim 1 : vector<8x256xf32>, i32 -> vector<8x256xf32>
    %c14_i32 = arith.constant 14 : i32
    %200 = vector.broadcast %c14_i32 : i32 to vector<8x256xi32>
    %201 = arith.cmpi slt, %2, %200 : vector<8x256xi32>
    %202 = arith.andi %166, %201 : vector<8x256xi1>
    %cst_151 = arith.constant 0.000000e+00 : f32
    %203 = vector.broadcast %cst_151 : f32 to vector<8x256xf32>
    %204 = arith.select %202, %199, %203 : vector<8x256xi1>, vector<8x256xf32>
    %c2_152 = arith.constant 2 : index
    %c4_153 = arith.constant 4 : index
    %c0_154 = arith.constant 0 : index
    %c0_155 = arith.constant 0 : index
    %205 = vector.load %arg2[%c2_152, %c4_153, %c0_154, %c0_155] : memref<6x15x8x8xf32, #tpu.memory_space<vmem>>, vector<1x1x8x8xf32>
    %206 = vector.shape_cast %205 : vector<1x1x8x8xf32> to vector<8x8xf32>
    %cst_156 = arith.constant dense<0.000000e+00> : vector<8x256xf32>
    %207 = tpu.matmul %206, %204, %cst_156 {dimension_numbers = #tpu.dot_dimension_numbers<[1], [0], [0], [1], [0, 0, 1, 1], [], []>} : vector<8x8xf32>, vector<8x256xf32>, vector<8x256xf32> -> vector<8x256xf32>
    %208 = arith.addf %198, %207 : vector<8x256xf32>
    %c2_i32_157 = arith.constant 2 : i32
    %209 = tpu.dynamic_rotate %159 by %c2_i32_157 dim 1 : vector<8x256xf32>, i32 -> vector<8x256xf32>
    %cst_158 = arith.constant 0.000000e+00 : f32
    %210 = vector.broadcast %cst_158 : f32 to vector<8x256xf32>
    %211 = arith.select %168, %209, %210 : vector<8x256xi1>, vector<8x256xf32>
    %c2_159 = arith.constant 2 : index
    %c5_160 = arith.constant 5 : index
    %c0_161 = arith.constant 0 : index
    %c0_162 = arith.constant 0 : index
    %212 = vector.load %arg2[%c2_159, %c5_160, %c0_161, %c0_162] : memref<6x15x8x8xf32, #tpu.memory_space<vmem>>, vector<1x1x8x8xf32>
    %213 = vector.shape_cast %212 : vector<1x1x8x8xf32> to vector<8x8xf32>
    %cst_163 = arith.constant dense<0.000000e+00> : vector<8x256xf32>
    %214 = tpu.matmul %213, %211, %cst_163 {dimension_numbers = #tpu.dot_dimension_numbers<[1], [0], [0], [1], [0, 0, 1, 1], [], []>} : vector<8x8xf32>, vector<8x256xf32>, vector<8x256xf32> -> vector<8x256xf32>
    %215 = arith.addf %208, %214 : vector<8x256xf32>
    %c1_i32_164 = arith.constant 1 : i32
    %216 = tpu.dynamic_rotate %159 by %c1_i32_164 dim 1 : vector<8x256xf32>, i32 -> vector<8x256xf32>
    %cst_165 = arith.constant 0.000000e+00 : f32
    %217 = vector.broadcast %cst_165 : f32 to vector<8x256xf32>
    %218 = arith.select %17, %216, %217 : vector<8x256xi1>, vector<8x256xf32>
    %c2_166 = arith.constant 2 : index
    %c6_167 = arith.constant 6 : index
    %c0_168 = arith.constant 0 : index
    %c0_169 = arith.constant 0 : index
    %219 = vector.load %arg2[%c2_166, %c6_167, %c0_168, %c0_169] : memref<6x15x8x8xf32, #tpu.memory_space<vmem>>, vector<1x1x8x8xf32>
    %220 = vector.shape_cast %219 : vector<1x1x8x8xf32> to vector<8x8xf32>
    %cst_170 = arith.constant dense<0.000000e+00> : vector<8x256xf32>
    %221 = tpu.matmul %220, %218, %cst_170 {dimension_numbers = #tpu.dot_dimension_numbers<[1], [0], [0], [1], [0, 0, 1, 1], [], []>} : vector<8x8xf32>, vector<8x256xf32>, vector<8x256xf32> -> vector<8x256xf32>
    %222 = arith.addf %215, %221 : vector<8x256xf32>
    %c2_171 = arith.constant 2 : index
    %c7_172 = arith.constant 7 : index
    %c0_173 = arith.constant 0 : index
    %c0_174 = arith.constant 0 : index
    %223 = vector.load %arg2[%c2_171, %c7_172, %c0_173, %c0_174] : memref<6x15x8x8xf32, #tpu.memory_space<vmem>>, vector<1x1x8x8xf32>
    %224 = vector.shape_cast %223 : vector<1x1x8x8xf32> to vector<8x8xf32>
    %cst_175 = arith.constant dense<0.000000e+00> : vector<8x256xf32>
    %225 = tpu.matmul %224, %159, %cst_175 {dimension_numbers = #tpu.dot_dimension_numbers<[1], [0], [0], [1], [0, 0, 1, 1], [], []>} : vector<8x8xf32>, vector<8x256xf32>, vector<8x256xf32> -> vector<8x256xf32>
    %226 = arith.addf %222, %225 : vector<8x256xf32>
    %c255_i32_176 = arith.constant 255 : i32
    %227 = tpu.dynamic_rotate %159 by %c255_i32_176 dim 1 : vector<8x256xf32>, i32 -> vector<8x256xf32>
    %cst_177 = arith.constant 0.000000e+00 : f32
    %228 = vector.broadcast %cst_177 : f32 to vector<8x256xf32>
    %229 = arith.select %34, %227, %228 : vector<8x256xi1>, vector<8x256xf32>
    %c2_178 = arith.constant 2 : index
    %c8_179 = arith.constant 8 : index
    %c0_180 = arith.constant 0 : index
    %c0_181 = arith.constant 0 : index
    %230 = vector.load %arg2[%c2_178, %c8_179, %c0_180, %c0_181] : memref<6x15x8x8xf32, #tpu.memory_space<vmem>>, vector<1x1x8x8xf32>
    %231 = vector.shape_cast %230 : vector<1x1x8x8xf32> to vector<8x8xf32>
    %cst_182 = arith.constant dense<0.000000e+00> : vector<8x256xf32>
    %232 = tpu.matmul %231, %229, %cst_182 {dimension_numbers = #tpu.dot_dimension_numbers<[1], [0], [0], [1], [0, 0, 1, 1], [], []>} : vector<8x8xf32>, vector<8x256xf32>, vector<8x256xf32> -> vector<8x256xf32>
    %233 = arith.addf %226, %232 : vector<8x256xf32>
    %c254_i32 = arith.constant 254 : i32
    %234 = tpu.dynamic_rotate %159 by %c254_i32 dim 1 : vector<8x256xf32>, i32 -> vector<8x256xf32>
    %cst_183 = arith.constant 0.000000e+00 : f32
    %235 = vector.broadcast %cst_183 : f32 to vector<8x256xf32>
    %236 = arith.select %201, %234, %235 : vector<8x256xi1>, vector<8x256xf32>
    %c2_184 = arith.constant 2 : index
    %c9 = arith.constant 9 : index
    %c0_185 = arith.constant 0 : index
    %c0_186 = arith.constant 0 : index
    %237 = vector.load %arg2[%c2_184, %c9, %c0_185, %c0_186] : memref<6x15x8x8xf32, #tpu.memory_space<vmem>>, vector<1x1x8x8xf32>
    %238 = vector.shape_cast %237 : vector<1x1x8x8xf32> to vector<8x8xf32>
    %cst_187 = arith.constant dense<0.000000e+00> : vector<8x256xf32>
    %239 = tpu.matmul %238, %236, %cst_187 {dimension_numbers = #tpu.dot_dimension_numbers<[1], [0], [0], [1], [0, 0, 1, 1], [], []>} : vector<8x8xf32>, vector<8x256xf32>, vector<8x256xf32> -> vector<8x256xf32>
    %240 = arith.addf %233, %239 : vector<8x256xf32>
    %c210_i32 = arith.constant 210 : i32
    %241 = tpu.dynamic_rotate %159 by %c210_i32 dim 1 : vector<8x256xf32>, i32 -> vector<8x256xf32>
    %c208_i32 = arith.constant 208 : i32
    %242 = vector.broadcast %c208_i32 : i32 to vector<8x256xi32>
    %243 = arith.cmpi slt, %0, %242 : vector<8x256xi32>
    %244 = arith.andi %243, %168 : vector<8x256xi1>
    %cst_188 = arith.constant 0.000000e+00 : f32
    %245 = vector.broadcast %cst_188 : f32 to vector<8x256xf32>
    %246 = arith.select %244, %241, %245 : vector<8x256xi1>, vector<8x256xf32>
    %c2_189 = arith.constant 2 : index
    %c10 = arith.constant 10 : index
    %c0_190 = arith.constant 0 : index
    %c0_191 = arith.constant 0 : index
    %247 = vector.load %arg2[%c2_189, %c10, %c0_190, %c0_191] : memref<6x15x8x8xf32, #tpu.memory_space<vmem>>, vector<1x1x8x8xf32>
    %248 = vector.shape_cast %247 : vector<1x1x8x8xf32> to vector<8x8xf32>
    %cst_192 = arith.constant dense<0.000000e+00> : vector<8x256xf32>
    %249 = tpu.matmul %248, %246, %cst_192 {dimension_numbers = #tpu.dot_dimension_numbers<[1], [0], [0], [1], [0, 0, 1, 1], [], []>} : vector<8x8xf32>, vector<8x256xf32>, vector<8x256xf32> -> vector<8x256xf32>
    %250 = arith.addf %240, %249 : vector<8x256xf32>
    %c209_i32 = arith.constant 209 : i32
    %251 = tpu.dynamic_rotate %159 by %c209_i32 dim 1 : vector<8x256xf32>, i32 -> vector<8x256xf32>
    %252 = arith.andi %243, %17 : vector<8x256xi1>
    %cst_193 = arith.constant 0.000000e+00 : f32
    %253 = vector.broadcast %cst_193 : f32 to vector<8x256xf32>
    %254 = arith.select %252, %251, %253 : vector<8x256xi1>, vector<8x256xf32>
    %c2_194 = arith.constant 2 : index
    %c11 = arith.constant 11 : index
    %c0_195 = arith.constant 0 : index
    %c0_196 = arith.constant 0 : index
    %255 = vector.load %arg2[%c2_194, %c11, %c0_195, %c0_196] : memref<6x15x8x8xf32, #tpu.memory_space<vmem>>, vector<1x1x8x8xf32>
    %256 = vector.shape_cast %255 : vector<1x1x8x8xf32> to vector<8x8xf32>
    %cst_197 = arith.constant dense<0.000000e+00> : vector<8x256xf32>
    %257 = tpu.matmul %256, %254, %cst_197 {dimension_numbers = #tpu.dot_dimension_numbers<[1], [0], [0], [1], [0, 0, 1, 1], [], []>} : vector<8x8xf32>, vector<8x256xf32>, vector<8x256xf32> -> vector<8x256xf32>
    %258 = arith.addf %250, %257 : vector<8x256xf32>
    %c208_i32_198 = arith.constant 208 : i32
    %259 = tpu.dynamic_rotate %159 by %c208_i32_198 dim 1 : vector<8x256xf32>, i32 -> vector<8x256xf32>
    %cst_199 = arith.constant 0.000000e+00 : f32
    %260 = vector.broadcast %cst_199 : f32 to vector<8x256xf32>
    %261 = arith.select %243, %259, %260 : vector<8x256xi1>, vector<8x256xf32>
    %c2_200 = arith.constant 2 : index
    %c12 = arith.constant 12 : index
    %c0_201 = arith.constant 0 : index
    %c0_202 = arith.constant 0 : index
    %262 = vector.load %arg2[%c2_200, %c12, %c0_201, %c0_202] : memref<6x15x8x8xf32, #tpu.memory_space<vmem>>, vector<1x1x8x8xf32>
    %263 = vector.shape_cast %262 : vector<1x1x8x8xf32> to vector<8x8xf32>
    %cst_203 = arith.constant dense<0.000000e+00> : vector<8x256xf32>
    %264 = tpu.matmul %263, %261, %cst_203 {dimension_numbers = #tpu.dot_dimension_numbers<[1], [0], [0], [1], [0, 0, 1, 1], [], []>} : vector<8x8xf32>, vector<8x256xf32>, vector<8x256xf32> -> vector<8x256xf32>
    %265 = arith.addf %258, %264 : vector<8x256xf32>
    %c207_i32 = arith.constant 207 : i32
    %266 = tpu.dynamic_rotate %159 by %c207_i32 dim 1 : vector<8x256xf32>, i32 -> vector<8x256xf32>
    %267 = arith.andi %243, %34 : vector<8x256xi1>
    %cst_204 = arith.constant 0.000000e+00 : f32
    %268 = vector.broadcast %cst_204 : f32 to vector<8x256xf32>
    %269 = arith.select %267, %266, %268 : vector<8x256xi1>, vector<8x256xf32>
    %c2_205 = arith.constant 2 : index
    %c13 = arith.constant 13 : index
    %c0_206 = arith.constant 0 : index
    %c0_207 = arith.constant 0 : index
    %270 = vector.load %arg2[%c2_205, %c13, %c0_206, %c0_207] : memref<6x15x8x8xf32, #tpu.memory_space<vmem>>, vector<1x1x8x8xf32>
    %271 = vector.shape_cast %270 : vector<1x1x8x8xf32> to vector<8x8xf32>
    %cst_208 = arith.constant dense<0.000000e+00> : vector<8x256xf32>
    %272 = tpu.matmul %271, %269, %cst_208 {dimension_numbers = #tpu.dot_dimension_numbers<[1], [0], [0], [1], [0, 0, 1, 1], [], []>} : vector<8x8xf32>, vector<8x256xf32>, vector<8x256xf32> -> vector<8x256xf32>
    %273 = arith.addf %265, %272 : vector<8x256xf32>
    %c206_i32 = arith.constant 206 : i32
    %274 = tpu.dynamic_rotate %159 by %c206_i32 dim 1 : vector<8x256xf32>, i32 -> vector<8x256xf32>
    %275 = arith.andi %243, %201 : vector<8x256xi1>
    %cst_209 = arith.constant 0.000000e+00 : f32
    %276 = vector.broadcast %cst_209 : f32 to vector<8x256xf32>
    %277 = arith.select %275, %274, %276 : vector<8x256xi1>, vector<8x256xf32>
    %c2_210 = arith.constant 2 : index
    %c14 = arith.constant 14 : index
    %c0_211 = arith.constant 0 : index
    %c0_212 = arith.constant 0 : index
    %278 = vector.load %arg2[%c2_210, %c14, %c0_211, %c0_212] : memref<6x15x8x8xf32, #tpu.memory_space<vmem>>, vector<1x1x8x8xf32>
    %279 = vector.shape_cast %278 : vector<1x1x8x8xf32> to vector<8x8xf32>
    %cst_213 = arith.constant dense<0.000000e+00> : vector<8x256xf32>
    %280 = tpu.matmul %279, %277, %cst_213 {dimension_numbers = #tpu.dot_dimension_numbers<[1], [0], [0], [1], [0, 0, 1, 1], [], []>} : vector<8x8xf32>, vector<8x256xf32>, vector<8x256xf32> -> vector<8x256xf32>
    %281 = arith.addf %273, %280 : vector<8x256xf32>
    %cst_214 = arith.constant 0.000000e+00 : f32
    %282 = vector.broadcast %cst_214 : f32 to vector<8x256xf32>
    %283 = arith.cmpf ogt, %281, %282 : vector<8x256xf32>
    %cst_215 = arith.constant 1.000000e-01 : f32
    %284 = vector.broadcast %cst_215 : f32 to vector<8x256xf32>
    %285 = arith.mulf %284, %281 : vector<8x256xf32>
    %286 = arith.select %283, %281, %285 : vector<8x256xi1>, vector<8x256xf32>
    %c3_216 = arith.constant 3 : index
    %c0_217 = arith.constant 0 : index
    %c0_218 = arith.constant 0 : index
    %287 = vector.load %arg3[%c3_216, %c0_217, %c0_218] : memref<6x8x1xf32, #tpu.memory_space<vmem>>, vector<1x8x1xf32>
    %288 = vector.shape_cast %287 : vector<1x8x1xf32> to vector<8x1xf32>
    %289 = vector.shape_cast %288 : vector<8x1xf32> to vector<8x1xf32>
    %290 = vector.broadcast %289 : vector<8x1xf32> to vector<8x256xf32>
    %c18_i32 = arith.constant 18 : i32
    %291 = tpu.dynamic_rotate %286 by %c18_i32 dim 1 : vector<8x256xf32>, i32 -> vector<8x256xf32>
    %292 = arith.andi %15, %168 : vector<8x256xi1>
    %cst_219 = arith.constant 0.000000e+00 : f32
    %293 = vector.broadcast %cst_219 : f32 to vector<8x256xf32>
    %294 = arith.select %292, %291, %293 : vector<8x256xi1>, vector<8x256xf32>
    %c3_220 = arith.constant 3 : index
    %c0_221 = arith.constant 0 : index
    %c0_222 = arith.constant 0 : index
    %c0_223 = arith.constant 0 : index
    %295 = vector.load %arg2[%c3_220, %c0_221, %c0_222, %c0_223] : memref<6x15x8x8xf32, #tpu.memory_space<vmem>>, vector<1x1x8x8xf32>
    %296 = vector.shape_cast %295 : vector<1x1x8x8xf32> to vector<8x8xf32>
    %cst_224 = arith.constant dense<0.000000e+00> : vector<8x256xf32>
    %297 = tpu.matmul %296, %294, %cst_224 {dimension_numbers = #tpu.dot_dimension_numbers<[1], [0], [0], [1], [0, 0, 1, 1], [], []>} : vector<8x8xf32>, vector<8x256xf32>, vector<8x256xf32> -> vector<8x256xf32>
    %298 = arith.addf %290, %297 : vector<8x256xf32>
    %c17_i32_225 = arith.constant 17 : i32
    %299 = tpu.dynamic_rotate %286 by %c17_i32_225 dim 1 : vector<8x256xf32>, i32 -> vector<8x256xf32>
    %cst_226 = arith.constant 0.000000e+00 : f32
    %300 = vector.broadcast %cst_226 : f32 to vector<8x256xf32>
    %301 = arith.select %18, %299, %300 : vector<8x256xi1>, vector<8x256xf32>
    %c3_227 = arith.constant 3 : index
    %c1_228 = arith.constant 1 : index
    %c0_229 = arith.constant 0 : index
    %c0_230 = arith.constant 0 : index
    %302 = vector.load %arg2[%c3_227, %c1_228, %c0_229, %c0_230] : memref<6x15x8x8xf32, #tpu.memory_space<vmem>>, vector<1x1x8x8xf32>
    %303 = vector.shape_cast %302 : vector<1x1x8x8xf32> to vector<8x8xf32>
    %cst_231 = arith.constant dense<0.000000e+00> : vector<8x256xf32>
    %304 = tpu.matmul %303, %301, %cst_231 {dimension_numbers = #tpu.dot_dimension_numbers<[1], [0], [0], [1], [0, 0, 1, 1], [], []>} : vector<8x8xf32>, vector<8x256xf32>, vector<8x256xf32> -> vector<8x256xf32>
    %305 = arith.addf %298, %304 : vector<8x256xf32>
    %c16_i32_232 = arith.constant 16 : i32
    %306 = tpu.dynamic_rotate %286 by %c16_i32_232 dim 1 : vector<8x256xf32>, i32 -> vector<8x256xf32>
    %cst_233 = arith.constant 0.000000e+00 : f32
    %307 = vector.broadcast %cst_233 : f32 to vector<8x256xf32>
    %308 = arith.select %15, %306, %307 : vector<8x256xi1>, vector<8x256xf32>
    %c3_234 = arith.constant 3 : index
    %c2_235 = arith.constant 2 : index
    %c0_236 = arith.constant 0 : index
    %c0_237 = arith.constant 0 : index
    %309 = vector.load %arg2[%c3_234, %c2_235, %c0_236, %c0_237] : memref<6x15x8x8xf32, #tpu.memory_space<vmem>>, vector<1x1x8x8xf32>
    %310 = vector.shape_cast %309 : vector<1x1x8x8xf32> to vector<8x8xf32>
    %cst_238 = arith.constant dense<0.000000e+00> : vector<8x256xf32>
    %311 = tpu.matmul %310, %308, %cst_238 {dimension_numbers = #tpu.dot_dimension_numbers<[1], [0], [0], [1], [0, 0, 1, 1], [], []>} : vector<8x8xf32>, vector<8x256xf32>, vector<8x256xf32> -> vector<8x256xf32>
    %312 = arith.addf %305, %311 : vector<8x256xf32>
    %c15_i32_239 = arith.constant 15 : i32
    %313 = tpu.dynamic_rotate %286 by %c15_i32_239 dim 1 : vector<8x256xf32>, i32 -> vector<8x256xf32>
    %cst_240 = arith.constant 0.000000e+00 : f32
    %314 = vector.broadcast %cst_240 : f32 to vector<8x256xf32>
    %315 = arith.select %35, %313, %314 : vector<8x256xi1>, vector<8x256xf32>
    %c3_241 = arith.constant 3 : index
    %c3_242 = arith.constant 3 : index
    %c0_243 = arith.constant 0 : index
    %c0_244 = arith.constant 0 : index
    %316 = vector.load %arg2[%c3_241, %c3_242, %c0_243, %c0_244] : memref<6x15x8x8xf32, #tpu.memory_space<vmem>>, vector<1x1x8x8xf32>
    %317 = vector.shape_cast %316 : vector<1x1x8x8xf32> to vector<8x8xf32>
    %cst_245 = arith.constant dense<0.000000e+00> : vector<8x256xf32>
    %318 = tpu.matmul %317, %315, %cst_245 {dimension_numbers = #tpu.dot_dimension_numbers<[1], [0], [0], [1], [0, 0, 1, 1], [], []>} : vector<8x8xf32>, vector<8x256xf32>, vector<8x256xf32> -> vector<8x256xf32>
    %319 = arith.addf %312, %318 : vector<8x256xf32>
    %c14_i32_246 = arith.constant 14 : i32
    %320 = tpu.dynamic_rotate %286 by %c14_i32_246 dim 1 : vector<8x256xf32>, i32 -> vector<8x256xf32>
    %321 = arith.andi %15, %201 : vector<8x256xi1>
    %cst_247 = arith.constant 0.000000e+00 : f32
    %322 = vector.broadcast %cst_247 : f32 to vector<8x256xf32>
    %323 = arith.select %321, %320, %322 : vector<8x256xi1>, vector<8x256xf32>
    %c3_248 = arith.constant 3 : index
    %c4_249 = arith.constant 4 : index
    %c0_250 = arith.constant 0 : index
    %c0_251 = arith.constant 0 : index
    %324 = vector.load %arg2[%c3_248, %c4_249, %c0_250, %c0_251] : memref<6x15x8x8xf32, #tpu.memory_space<vmem>>, vector<1x1x8x8xf32>
    %325 = vector.shape_cast %324 : vector<1x1x8x8xf32> to vector<8x8xf32>
    %cst_252 = arith.constant dense<0.000000e+00> : vector<8x256xf32>
    %326 = tpu.matmul %325, %323, %cst_252 {dimension_numbers = #tpu.dot_dimension_numbers<[1], [0], [0], [1], [0, 0, 1, 1], [], []>} : vector<8x8xf32>, vector<8x256xf32>, vector<8x256xf32> -> vector<8x256xf32>
    %327 = arith.addf %319, %326 : vector<8x256xf32>
    %c2_i32_253 = arith.constant 2 : i32
    %328 = tpu.dynamic_rotate %286 by %c2_i32_253 dim 1 : vector<8x256xf32>, i32 -> vector<8x256xf32>
    %cst_254 = arith.constant 0.000000e+00 : f32
    %329 = vector.broadcast %cst_254 : f32 to vector<8x256xf32>
    %330 = arith.select %168, %328, %329 : vector<8x256xi1>, vector<8x256xf32>
    %c3_255 = arith.constant 3 : index
    %c5_256 = arith.constant 5 : index
    %c0_257 = arith.constant 0 : index
    %c0_258 = arith.constant 0 : index
    %331 = vector.load %arg2[%c3_255, %c5_256, %c0_257, %c0_258] : memref<6x15x8x8xf32, #tpu.memory_space<vmem>>, vector<1x1x8x8xf32>
    %332 = vector.shape_cast %331 : vector<1x1x8x8xf32> to vector<8x8xf32>
    %cst_259 = arith.constant dense<0.000000e+00> : vector<8x256xf32>
    %333 = tpu.matmul %332, %330, %cst_259 {dimension_numbers = #tpu.dot_dimension_numbers<[1], [0], [0], [1], [0, 0, 1, 1], [], []>} : vector<8x8xf32>, vector<8x256xf32>, vector<8x256xf32> -> vector<8x256xf32>
    %334 = arith.addf %327, %333 : vector<8x256xf32>
    %c1_i32_260 = arith.constant 1 : i32
    %335 = tpu.dynamic_rotate %286 by %c1_i32_260 dim 1 : vector<8x256xf32>, i32 -> vector<8x256xf32>
    %cst_261 = arith.constant 0.000000e+00 : f32
    %336 = vector.broadcast %cst_261 : f32 to vector<8x256xf32>
    %337 = arith.select %17, %335, %336 : vector<8x256xi1>, vector<8x256xf32>
    %c3_262 = arith.constant 3 : index
    %c6_263 = arith.constant 6 : index
    %c0_264 = arith.constant 0 : index
    %c0_265 = arith.constant 0 : index
    %338 = vector.load %arg2[%c3_262, %c6_263, %c0_264, %c0_265] : memref<6x15x8x8xf32, #tpu.memory_space<vmem>>, vector<1x1x8x8xf32>
    %339 = vector.shape_cast %338 : vector<1x1x8x8xf32> to vector<8x8xf32>
    %cst_266 = arith.constant dense<0.000000e+00> : vector<8x256xf32>
    %340 = tpu.matmul %339, %337, %cst_266 {dimension_numbers = #tpu.dot_dimension_numbers<[1], [0], [0], [1], [0, 0, 1, 1], [], []>} : vector<8x8xf32>, vector<8x256xf32>, vector<8x256xf32> -> vector<8x256xf32>
    %341 = arith.addf %334, %340 : vector<8x256xf32>
    %c3_267 = arith.constant 3 : index
    %c7_268 = arith.constant 7 : index
    %c0_269 = arith.constant 0 : index
    %c0_270 = arith.constant 0 : index
    %342 = vector.load %arg2[%c3_267, %c7_268, %c0_269, %c0_270] : memref<6x15x8x8xf32, #tpu.memory_space<vmem>>, vector<1x1x8x8xf32>
    %343 = vector.shape_cast %342 : vector<1x1x8x8xf32> to vector<8x8xf32>
    %cst_271 = arith.constant dense<0.000000e+00> : vector<8x256xf32>
    %344 = tpu.matmul %343, %286, %cst_271 {dimension_numbers = #tpu.dot_dimension_numbers<[1], [0], [0], [1], [0, 0, 1, 1], [], []>} : vector<8x8xf32>, vector<8x256xf32>, vector<8x256xf32> -> vector<8x256xf32>
    %345 = arith.addf %341, %344 : vector<8x256xf32>
    %c255_i32_272 = arith.constant 255 : i32
    %346 = tpu.dynamic_rotate %286 by %c255_i32_272 dim 1 : vector<8x256xf32>, i32 -> vector<8x256xf32>
    %cst_273 = arith.constant 0.000000e+00 : f32
    %347 = vector.broadcast %cst_273 : f32 to vector<8x256xf32>
    %348 = arith.select %34, %346, %347 : vector<8x256xi1>, vector<8x256xf32>
    %c3_274 = arith.constant 3 : index
    %c8_275 = arith.constant 8 : index
    %c0_276 = arith.constant 0 : index
    %c0_277 = arith.constant 0 : index
    %349 = vector.load %arg2[%c3_274, %c8_275, %c0_276, %c0_277] : memref<6x15x8x8xf32, #tpu.memory_space<vmem>>, vector<1x1x8x8xf32>
    %350 = vector.shape_cast %349 : vector<1x1x8x8xf32> to vector<8x8xf32>
    %cst_278 = arith.constant dense<0.000000e+00> : vector<8x256xf32>
    %351 = tpu.matmul %350, %348, %cst_278 {dimension_numbers = #tpu.dot_dimension_numbers<[1], [0], [0], [1], [0, 0, 1, 1], [], []>} : vector<8x8xf32>, vector<8x256xf32>, vector<8x256xf32> -> vector<8x256xf32>
    %352 = arith.addf %345, %351 : vector<8x256xf32>
    %c254_i32_279 = arith.constant 254 : i32
    %353 = tpu.dynamic_rotate %286 by %c254_i32_279 dim 1 : vector<8x256xf32>, i32 -> vector<8x256xf32>
    %cst_280 = arith.constant 0.000000e+00 : f32
    %354 = vector.broadcast %cst_280 : f32 to vector<8x256xf32>
    %355 = arith.select %201, %353, %354 : vector<8x256xi1>, vector<8x256xf32>
    %c3_281 = arith.constant 3 : index
    %c9_282 = arith.constant 9 : index
    %c0_283 = arith.constant 0 : index
    %c0_284 = arith.constant 0 : index
    %356 = vector.load %arg2[%c3_281, %c9_282, %c0_283, %c0_284] : memref<6x15x8x8xf32, #tpu.memory_space<vmem>>, vector<1x1x8x8xf32>
    %357 = vector.shape_cast %356 : vector<1x1x8x8xf32> to vector<8x8xf32>
    %cst_285 = arith.constant dense<0.000000e+00> : vector<8x256xf32>
    %358 = tpu.matmul %357, %355, %cst_285 {dimension_numbers = #tpu.dot_dimension_numbers<[1], [0], [0], [1], [0, 0, 1, 1], [], []>} : vector<8x8xf32>, vector<8x256xf32>, vector<8x256xf32> -> vector<8x256xf32>
    %359 = arith.addf %352, %358 : vector<8x256xf32>
    %c242_i32 = arith.constant 242 : i32
    %360 = tpu.dynamic_rotate %286 by %c242_i32 dim 1 : vector<8x256xf32>, i32 -> vector<8x256xf32>
    %361 = arith.andi %62, %168 : vector<8x256xi1>
    %cst_286 = arith.constant 0.000000e+00 : f32
    %362 = vector.broadcast %cst_286 : f32 to vector<8x256xf32>
    %363 = arith.select %361, %360, %362 : vector<8x256xi1>, vector<8x256xf32>
    %c3_287 = arith.constant 3 : index
    %c10_288 = arith.constant 10 : index
    %c0_289 = arith.constant 0 : index
    %c0_290 = arith.constant 0 : index
    %364 = vector.load %arg2[%c3_287, %c10_288, %c0_289, %c0_290] : memref<6x15x8x8xf32, #tpu.memory_space<vmem>>, vector<1x1x8x8xf32>
    %365 = vector.shape_cast %364 : vector<1x1x8x8xf32> to vector<8x8xf32>
    %cst_291 = arith.constant dense<0.000000e+00> : vector<8x256xf32>
    %366 = tpu.matmul %365, %363, %cst_291 {dimension_numbers = #tpu.dot_dimension_numbers<[1], [0], [0], [1], [0, 0, 1, 1], [], []>} : vector<8x8xf32>, vector<8x256xf32>, vector<8x256xf32> -> vector<8x256xf32>
    %367 = arith.addf %359, %366 : vector<8x256xf32>
    %c241_i32_292 = arith.constant 241 : i32
    %368 = tpu.dynamic_rotate %286 by %c241_i32_292 dim 1 : vector<8x256xf32>, i32 -> vector<8x256xf32>
    %cst_293 = arith.constant 0.000000e+00 : f32
    %369 = vector.broadcast %cst_293 : f32 to vector<8x256xf32>
    %370 = arith.select %63, %368, %369 : vector<8x256xi1>, vector<8x256xf32>
    %c3_294 = arith.constant 3 : index
    %c11_295 = arith.constant 11 : index
    %c0_296 = arith.constant 0 : index
    %c0_297 = arith.constant 0 : index
    %371 = vector.load %arg2[%c3_294, %c11_295, %c0_296, %c0_297] : memref<6x15x8x8xf32, #tpu.memory_space<vmem>>, vector<1x1x8x8xf32>
    %372 = vector.shape_cast %371 : vector<1x1x8x8xf32> to vector<8x8xf32>
    %cst_298 = arith.constant dense<0.000000e+00> : vector<8x256xf32>
    %373 = tpu.matmul %372, %370, %cst_298 {dimension_numbers = #tpu.dot_dimension_numbers<[1], [0], [0], [1], [0, 0, 1, 1], [], []>} : vector<8x8xf32>, vector<8x256xf32>, vector<8x256xf32> -> vector<8x256xf32>
    %374 = arith.addf %367, %373 : vector<8x256xf32>
    %c240_i32_299 = arith.constant 240 : i32
    %375 = tpu.dynamic_rotate %286 by %c240_i32_299 dim 1 : vector<8x256xf32>, i32 -> vector<8x256xf32>
    %cst_300 = arith.constant 0.000000e+00 : f32
    %376 = vector.broadcast %cst_300 : f32 to vector<8x256xf32>
    %377 = arith.select %62, %375, %376 : vector<8x256xi1>, vector<8x256xf32>
    %c3_301 = arith.constant 3 : index
    %c12_302 = arith.constant 12 : index
    %c0_303 = arith.constant 0 : index
    %c0_304 = arith.constant 0 : index
    %378 = vector.load %arg2[%c3_301, %c12_302, %c0_303, %c0_304] : memref<6x15x8x8xf32, #tpu.memory_space<vmem>>, vector<1x1x8x8xf32>
    %379 = vector.shape_cast %378 : vector<1x1x8x8xf32> to vector<8x8xf32>
    %cst_305 = arith.constant dense<0.000000e+00> : vector<8x256xf32>
    %380 = tpu.matmul %379, %377, %cst_305 {dimension_numbers = #tpu.dot_dimension_numbers<[1], [0], [0], [1], [0, 0, 1, 1], [], []>} : vector<8x8xf32>, vector<8x256xf32>, vector<8x256xf32> -> vector<8x256xf32>
    %381 = arith.addf %374, %380 : vector<8x256xf32>
    %c239_i32_306 = arith.constant 239 : i32
    %382 = tpu.dynamic_rotate %286 by %c239_i32_306 dim 1 : vector<8x256xf32>, i32 -> vector<8x256xf32>
    %cst_307 = arith.constant 0.000000e+00 : f32
    %383 = vector.broadcast %cst_307 : f32 to vector<8x256xf32>
    %384 = arith.select %78, %382, %383 : vector<8x256xi1>, vector<8x256xf32>
    %c3_308 = arith.constant 3 : index
    %c13_309 = arith.constant 13 : index
    %c0_310 = arith.constant 0 : index
    %c0_311 = arith.constant 0 : index
    %385 = vector.load %arg2[%c3_308, %c13_309, %c0_310, %c0_311] : memref<6x15x8x8xf32, #tpu.memory_space<vmem>>, vector<1x1x8x8xf32>
    %386 = vector.shape_cast %385 : vector<1x1x8x8xf32> to vector<8x8xf32>
    %cst_312 = arith.constant dense<0.000000e+00> : vector<8x256xf32>
    %387 = tpu.matmul %386, %384, %cst_312 {dimension_numbers = #tpu.dot_dimension_numbers<[1], [0], [0], [1], [0, 0, 1, 1], [], []>} : vector<8x8xf32>, vector<8x256xf32>, vector<8x256xf32> -> vector<8x256xf32>
    %388 = arith.addf %381, %387 : vector<8x256xf32>
    %c238_i32 = arith.constant 238 : i32
    %389 = tpu.dynamic_rotate %286 by %c238_i32 dim 1 : vector<8x256xf32>, i32 -> vector<8x256xf32>
    %390 = arith.andi %62, %201 : vector<8x256xi1>
    %cst_313 = arith.constant 0.000000e+00 : f32
    %391 = vector.broadcast %cst_313 : f32 to vector<8x256xf32>
    %392 = arith.select %390, %389, %391 : vector<8x256xi1>, vector<8x256xf32>
    %c3_314 = arith.constant 3 : index
    %c14_315 = arith.constant 14 : index
    %c0_316 = arith.constant 0 : index
    %c0_317 = arith.constant 0 : index
    %393 = vector.load %arg2[%c3_314, %c14_315, %c0_316, %c0_317] : memref<6x15x8x8xf32, #tpu.memory_space<vmem>>, vector<1x1x8x8xf32>
    %394 = vector.shape_cast %393 : vector<1x1x8x8xf32> to vector<8x8xf32>
    %cst_318 = arith.constant dense<0.000000e+00> : vector<8x256xf32>
    %395 = tpu.matmul %394, %392, %cst_318 {dimension_numbers = #tpu.dot_dimension_numbers<[1], [0], [0], [1], [0, 0, 1, 1], [], []>} : vector<8x8xf32>, vector<8x256xf32>, vector<8x256xf32> -> vector<8x256xf32>
    %396 = arith.addf %388, %395 : vector<8x256xf32>
    %397 = arith.addf %154, %396 : vector<8x256xf32>
    %cst_319 = arith.constant 0.000000e+00 : f32
    %398 = vector.broadcast %cst_319 : f32 to vector<8x256xf32>
    %399 = arith.cmpf ogt, %397, %398 : vector<8x256xf32>
    %cst_320 = arith.constant 1.000000e-01 : f32
    %400 = vector.broadcast %cst_320 : f32 to vector<8x256xf32>
    %401 = arith.mulf %400, %397 : vector<8x256xf32>
    %402 = arith.select %399, %397, %401 : vector<8x256xi1>, vector<8x256xf32>
    %c4_321 = arith.constant 4 : index
    %c0_322 = arith.constant 0 : index
    %c0_323 = arith.constant 0 : index
    %403 = vector.load %arg3[%c4_321, %c0_322, %c0_323] : memref<6x8x1xf32, #tpu.memory_space<vmem>>, vector<1x8x1xf32>
    %404 = vector.shape_cast %403 : vector<1x8x1xf32> to vector<8x1xf32>
    %405 = vector.shape_cast %404 : vector<8x1xf32> to vector<8x1xf32>
    %406 = vector.broadcast %405 : vector<8x1xf32> to vector<8x256xf32>
    %c82_i32 = arith.constant 82 : i32
    %407 = tpu.dynamic_rotate %402 by %c82_i32 dim 1 : vector<8x256xf32>, i32 -> vector<8x256xf32>
    %c80_i32 = arith.constant 80 : i32
    %408 = vector.broadcast %c80_i32 : i32 to vector<8x256xi32>
    %409 = arith.cmpi sge, %0, %408 : vector<8x256xi32>
    %410 = arith.andi %409, %168 : vector<8x256xi1>
    %cst_324 = arith.constant 0.000000e+00 : f32
    %411 = vector.broadcast %cst_324 : f32 to vector<8x256xf32>
    %412 = arith.select %410, %407, %411 : vector<8x256xi1>, vector<8x256xf32>
    %c4_325 = arith.constant 4 : index
    %c0_326 = arith.constant 0 : index
    %c0_327 = arith.constant 0 : index
    %c0_328 = arith.constant 0 : index
    %413 = vector.load %arg2[%c4_325, %c0_326, %c0_327, %c0_328] : memref<6x15x8x8xf32, #tpu.memory_space<vmem>>, vector<1x1x8x8xf32>
    %414 = vector.shape_cast %413 : vector<1x1x8x8xf32> to vector<8x8xf32>
    %cst_329 = arith.constant dense<0.000000e+00> : vector<8x256xf32>
    %415 = tpu.matmul %414, %412, %cst_329 {dimension_numbers = #tpu.dot_dimension_numbers<[1], [0], [0], [1], [0, 0, 1, 1], [], []>} : vector<8x8xf32>, vector<8x256xf32>, vector<8x256xf32> -> vector<8x256xf32>
    %416 = arith.addf %406, %415 : vector<8x256xf32>
    %c81_i32 = arith.constant 81 : i32
    %417 = tpu.dynamic_rotate %402 by %c81_i32 dim 1 : vector<8x256xf32>, i32 -> vector<8x256xf32>
    %418 = arith.andi %409, %17 : vector<8x256xi1>
    %cst_330 = arith.constant 0.000000e+00 : f32
    %419 = vector.broadcast %cst_330 : f32 to vector<8x256xf32>
    %420 = arith.select %418, %417, %419 : vector<8x256xi1>, vector<8x256xf32>
    %c4_331 = arith.constant 4 : index
    %c1_332 = arith.constant 1 : index
    %c0_333 = arith.constant 0 : index
    %c0_334 = arith.constant 0 : index
    %421 = vector.load %arg2[%c4_331, %c1_332, %c0_333, %c0_334] : memref<6x15x8x8xf32, #tpu.memory_space<vmem>>, vector<1x1x8x8xf32>
    %422 = vector.shape_cast %421 : vector<1x1x8x8xf32> to vector<8x8xf32>
    %cst_335 = arith.constant dense<0.000000e+00> : vector<8x256xf32>
    %423 = tpu.matmul %422, %420, %cst_335 {dimension_numbers = #tpu.dot_dimension_numbers<[1], [0], [0], [1], [0, 0, 1, 1], [], []>} : vector<8x8xf32>, vector<8x256xf32>, vector<8x256xf32> -> vector<8x256xf32>
    %424 = arith.addf %416, %423 : vector<8x256xf32>
    %c80_i32_336 = arith.constant 80 : i32
    %425 = tpu.dynamic_rotate %402 by %c80_i32_336 dim 1 : vector<8x256xf32>, i32 -> vector<8x256xf32>
    %cst_337 = arith.constant 0.000000e+00 : f32
    %426 = vector.broadcast %cst_337 : f32 to vector<8x256xf32>
    %427 = arith.select %409, %425, %426 : vector<8x256xi1>, vector<8x256xf32>
    %c4_338 = arith.constant 4 : index
    %c2_339 = arith.constant 2 : index
    %c0_340 = arith.constant 0 : index
    %c0_341 = arith.constant 0 : index
    %428 = vector.load %arg2[%c4_338, %c2_339, %c0_340, %c0_341] : memref<6x15x8x8xf32, #tpu.memory_space<vmem>>, vector<1x1x8x8xf32>
    %429 = vector.shape_cast %428 : vector<1x1x8x8xf32> to vector<8x8xf32>
    %cst_342 = arith.constant dense<0.000000e+00> : vector<8x256xf32>
    %430 = tpu.matmul %429, %427, %cst_342 {dimension_numbers = #tpu.dot_dimension_numbers<[1], [0], [0], [1], [0, 0, 1, 1], [], []>} : vector<8x8xf32>, vector<8x256xf32>, vector<8x256xf32> -> vector<8x256xf32>
    %431 = arith.addf %424, %430 : vector<8x256xf32>
    %c79_i32 = arith.constant 79 : i32
    %432 = tpu.dynamic_rotate %402 by %c79_i32 dim 1 : vector<8x256xf32>, i32 -> vector<8x256xf32>
    %433 = arith.andi %409, %34 : vector<8x256xi1>
    %cst_343 = arith.constant 0.000000e+00 : f32
    %434 = vector.broadcast %cst_343 : f32 to vector<8x256xf32>
    %435 = arith.select %433, %432, %434 : vector<8x256xi1>, vector<8x256xf32>
    %c4_344 = arith.constant 4 : index
    %c3_345 = arith.constant 3 : index
    %c0_346 = arith.constant 0 : index
    %c0_347 = arith.constant 0 : index
    %436 = vector.load %arg2[%c4_344, %c3_345, %c0_346, %c0_347] : memref<6x15x8x8xf32, #tpu.memory_space<vmem>>, vector<1x1x8x8xf32>
    %437 = vector.shape_cast %436 : vector<1x1x8x8xf32> to vector<8x8xf32>
    %cst_348 = arith.constant dense<0.000000e+00> : vector<8x256xf32>
    %438 = tpu.matmul %437, %435, %cst_348 {dimension_numbers = #tpu.dot_dimension_numbers<[1], [0], [0], [1], [0, 0, 1, 1], [], []>} : vector<8x8xf32>, vector<8x256xf32>, vector<8x256xf32> -> vector<8x256xf32>
    %439 = arith.addf %431, %438 : vector<8x256xf32>
    %c78_i32 = arith.constant 78 : i32
    %440 = tpu.dynamic_rotate %402 by %c78_i32 dim 1 : vector<8x256xf32>, i32 -> vector<8x256xf32>
    %441 = arith.andi %409, %201 : vector<8x256xi1>
    %cst_349 = arith.constant 0.000000e+00 : f32
    %442 = vector.broadcast %cst_349 : f32 to vector<8x256xf32>
    %443 = arith.select %441, %440, %442 : vector<8x256xi1>, vector<8x256xf32>
    %c4_350 = arith.constant 4 : index
    %c4_351 = arith.constant 4 : index
    %c0_352 = arith.constant 0 : index
    %c0_353 = arith.constant 0 : index
    %444 = vector.load %arg2[%c4_350, %c4_351, %c0_352, %c0_353] : memref<6x15x8x8xf32, #tpu.memory_space<vmem>>, vector<1x1x8x8xf32>
    %445 = vector.shape_cast %444 : vector<1x1x8x8xf32> to vector<8x8xf32>
    %cst_354 = arith.constant dense<0.000000e+00> : vector<8x256xf32>
    %446 = tpu.matmul %445, %443, %cst_354 {dimension_numbers = #tpu.dot_dimension_numbers<[1], [0], [0], [1], [0, 0, 1, 1], [], []>} : vector<8x8xf32>, vector<8x256xf32>, vector<8x256xf32> -> vector<8x256xf32>
    %447 = arith.addf %439, %446 : vector<8x256xf32>
    %c2_i32_355 = arith.constant 2 : i32
    %448 = tpu.dynamic_rotate %402 by %c2_i32_355 dim 1 : vector<8x256xf32>, i32 -> vector<8x256xf32>
    %cst_356 = arith.constant 0.000000e+00 : f32
    %449 = vector.broadcast %cst_356 : f32 to vector<8x256xf32>
    %450 = arith.select %168, %448, %449 : vector<8x256xi1>, vector<8x256xf32>
    %c4_357 = arith.constant 4 : index
    %c5_358 = arith.constant 5 : index
    %c0_359 = arith.constant 0 : index
    %c0_360 = arith.constant 0 : index
    %451 = vector.load %arg2[%c4_357, %c5_358, %c0_359, %c0_360] : memref<6x15x8x8xf32, #tpu.memory_space<vmem>>, vector<1x1x8x8xf32>
    %452 = vector.shape_cast %451 : vector<1x1x8x8xf32> to vector<8x8xf32>
    %cst_361 = arith.constant dense<0.000000e+00> : vector<8x256xf32>
    %453 = tpu.matmul %452, %450, %cst_361 {dimension_numbers = #tpu.dot_dimension_numbers<[1], [0], [0], [1], [0, 0, 1, 1], [], []>} : vector<8x8xf32>, vector<8x256xf32>, vector<8x256xf32> -> vector<8x256xf32>
    %454 = arith.addf %447, %453 : vector<8x256xf32>
    %c1_i32_362 = arith.constant 1 : i32
    %455 = tpu.dynamic_rotate %402 by %c1_i32_362 dim 1 : vector<8x256xf32>, i32 -> vector<8x256xf32>
    %cst_363 = arith.constant 0.000000e+00 : f32
    %456 = vector.broadcast %cst_363 : f32 to vector<8x256xf32>
    %457 = arith.select %17, %455, %456 : vector<8x256xi1>, vector<8x256xf32>
    %c4_364 = arith.constant 4 : index
    %c6_365 = arith.constant 6 : index
    %c0_366 = arith.constant 0 : index
    %c0_367 = arith.constant 0 : index
    %458 = vector.load %arg2[%c4_364, %c6_365, %c0_366, %c0_367] : memref<6x15x8x8xf32, #tpu.memory_space<vmem>>, vector<1x1x8x8xf32>
    %459 = vector.shape_cast %458 : vector<1x1x8x8xf32> to vector<8x8xf32>
    %cst_368 = arith.constant dense<0.000000e+00> : vector<8x256xf32>
    %460 = tpu.matmul %459, %457, %cst_368 {dimension_numbers = #tpu.dot_dimension_numbers<[1], [0], [0], [1], [0, 0, 1, 1], [], []>} : vector<8x8xf32>, vector<8x256xf32>, vector<8x256xf32> -> vector<8x256xf32>
    %461 = arith.addf %454, %460 : vector<8x256xf32>
    %c4_369 = arith.constant 4 : index
    %c7_370 = arith.constant 7 : index
    %c0_371 = arith.constant 0 : index
    %c0_372 = arith.constant 0 : index
    %462 = vector.load %arg2[%c4_369, %c7_370, %c0_371, %c0_372] : memref<6x15x8x8xf32, #tpu.memory_space<vmem>>, vector<1x1x8x8xf32>
    %463 = vector.shape_cast %462 : vector<1x1x8x8xf32> to vector<8x8xf32>
    %cst_373 = arith.constant dense<0.000000e+00> : vector<8x256xf32>
    %464 = tpu.matmul %463, %402, %cst_373 {dimension_numbers = #tpu.dot_dimension_numbers<[1], [0], [0], [1], [0, 0, 1, 1], [], []>} : vector<8x8xf32>, vector<8x256xf32>, vector<8x256xf32> -> vector<8x256xf32>
    %465 = arith.addf %461, %464 : vector<8x256xf32>
    %c255_i32_374 = arith.constant 255 : i32
    %466 = tpu.dynamic_rotate %402 by %c255_i32_374 dim 1 : vector<8x256xf32>, i32 -> vector<8x256xf32>
    %cst_375 = arith.constant 0.000000e+00 : f32
    %467 = vector.broadcast %cst_375 : f32 to vector<8x256xf32>
    %468 = arith.select %34, %466, %467 : vector<8x256xi1>, vector<8x256xf32>
    %c4_376 = arith.constant 4 : index
    %c8_377 = arith.constant 8 : index
    %c0_378 = arith.constant 0 : index
    %c0_379 = arith.constant 0 : index
    %469 = vector.load %arg2[%c4_376, %c8_377, %c0_378, %c0_379] : memref<6x15x8x8xf32, #tpu.memory_space<vmem>>, vector<1x1x8x8xf32>
    %470 = vector.shape_cast %469 : vector<1x1x8x8xf32> to vector<8x8xf32>
    %cst_380 = arith.constant dense<0.000000e+00> : vector<8x256xf32>
    %471 = tpu.matmul %470, %468, %cst_380 {dimension_numbers = #tpu.dot_dimension_numbers<[1], [0], [0], [1], [0, 0, 1, 1], [], []>} : vector<8x8xf32>, vector<8x256xf32>, vector<8x256xf32> -> vector<8x256xf32>
    %472 = arith.addf %465, %471 : vector<8x256xf32>
    %c254_i32_381 = arith.constant 254 : i32
    %473 = tpu.dynamic_rotate %402 by %c254_i32_381 dim 1 : vector<8x256xf32>, i32 -> vector<8x256xf32>
    %cst_382 = arith.constant 0.000000e+00 : f32
    %474 = vector.broadcast %cst_382 : f32 to vector<8x256xf32>
    %475 = arith.select %201, %473, %474 : vector<8x256xi1>, vector<8x256xf32>
    %c4_383 = arith.constant 4 : index
    %c9_384 = arith.constant 9 : index
    %c0_385 = arith.constant 0 : index
    %c0_386 = arith.constant 0 : index
    %476 = vector.load %arg2[%c4_383, %c9_384, %c0_385, %c0_386] : memref<6x15x8x8xf32, #tpu.memory_space<vmem>>, vector<1x1x8x8xf32>
    %477 = vector.shape_cast %476 : vector<1x1x8x8xf32> to vector<8x8xf32>
    %cst_387 = arith.constant dense<0.000000e+00> : vector<8x256xf32>
    %478 = tpu.matmul %477, %475, %cst_387 {dimension_numbers = #tpu.dot_dimension_numbers<[1], [0], [0], [1], [0, 0, 1, 1], [], []>} : vector<8x8xf32>, vector<8x256xf32>, vector<8x256xf32> -> vector<8x256xf32>
    %479 = arith.addf %472, %478 : vector<8x256xf32>
    %c178_i32 = arith.constant 178 : i32
    %480 = tpu.dynamic_rotate %402 by %c178_i32 dim 1 : vector<8x256xf32>, i32 -> vector<8x256xf32>
    %c176_i32 = arith.constant 176 : i32
    %481 = vector.broadcast %c176_i32 : i32 to vector<8x256xi32>
    %482 = arith.cmpi slt, %0, %481 : vector<8x256xi32>
    %483 = arith.andi %482, %168 : vector<8x256xi1>
    %cst_388 = arith.constant 0.000000e+00 : f32
    %484 = vector.broadcast %cst_388 : f32 to vector<8x256xf32>
    %485 = arith.select %483, %480, %484 : vector<8x256xi1>, vector<8x256xf32>
    %c4_389 = arith.constant 4 : index
    %c10_390 = arith.constant 10 : index
    %c0_391 = arith.constant 0 : index
    %c0_392 = arith.constant 0 : index
    %486 = vector.load %arg2[%c4_389, %c10_390, %c0_391, %c0_392] : memref<6x15x8x8xf32, #tpu.memory_space<vmem>>, vector<1x1x8x8xf32>
    %487 = vector.shape_cast %486 : vector<1x1x8x8xf32> to vector<8x8xf32>
    %cst_393 = arith.constant dense<0.000000e+00> : vector<8x256xf32>
    %488 = tpu.matmul %487, %485, %cst_393 {dimension_numbers = #tpu.dot_dimension_numbers<[1], [0], [0], [1], [0, 0, 1, 1], [], []>} : vector<8x8xf32>, vector<8x256xf32>, vector<8x256xf32> -> vector<8x256xf32>
    %489 = arith.addf %479, %488 : vector<8x256xf32>
    %c177_i32 = arith.constant 177 : i32
    %490 = tpu.dynamic_rotate %402 by %c177_i32 dim 1 : vector<8x256xf32>, i32 -> vector<8x256xf32>
    %491 = arith.andi %482, %17 : vector<8x256xi1>
    %cst_394 = arith.constant 0.000000e+00 : f32
    %492 = vector.broadcast %cst_394 : f32 to vector<8x256xf32>
    %493 = arith.select %491, %490, %492 : vector<8x256xi1>, vector<8x256xf32>
    %c4_395 = arith.constant 4 : index
    %c11_396 = arith.constant 11 : index
    %c0_397 = arith.constant 0 : index
    %c0_398 = arith.constant 0 : index
    %494 = vector.load %arg2[%c4_395, %c11_396, %c0_397, %c0_398] : memref<6x15x8x8xf32, #tpu.memory_space<vmem>>, vector<1x1x8x8xf32>
    %495 = vector.shape_cast %494 : vector<1x1x8x8xf32> to vector<8x8xf32>
    %cst_399 = arith.constant dense<0.000000e+00> : vector<8x256xf32>
    %496 = tpu.matmul %495, %493, %cst_399 {dimension_numbers = #tpu.dot_dimension_numbers<[1], [0], [0], [1], [0, 0, 1, 1], [], []>} : vector<8x8xf32>, vector<8x256xf32>, vector<8x256xf32> -> vector<8x256xf32>
    %497 = arith.addf %489, %496 : vector<8x256xf32>
    %c176_i32_400 = arith.constant 176 : i32
    %498 = tpu.dynamic_rotate %402 by %c176_i32_400 dim 1 : vector<8x256xf32>, i32 -> vector<8x256xf32>
    %cst_401 = arith.constant 0.000000e+00 : f32
    %499 = vector.broadcast %cst_401 : f32 to vector<8x256xf32>
    %500 = arith.select %482, %498, %499 : vector<8x256xi1>, vector<8x256xf32>
    %c4_402 = arith.constant 4 : index
    %c12_403 = arith.constant 12 : index
    %c0_404 = arith.constant 0 : index
    %c0_405 = arith.constant 0 : index
    %501 = vector.load %arg2[%c4_402, %c12_403, %c0_404, %c0_405] : memref<6x15x8x8xf32, #tpu.memory_space<vmem>>, vector<1x1x8x8xf32>
    %502 = vector.shape_cast %501 : vector<1x1x8x8xf32> to vector<8x8xf32>
    %cst_406 = arith.constant dense<0.000000e+00> : vector<8x256xf32>
    %503 = tpu.matmul %502, %500, %cst_406 {dimension_numbers = #tpu.dot_dimension_numbers<[1], [0], [0], [1], [0, 0, 1, 1], [], []>} : vector<8x8xf32>, vector<8x256xf32>, vector<8x256xf32> -> vector<8x256xf32>
    %504 = arith.addf %497, %503 : vector<8x256xf32>
    %c175_i32 = arith.constant 175 : i32
    %505 = tpu.dynamic_rotate %402 by %c175_i32 dim 1 : vector<8x256xf32>, i32 -> vector<8x256xf32>
    %506 = arith.andi %482, %34 : vector<8x256xi1>
    %cst_407 = arith.constant 0.000000e+00 : f32
    %507 = vector.broadcast %cst_407 : f32 to vector<8x256xf32>
    %508 = arith.select %506, %505, %507 : vector<8x256xi1>, vector<8x256xf32>
    %c4_408 = arith.constant 4 : index
    %c13_409 = arith.constant 13 : index
    %c0_410 = arith.constant 0 : index
    %c0_411 = arith.constant 0 : index
    %509 = vector.load %arg2[%c4_408, %c13_409, %c0_410, %c0_411] : memref<6x15x8x8xf32, #tpu.memory_space<vmem>>, vector<1x1x8x8xf32>
    %510 = vector.shape_cast %509 : vector<1x1x8x8xf32> to vector<8x8xf32>
    %cst_412 = arith.constant dense<0.000000e+00> : vector<8x256xf32>
    %511 = tpu.matmul %510, %508, %cst_412 {dimension_numbers = #tpu.dot_dimension_numbers<[1], [0], [0], [1], [0, 0, 1, 1], [], []>} : vector<8x8xf32>, vector<8x256xf32>, vector<8x256xf32> -> vector<8x256xf32>
    %512 = arith.addf %504, %511 : vector<8x256xf32>
    %c174_i32 = arith.constant 174 : i32
    %513 = tpu.dynamic_rotate %402 by %c174_i32 dim 1 : vector<8x256xf32>, i32 -> vector<8x256xf32>
    %514 = arith.andi %482, %201 : vector<8x256xi1>
    %cst_413 = arith.constant 0.000000e+00 : f32
    %515 = vector.broadcast %cst_413 : f32 to vector<8x256xf32>
    %516 = arith.select %514, %513, %515 : vector<8x256xi1>, vector<8x256xf32>
    %c4_414 = arith.constant 4 : index
    %c14_415 = arith.constant 14 : index
    %c0_416 = arith.constant 0 : index
    %c0_417 = arith.constant 0 : index
    %517 = vector.load %arg2[%c4_414, %c14_415, %c0_416, %c0_417] : memref<6x15x8x8xf32, #tpu.memory_space<vmem>>, vector<1x1x8x8xf32>
    %518 = vector.shape_cast %517 : vector<1x1x8x8xf32> to vector<8x8xf32>
    %cst_418 = arith.constant dense<0.000000e+00> : vector<8x256xf32>
    %519 = tpu.matmul %518, %516, %cst_418 {dimension_numbers = #tpu.dot_dimension_numbers<[1], [0], [0], [1], [0, 0, 1, 1], [], []>} : vector<8x8xf32>, vector<8x256xf32>, vector<8x256xf32> -> vector<8x256xf32>
    %520 = arith.addf %512, %519 : vector<8x256xf32>
    %cst_419 = arith.constant 0.000000e+00 : f32
    %521 = vector.broadcast %cst_419 : f32 to vector<8x256xf32>
    %522 = arith.cmpf ogt, %520, %521 : vector<8x256xf32>
    %cst_420 = arith.constant 1.000000e-01 : f32
    %523 = vector.broadcast %cst_420 : f32 to vector<8x256xf32>
    %524 = arith.mulf %523, %520 : vector<8x256xf32>
    %525 = arith.select %522, %520, %524 : vector<8x256xi1>, vector<8x256xf32>
    %c5_421 = arith.constant 5 : index
    %c0_422 = arith.constant 0 : index
    %c0_423 = arith.constant 0 : index
    %526 = vector.load %arg3[%c5_421, %c0_422, %c0_423] : memref<6x8x1xf32, #tpu.memory_space<vmem>>, vector<1x8x1xf32>
    %527 = vector.shape_cast %526 : vector<1x8x1xf32> to vector<8x1xf32>
    %528 = vector.shape_cast %527 : vector<8x1xf32> to vector<8x1xf32>
    %529 = vector.broadcast %528 : vector<8x1xf32> to vector<8x256xf32>
    %c18_i32_424 = arith.constant 18 : i32
    %530 = tpu.dynamic_rotate %525 by %c18_i32_424 dim 1 : vector<8x256xf32>, i32 -> vector<8x256xf32>
    %cst_425 = arith.constant 0.000000e+00 : f32
    %531 = vector.broadcast %cst_425 : f32 to vector<8x256xf32>
    %532 = arith.select %292, %530, %531 : vector<8x256xi1>, vector<8x256xf32>
    %c5_426 = arith.constant 5 : index
    %c0_427 = arith.constant 0 : index
    %c0_428 = arith.constant 0 : index
    %c0_429 = arith.constant 0 : index
    %533 = vector.load %arg2[%c5_426, %c0_427, %c0_428, %c0_429] : memref<6x15x8x8xf32, #tpu.memory_space<vmem>>, vector<1x1x8x8xf32>
    %534 = vector.shape_cast %533 : vector<1x1x8x8xf32> to vector<8x8xf32>
    %cst_430 = arith.constant dense<0.000000e+00> : vector<8x256xf32>
    %535 = tpu.matmul %534, %532, %cst_430 {dimension_numbers = #tpu.dot_dimension_numbers<[1], [0], [0], [1], [0, 0, 1, 1], [], []>} : vector<8x8xf32>, vector<8x256xf32>, vector<8x256xf32> -> vector<8x256xf32>
    %536 = arith.addf %529, %535 : vector<8x256xf32>
    %c17_i32_431 = arith.constant 17 : i32
    %537 = tpu.dynamic_rotate %525 by %c17_i32_431 dim 1 : vector<8x256xf32>, i32 -> vector<8x256xf32>
    %cst_432 = arith.constant 0.000000e+00 : f32
    %538 = vector.broadcast %cst_432 : f32 to vector<8x256xf32>
    %539 = arith.select %18, %537, %538 : vector<8x256xi1>, vector<8x256xf32>
    %c5_433 = arith.constant 5 : index
    %c1_434 = arith.constant 1 : index
    %c0_435 = arith.constant 0 : index
    %c0_436 = arith.constant 0 : index
    %540 = vector.load %arg2[%c5_433, %c1_434, %c0_435, %c0_436] : memref<6x15x8x8xf32, #tpu.memory_space<vmem>>, vector<1x1x8x8xf32>
    %541 = vector.shape_cast %540 : vector<1x1x8x8xf32> to vector<8x8xf32>
    %cst_437 = arith.constant dense<0.000000e+00> : vector<8x256xf32>
    %542 = tpu.matmul %541, %539, %cst_437 {dimension_numbers = #tpu.dot_dimension_numbers<[1], [0], [0], [1], [0, 0, 1, 1], [], []>} : vector<8x8xf32>, vector<8x256xf32>, vector<8x256xf32> -> vector<8x256xf32>
    %543 = arith.addf %536, %542 : vector<8x256xf32>
    %c16_i32_438 = arith.constant 16 : i32
    %544 = tpu.dynamic_rotate %525 by %c16_i32_438 dim 1 : vector<8x256xf32>, i32 -> vector<8x256xf32>
    %cst_439 = arith.constant 0.000000e+00 : f32
    %545 = vector.broadcast %cst_439 : f32 to vector<8x256xf32>
    %546 = arith.select %15, %544, %545 : vector<8x256xi1>, vector<8x256xf32>
    %c5_440 = arith.constant 5 : index
    %c2_441 = arith.constant 2 : index
    %c0_442 = arith.constant 0 : index
    %c0_443 = arith.constant 0 : index
    %547 = vector.load %arg2[%c5_440, %c2_441, %c0_442, %c0_443] : memref<6x15x8x8xf32, #tpu.memory_space<vmem>>, vector<1x1x8x8xf32>
    %548 = vector.shape_cast %547 : vector<1x1x8x8xf32> to vector<8x8xf32>
    %cst_444 = arith.constant dense<0.000000e+00> : vector<8x256xf32>
    %549 = tpu.matmul %548, %546, %cst_444 {dimension_numbers = #tpu.dot_dimension_numbers<[1], [0], [0], [1], [0, 0, 1, 1], [], []>} : vector<8x8xf32>, vector<8x256xf32>, vector<8x256xf32> -> vector<8x256xf32>
    %550 = arith.addf %543, %549 : vector<8x256xf32>
    %c15_i32_445 = arith.constant 15 : i32
    %551 = tpu.dynamic_rotate %525 by %c15_i32_445 dim 1 : vector<8x256xf32>, i32 -> vector<8x256xf32>
    %cst_446 = arith.constant 0.000000e+00 : f32
    %552 = vector.broadcast %cst_446 : f32 to vector<8x256xf32>
    %553 = arith.select %35, %551, %552 : vector<8x256xi1>, vector<8x256xf32>
    %c5_447 = arith.constant 5 : index
    %c3_448 = arith.constant 3 : index
    %c0_449 = arith.constant 0 : index
    %c0_450 = arith.constant 0 : index
    %554 = vector.load %arg2[%c5_447, %c3_448, %c0_449, %c0_450] : memref<6x15x8x8xf32, #tpu.memory_space<vmem>>, vector<1x1x8x8xf32>
    %555 = vector.shape_cast %554 : vector<1x1x8x8xf32> to vector<8x8xf32>
    %cst_451 = arith.constant dense<0.000000e+00> : vector<8x256xf32>
    %556 = tpu.matmul %555, %553, %cst_451 {dimension_numbers = #tpu.dot_dimension_numbers<[1], [0], [0], [1], [0, 0, 1, 1], [], []>} : vector<8x8xf32>, vector<8x256xf32>, vector<8x256xf32> -> vector<8x256xf32>
    %557 = arith.addf %550, %556 : vector<8x256xf32>
    %c14_i32_452 = arith.constant 14 : i32
    %558 = tpu.dynamic_rotate %525 by %c14_i32_452 dim 1 : vector<8x256xf32>, i32 -> vector<8x256xf32>
    %cst_453 = arith.constant 0.000000e+00 : f32
    %559 = vector.broadcast %cst_453 : f32 to vector<8x256xf32>
    %560 = arith.select %321, %558, %559 : vector<8x256xi1>, vector<8x256xf32>
    %c5_454 = arith.constant 5 : index
    %c4_455 = arith.constant 4 : index
    %c0_456 = arith.constant 0 : index
    %c0_457 = arith.constant 0 : index
    %561 = vector.load %arg2[%c5_454, %c4_455, %c0_456, %c0_457] : memref<6x15x8x8xf32, #tpu.memory_space<vmem>>, vector<1x1x8x8xf32>
    %562 = vector.shape_cast %561 : vector<1x1x8x8xf32> to vector<8x8xf32>
    %cst_458 = arith.constant dense<0.000000e+00> : vector<8x256xf32>
    %563 = tpu.matmul %562, %560, %cst_458 {dimension_numbers = #tpu.dot_dimension_numbers<[1], [0], [0], [1], [0, 0, 1, 1], [], []>} : vector<8x8xf32>, vector<8x256xf32>, vector<8x256xf32> -> vector<8x256xf32>
    %564 = arith.addf %557, %563 : vector<8x256xf32>
    %c2_i32_459 = arith.constant 2 : i32
    %565 = tpu.dynamic_rotate %525 by %c2_i32_459 dim 1 : vector<8x256xf32>, i32 -> vector<8x256xf32>
    %cst_460 = arith.constant 0.000000e+00 : f32
    %566 = vector.broadcast %cst_460 : f32 to vector<8x256xf32>
    %567 = arith.select %168, %565, %566 : vector<8x256xi1>, vector<8x256xf32>
    %c5_461 = arith.constant 5 : index
    %c5_462 = arith.constant 5 : index
    %c0_463 = arith.constant 0 : index
    %c0_464 = arith.constant 0 : index
    %568 = vector.load %arg2[%c5_461, %c5_462, %c0_463, %c0_464] : memref<6x15x8x8xf32, #tpu.memory_space<vmem>>, vector<1x1x8x8xf32>
    %569 = vector.shape_cast %568 : vector<1x1x8x8xf32> to vector<8x8xf32>
    %cst_465 = arith.constant dense<0.000000e+00> : vector<8x256xf32>
    %570 = tpu.matmul %569, %567, %cst_465 {dimension_numbers = #tpu.dot_dimension_numbers<[1], [0], [0], [1], [0, 0, 1, 1], [], []>} : vector<8x8xf32>, vector<8x256xf32>, vector<8x256xf32> -> vector<8x256xf32>
    %571 = arith.addf %564, %570 : vector<8x256xf32>
    %c1_i32_466 = arith.constant 1 : i32
    %572 = tpu.dynamic_rotate %525 by %c1_i32_466 dim 1 : vector<8x256xf32>, i32 -> vector<8x256xf32>
    %cst_467 = arith.constant 0.000000e+00 : f32
    %573 = vector.broadcast %cst_467 : f32 to vector<8x256xf32>
    %574 = arith.select %17, %572, %573 : vector<8x256xi1>, vector<8x256xf32>
    %c5_468 = arith.constant 5 : index
    %c6_469 = arith.constant 6 : index
    %c0_470 = arith.constant 0 : index
    %c0_471 = arith.constant 0 : index
    %575 = vector.load %arg2[%c5_468, %c6_469, %c0_470, %c0_471] : memref<6x15x8x8xf32, #tpu.memory_space<vmem>>, vector<1x1x8x8xf32>
    %576 = vector.shape_cast %575 : vector<1x1x8x8xf32> to vector<8x8xf32>
    %cst_472 = arith.constant dense<0.000000e+00> : vector<8x256xf32>
    %577 = tpu.matmul %576, %574, %cst_472 {dimension_numbers = #tpu.dot_dimension_numbers<[1], [0], [0], [1], [0, 0, 1, 1], [], []>} : vector<8x8xf32>, vector<8x256xf32>, vector<8x256xf32> -> vector<8x256xf32>
    %578 = arith.addf %571, %577 : vector<8x256xf32>
    %c5_473 = arith.constant 5 : index
    %c7_474 = arith.constant 7 : index
    %c0_475 = arith.constant 0 : index
    %c0_476 = arith.constant 0 : index
    %579 = vector.load %arg2[%c5_473, %c7_474, %c0_475, %c0_476] : memref<6x15x8x8xf32, #tpu.memory_space<vmem>>, vector<1x1x8x8xf32>
    %580 = vector.shape_cast %579 : vector<1x1x8x8xf32> to vector<8x8xf32>
    %cst_477 = arith.constant dense<0.000000e+00> : vector<8x256xf32>
    %581 = tpu.matmul %580, %525, %cst_477 {dimension_numbers = #tpu.dot_dimension_numbers<[1], [0], [0], [1], [0, 0, 1, 1], [], []>} : vector<8x8xf32>, vector<8x256xf32>, vector<8x256xf32> -> vector<8x256xf32>
    %582 = arith.addf %578, %581 : vector<8x256xf32>
    %c255_i32_478 = arith.constant 255 : i32
    %583 = tpu.dynamic_rotate %525 by %c255_i32_478 dim 1 : vector<8x256xf32>, i32 -> vector<8x256xf32>
    %cst_479 = arith.constant 0.000000e+00 : f32
    %584 = vector.broadcast %cst_479 : f32 to vector<8x256xf32>
    %585 = arith.select %34, %583, %584 : vector<8x256xi1>, vector<8x256xf32>
    %c5_480 = arith.constant 5 : index
    %c8_481 = arith.constant 8 : index
    %c0_482 = arith.constant 0 : index
    %c0_483 = arith.constant 0 : index
    %586 = vector.load %arg2[%c5_480, %c8_481, %c0_482, %c0_483] : memref<6x15x8x8xf32, #tpu.memory_space<vmem>>, vector<1x1x8x8xf32>
    %587 = vector.shape_cast %586 : vector<1x1x8x8xf32> to vector<8x8xf32>
    %cst_484 = arith.constant dense<0.000000e+00> : vector<8x256xf32>
    %588 = tpu.matmul %587, %585, %cst_484 {dimension_numbers = #tpu.dot_dimension_numbers<[1], [0], [0], [1], [0, 0, 1, 1], [], []>} : vector<8x8xf32>, vector<8x256xf32>, vector<8x256xf32> -> vector<8x256xf32>
    %589 = arith.addf %582, %588 : vector<8x256xf32>
    %c254_i32_485 = arith.constant 254 : i32
    %590 = tpu.dynamic_rotate %525 by %c254_i32_485 dim 1 : vector<8x256xf32>, i32 -> vector<8x256xf32>
    %cst_486 = arith.constant 0.000000e+00 : f32
    %591 = vector.broadcast %cst_486 : f32 to vector<8x256xf32>
    %592 = arith.select %201, %590, %591 : vector<8x256xi1>, vector<8x256xf32>
    %c5_487 = arith.constant 5 : index
    %c9_488 = arith.constant 9 : index
    %c0_489 = arith.constant 0 : index
    %c0_490 = arith.constant 0 : index
    %593 = vector.load %arg2[%c5_487, %c9_488, %c0_489, %c0_490] : memref<6x15x8x8xf32, #tpu.memory_space<vmem>>, vector<1x1x8x8xf32>
    %594 = vector.shape_cast %593 : vector<1x1x8x8xf32> to vector<8x8xf32>
    %cst_491 = arith.constant dense<0.000000e+00> : vector<8x256xf32>
    %595 = tpu.matmul %594, %592, %cst_491 {dimension_numbers = #tpu.dot_dimension_numbers<[1], [0], [0], [1], [0, 0, 1, 1], [], []>} : vector<8x8xf32>, vector<8x256xf32>, vector<8x256xf32> -> vector<8x256xf32>
    %596 = arith.addf %589, %595 : vector<8x256xf32>
    %c242_i32_492 = arith.constant 242 : i32
    %597 = tpu.dynamic_rotate %525 by %c242_i32_492 dim 1 : vector<8x256xf32>, i32 -> vector<8x256xf32>
    %cst_493 = arith.constant 0.000000e+00 : f32
    %598 = vector.broadcast %cst_493 : f32 to vector<8x256xf32>
    %599 = arith.select %361, %597, %598 : vector<8x256xi1>, vector<8x256xf32>
    %c5_494 = arith.constant 5 : index
    %c10_495 = arith.constant 10 : index
    %c0_496 = arith.constant 0 : index
    %c0_497 = arith.constant 0 : index
    %600 = vector.load %arg2[%c5_494, %c10_495, %c0_496, %c0_497] : memref<6x15x8x8xf32, #tpu.memory_space<vmem>>, vector<1x1x8x8xf32>
    %601 = vector.shape_cast %600 : vector<1x1x8x8xf32> to vector<8x8xf32>
    %cst_498 = arith.constant dense<0.000000e+00> : vector<8x256xf32>
    %602 = tpu.matmul %601, %599, %cst_498 {dimension_numbers = #tpu.dot_dimension_numbers<[1], [0], [0], [1], [0, 0, 1, 1], [], []>} : vector<8x8xf32>, vector<8x256xf32>, vector<8x256xf32> -> vector<8x256xf32>
    %603 = arith.addf %596, %602 : vector<8x256xf32>
    %c241_i32_499 = arith.constant 241 : i32
    %604 = tpu.dynamic_rotate %525 by %c241_i32_499 dim 1 : vector<8x256xf32>, i32 -> vector<8x256xf32>
    %cst_500 = arith.constant 0.000000e+00 : f32
    %605 = vector.broadcast %cst_500 : f32 to vector<8x256xf32>
    %606 = arith.select %63, %604, %605 : vector<8x256xi1>, vector<8x256xf32>
    %c5_501 = arith.constant 5 : index
    %c11_502 = arith.constant 11 : index
    %c0_503 = arith.constant 0 : index
    %c0_504 = arith.constant 0 : index
    %607 = vector.load %arg2[%c5_501, %c11_502, %c0_503, %c0_504] : memref<6x15x8x8xf32, #tpu.memory_space<vmem>>, vector<1x1x8x8xf32>
    %608 = vector.shape_cast %607 : vector<1x1x8x8xf32> to vector<8x8xf32>
    %cst_505 = arith.constant dense<0.000000e+00> : vector<8x256xf32>
    %609 = tpu.matmul %608, %606, %cst_505 {dimension_numbers = #tpu.dot_dimension_numbers<[1], [0], [0], [1], [0, 0, 1, 1], [], []>} : vector<8x8xf32>, vector<8x256xf32>, vector<8x256xf32> -> vector<8x256xf32>
    %610 = arith.addf %603, %609 : vector<8x256xf32>
    %c240_i32_506 = arith.constant 240 : i32
    %611 = tpu.dynamic_rotate %525 by %c240_i32_506 dim 1 : vector<8x256xf32>, i32 -> vector<8x256xf32>
    %cst_507 = arith.constant 0.000000e+00 : f32
    %612 = vector.broadcast %cst_507 : f32 to vector<8x256xf32>
    %613 = arith.select %62, %611, %612 : vector<8x256xi1>, vector<8x256xf32>
    %c5_508 = arith.constant 5 : index
    %c12_509 = arith.constant 12 : index
    %c0_510 = arith.constant 0 : index
    %c0_511 = arith.constant 0 : index
    %614 = vector.load %arg2[%c5_508, %c12_509, %c0_510, %c0_511] : memref<6x15x8x8xf32, #tpu.memory_space<vmem>>, vector<1x1x8x8xf32>
    %615 = vector.shape_cast %614 : vector<1x1x8x8xf32> to vector<8x8xf32>
    %cst_512 = arith.constant dense<0.000000e+00> : vector<8x256xf32>
    %616 = tpu.matmul %615, %613, %cst_512 {dimension_numbers = #tpu.dot_dimension_numbers<[1], [0], [0], [1], [0, 0, 1, 1], [], []>} : vector<8x8xf32>, vector<8x256xf32>, vector<8x256xf32> -> vector<8x256xf32>
    %617 = arith.addf %610, %616 : vector<8x256xf32>
    %c239_i32_513 = arith.constant 239 : i32
    %618 = tpu.dynamic_rotate %525 by %c239_i32_513 dim 1 : vector<8x256xf32>, i32 -> vector<8x256xf32>
    %cst_514 = arith.constant 0.000000e+00 : f32
    %619 = vector.broadcast %cst_514 : f32 to vector<8x256xf32>
    %620 = arith.select %78, %618, %619 : vector<8x256xi1>, vector<8x256xf32>
    %c5_515 = arith.constant 5 : index
    %c13_516 = arith.constant 13 : index
    %c0_517 = arith.constant 0 : index
    %c0_518 = arith.constant 0 : index
    %621 = vector.load %arg2[%c5_515, %c13_516, %c0_517, %c0_518] : memref<6x15x8x8xf32, #tpu.memory_space<vmem>>, vector<1x1x8x8xf32>
    %622 = vector.shape_cast %621 : vector<1x1x8x8xf32> to vector<8x8xf32>
    %cst_519 = arith.constant dense<0.000000e+00> : vector<8x256xf32>
    %623 = tpu.matmul %622, %620, %cst_519 {dimension_numbers = #tpu.dot_dimension_numbers<[1], [0], [0], [1], [0, 0, 1, 1], [], []>} : vector<8x8xf32>, vector<8x256xf32>, vector<8x256xf32> -> vector<8x256xf32>
    %624 = arith.addf %617, %623 : vector<8x256xf32>
    %c238_i32_520 = arith.constant 238 : i32
    %625 = tpu.dynamic_rotate %525 by %c238_i32_520 dim 1 : vector<8x256xf32>, i32 -> vector<8x256xf32>
    %cst_521 = arith.constant 0.000000e+00 : f32
    %626 = vector.broadcast %cst_521 : f32 to vector<8x256xf32>
    %627 = arith.select %390, %625, %626 : vector<8x256xi1>, vector<8x256xf32>
    %c5_522 = arith.constant 5 : index
    %c14_523 = arith.constant 14 : index
    %c0_524 = arith.constant 0 : index
    %c0_525 = arith.constant 0 : index
    %628 = vector.load %arg2[%c5_522, %c14_523, %c0_524, %c0_525] : memref<6x15x8x8xf32, #tpu.memory_space<vmem>>, vector<1x1x8x8xf32>
    %629 = vector.shape_cast %628 : vector<1x1x8x8xf32> to vector<8x8xf32>
    %cst_526 = arith.constant dense<0.000000e+00> : vector<8x256xf32>
    %630 = tpu.matmul %629, %627, %cst_526 {dimension_numbers = #tpu.dot_dimension_numbers<[1], [0], [0], [1], [0, 0, 1, 1], [], []>} : vector<8x8xf32>, vector<8x256xf32>, vector<8x256xf32> -> vector<8x256xf32>
    %631 = arith.addf %624, %630 : vector<8x256xf32>
    %632 = arith.addf %397, %631 : vector<8x256xf32>
    %c0_527 = arith.constant 0 : index
    %c0_528 = arith.constant 0 : index
    %633 = vector.load %arg4[%c0_527, %c0_528] : memref<8x256xf32, #tpu.memory_space<vmem>>, vector<8x256xf32>
    tpu.vector_store %arg4[%c0_527, %c0_528], %632 {strides = array<i32>} : memref<8x256xf32, #tpu.memory_space<vmem>>, vector<8x256xf32>,
    return
  }
  func.func @transform_0(%arg0: i32) -> (i32, i32) {
    %c0_i32 = arith.constant 0 : i32
    %c0_i32_0 = arith.constant 0 : i32
    %c0_i32_1 = arith.constant 0 : i32
    return %c0_i32, %c0_i32_0 : i32, i32
  }
  func.func @transform_1(%arg0: i32) -> (i32, i32, i32, i32) {
    %c0_i32 = arith.constant 0 : i32
    %c0_i32_0 = arith.constant 0 : i32
    %c0_i32_1 = arith.constant 0 : i32
    %c0_i32_2 = arith.constant 0 : i32
    %c0_i32_3 = arith.constant 0 : i32
    return %c0_i32, %c0_i32_0, %c0_i32_1, %c0_i32_2 : i32, i32, i32, i32
  }
  func.func @transform_2(%arg0: i32) -> (i32, i32, i32) {
    %c0_i32 = arith.constant 0 : i32
    %c0_i32_0 = arith.constant 0 : i32
    %c0_i32_1 = arith.constant 0 : i32
    %c0_i32_2 = arith.constant 0 : i32
    return %c0_i32, %c0_i32_0, %c0_i32_1 : i32, i32, i32
  }
  func.func @transform_3(%arg0: i32) -> (i32, i32) {
    %c0_i32 = arith.constant 0 : i32
    %c0_i32_0 = arith.constant 0 : i32
    %c0_i32_1 = arith.constant 0 : i32
    return %c0_i32, %c0_i32_0 : i32, i32
  }
}

</mosaic_0001>

<bundles_post_ra>
// kernel: tile.33
= control target key start
LH: loop header
LB: loop body
LE: loop exit
PB: predicated region body
PF: predicated region fallthrough
CT: control target
= control target key end

     0   :  { %s22_s0 = inlined_call_operand.vmem [shape: f32[4], index: 0, kind: input, shape index: {}]   ;;  %s23_s1 = inlined_call_operand.vmem [shape: f32[2,4], index: 1, kind: output, shape index: {}]  }
   0x1   :  { %v4_v0 = vld [vmem:[%s22_s0] ss:$0 sm:$0xff] }
   0x2   :  { %5 = vst [vmem:[%s23_s1] sm:$0x3] %v4_v0 }

// kernel: tile.54
= control target key start
LH: loop header
LB: loop body
LE: loop exit
PB: predicated region body
PF: predicated region fallthrough
CT: control target
= control target key end

     0   :  { %vm7_vm0 = vcmask 31744   ;;  %vm13_vm1 = vcmask 64544   ;;  %s39_s0 = inlined_call_operand.vmem [shape: f32[2,4], index: 0, kind: input, shape index: {}]   ;;  %s40_s1 = inlined_call_operand.vmem [shape: f32[1,8,1], index: 1, kind: output, shape index: {}]  }
   0x1   :  { %v4_v0 = vld [vmem:[%s39_s0] sm:$0x3]  ;;  %s22_s0 = smov 4  }
   0x2   :  { %5 = vst [vmem:[#allocation1] sm:$0x3] %v4_v0 }
   0x9   :  { %v10_v1 = vld [vmem:[#allocation1 + $0x1] sm:$0x1]   ;;  %v6_v2 = vld [vmem:[#allocation1] sm:$0x1]  }
   0xa   :  { %11 = vrot.lane.b32.xlu0 %v10_v1, %s22_s0  ;;  %8 = vst.msk [vmem:[#allocation0] sm:$0x1] %vm7_vm0, %v6_v2  }
  0x7c   :  { %v12_v3 = vpop.permute.xlu0 %11  }
  0x7d   :  { %14 = vst.msk [vmem:[#allocation0] sm:$0x1] %vm13_vm1, %v12_v3  }
  0x84   :  { %v18_v4 = vld [vmem:[#allocation0] sm:$0x1] }
  0x85   :  { %20 = vst [vmem:[%s40_s1] sm:$0x1] %v18_v4 }

// kernel: resblock_forward_pallas.1
= control target key start
LH: loop header
LB: loop body
LE: loop exit
PB: predicated region body
PF: predicated region fallthrough
CT: control target
= control target key end

     0   :  { %v7338_v2 = vmov 0.0   ;;  %s7339_s16 = smov 16   ;;  %s7341_s17 = smov 15   ;;  %v7347_v7 = vmov 0   ;;  %v14_v9 = vlaneseq  ;;  %vm49_vm8 = vcmask 64512   ;;  %s8839_s0 = inlined_call_operand.vmem [shape: f32[8,256], index: 0, kind: input, shape index: {}]   ;;  %s8840_s2 = inlined_call_operand.vmem [shape: f32[6,8,1], index: 2, kind: input, shape index: {}]   ;;  %s8841_s1 = inlined_call_operand.vmem [shape: f32[6,15,8,8], index: 1, kind: input, shape index: {}]   ;;  %s8842_s3 = inlined_call_operand.vmem [shape: f32[8,256], index: 3, kind: output, shape index: {}]  }
   0x1   :  { %v7387_v0 = vld [vmem:[%s8839_s0] sm:$0xff]  ;;  %v7392_v1 = vld [vmem:[%s8839_s0 + $0x8] sm:$0xff]  ;;  %117 = vmatprep.mubr.f32.mxu0 %v7338_v2  ;;  %913 = vmatprep.mubr.f32.mxu1 %v7338_v2  ;;  %s7340_s0 = smov 17   ;;  %s7342_s18 = smov 1   ;;  %v6868_v33 = vld [vmem:[%s8841_s1 + $0x10] sm:$0xff] }
   0x2   :  { %vm21_vm0 = vcmp.gt.f32.partialorder %v7387_v0, 0.0  ;;  %v23_v3 = vmul.f32 0.1, %v7387_v0  ;;  %v24_v4 = vmul.f32 0.1, %v7392_v1  ;;  %vm22_vm1 = vcmp.gt.f32.partialorder %v7392_v1, 0.0  ;;  %7336 = vset.pattern.permute.xlu0 %v7347_v7  ;;  %7337 = vset.pattern.permute.xlu1 %v7347_v7 }
   0x3   :  { %s7343_s19 = smov 127   ;;  %s7344_s20 = smov 113   ;;  %v27_v8 = vld [vmem:[%s8840_s2] sm:$0xff]  ;;  %v7441_v10 = vand.u32 127, %v14_v9  ;;  %v6865_v29 = vld [vmem:[%s8841_s1 + $0x8] sm:$0xff]  ;;  %v6872_v37 = vld [vmem:[%s8841_s1 + $0x18] sm:$0xff] }
   0x4   :  { %v7401_v5 = vsel %vm21_vm0, %v7387_v0, %v23_v3  ;;  %v7408_v6 = vsel %vm22_vm1, %v7392_v1, %v24_v4  ;;  %s7345_s21 = smov 112   ;;  %s7346_s22 = smov 111   ;;  %v48_v21 = vld [vmem:[%s8841_s1] sm:$0xff]  ;;  %v6878_v47 = vld [vmem:[%s8841_s1 + $0x28] sm:$0xff]  ;;  %v6882_v52 = vld [vmem:[%s8841_s1 + $0x30] sm:$0xff] }
   0x5   :  { %126 = vrot.lane.b32.xlu1 %v7401_v5, %s7339_s16  ;;  %33 = vrot.lane.b32.xlu0 %v7401_v5, %s7340_s0  ;;  %v7444_v11 = vadd.s32 128, %v7441_v10  ;;  %v7447_v12 = vand.u32 15, %v7441_v10  ;;  %vm8852_vm2 = vcmp.ge.s32.totalorder %v7441_v10, 16  ;;  %vm8850_vm4 = vcmp.lt.s32.totalorder %v7441_v10, 16  ;;  %v6876_v41 = vld [vmem:[%s8841_s1 + $0x20] sm:$0xff]  ;;  %v6886_v56 = vld [vmem:[%s8841_s1 + $0x38] sm:$0xff] }
   0x6   :  { %vm8851_vm5 = vcmp.lt.s32.totalorder %v7441_v10, 17  ;;  %vm8849_vm9 = vcmp.lt.s32.totalorder %v7441_v10, 15  ;;  %vm8844_vm12 = vcmp.lt.s32.totalorder %v7441_v10, 1  ;;  %vm8843_vm14 = vcmp.lt.s32.totalorder %v7441_v10, 127  ;;  %v6889_v58 = vld [vmem:[%s8841_s1 + $0x40] sm:$0xff]  ;;  %v6893_v7 = vld [vmem:[%s8840_s2 + $0x8] sm:$0xff] }
   0x7   :  { %v7450_v13 = vand.u32 15, %v7444_v11  ;;  %vm8864_vm3 = vcmp.ge.s32.totalorder %v7447_v12, 1  ;;  %vm8876_vm11 = vcmp.lt.s32.totalorder %v7447_v12, 15  ;;  %vm8845_vm15 = vcmp.lt.s32.totalorder %v7441_v10, 113  ;;  %s7348_s23 = smov 50   ;;  %s7349_s24 = smov 49  }
   0x8   :  { %vm7461_vm7 = vmand %vm8852_vm2, %vm8864_vm3  ;;  %vm8847_vm0 = vcmp.lt.s32.totalorder %v7444_v11, 240  ;;  %s7350_s25 = smov 48   ;;  %s7351_s26 = smov 47   ;;  %v7139_v44 = vld [vmem:[%s8841_s1 + $0x2b0] sm:$0xff]  ;;  %v7146_v55 = vld [vmem:[%s8841_s1 + $0x2c0] sm:$0xff] }
   0x9   :  { %128 = vrot.lane.b32.xlu1 %v7408_v6, %s7339_s16  ;;  %35 = vrot.lane.b32.xlu0 %v7408_v6, %s7340_s0  ;;  %vm8870_vm6 = vcmp.ge.s32.totalorder %v7450_v13, 1  ;;  %vm8856_vm10 = vcmp.lt.s32.totalorder %v7450_v13, 15  ;;  %vm7501_vm13 = vmand %vm8852_vm2, %vm8876_vm11  ;;  %s7352_s27 = smov 46   ;;  %s7353_s28 = smov 2  }
   0xa   :  { %vm7547_vm1 = vmand %vm8847_vm0, %vm8870_vm6  ;;  %s7354_s29 = smov 126   ;;  %s7355_s30 = smov 82  }
   0xb   :  { %s7356_s4 = smov 81   ;;  %s7357_s5 = smov 80  }
   0xc   :  { %s7358_s6 = smov 79   ;;  %s7359_s7 = smov 78  }
   0xd   :  { %215 = vrot.lane.b32.xlu1 %v7408_v6, %s7341_s17  ;;  %213 = vrot.lane.b32.xlu0 %v7401_v5, %s7341_s17  ;;  %s7360_s8 = smov 18   ;;  %s7361_s9 = smov 14  }
   0xe   :  { %s7362_s10 = smov 114   ;;  %s7363_s11 = smov 110  }
  0x11   :  { %306 = vrot.lane.b32.xlu1 %v7408_v6, %s7342_s18  ;;  %304 = vrot.lane.b32.xlu0 %v7401_v5, %s7342_s18 }
  0x15   :  { %471 = vrot.lane.b32.xlu1 %v7408_v6, %s7343_s19  ;;  %469 = vrot.lane.b32.xlu0 %v7401_v5, %s7343_s19 }
  0x19   :  { %558 = vrot.lane.b32.xlu1 %v7408_v6, %s7344_s20  ;;  %556 = vrot.lane.b32.xlu0 %v7401_v5, %s7344_s20 }
  0x1d   :  { %649 = vrot.lane.b32.xlu1 %v7408_v6, %s7345_s21  ;;  %647 = vrot.lane.b32.xlu0 %v7401_v5, %s7345_s21 }
  0x21   :  { %736 = vrot.lane.b32.xlu1 %v7408_v6, %s7346_s22  ;;  %734 = vrot.lane.b32.xlu0 %v7401_v5, %s7346_s22 }
  0x25   :  { %30 = vperm.xlu0 %7336, %v27_v8  }
  0x77   :  { %v127_v14 = vpop.permute.xlu1 %126  ;;  %v34_v15 = vpop.permute.xlu0 %33 }
  0x7b   :  { %v129_v16 = vpop.permute.xlu1 %128  ;;  %v36_v17 = vpop.permute.xlu0 %35 }
  0x7c   :  { %v38_v19 = vsel %vm8851_vm5, %v34_v15, %v36_v17  ;;  %v39_v20 = vsel %vm8851_vm5, %v36_v17, %v34_v15  ;;  %v131_v22 = vsel %vm8850_vm4, %v127_v14, %v129_v16  ;;  %v132_v23 = vsel %vm8850_vm4, %v129_v16, %v127_v14  ;;  %v6894_v17 = vld [vmem:[%s8841_s1 + $0x78] sm:$0xff] }
  0x7d   :  { %6862 = vmatprep.subr.msk.mxu0 %vm8870_vm6, %v38_v19 }
  0x7e   :  { %6863 = vmatpush1.msk.msra.mxu0 %vm7461_vm7, %v39_v20 }
  0x7f   :  { %6864 = vmatmul.mubr.msk.f32.vlgmr.msra.gmra.mrb[0].mxu0 %vm49_vm8, %v48_v21  ;;  %140 = vmatprep.subr.mxu0 %v131_v22  ;;  %v216_v24 = vpop.permute.xlu1 %215  ;;  %v214_v25 = vpop.permute.xlu0 %213 }
  0x80   :  { %6866 = vmatpush1.msk.msra.mxu0 %vm8852_vm2, %v132_v23  ;;  %204 = vmatprep.mubr.f32.mxu0 %v7338_v2  ;;  %v218_v26 = vsel %vm8849_vm9, %v214_v25, %v216_v24  ;;  %v219_v30 = vsel %vm8849_vm9, %v216_v24, %v214_v25  ;;  %v6898_v25 = vld [vmem:[%s8841_s1 + $0x80] sm:$0xff] }
  0x81   :  { %6869 = vmatprep.subr.msk.mxu0 %vm8856_vm10, %v218_v26 }
  0x83   :  { %v307_v27 = vpop.permute.xlu1 %306  ;;  %v305_v28 = vpop.permute.xlu0 %304 }
  0x84   :  { %v309_v32 = vsel %vm8844_vm12, %v305_v28, %v307_v27  ;;  %v310_v34 = vsel %vm8844_vm12, %v307_v27, %v305_v28  ;;  %vm8846_vm12 = vcmp.lt.s32.totalorder %v7441_v10, 111 }
  0x87   :  { %6867 = vmatmul.mubr.msk.f32.vlgmr.msra.gmra.mrb[0].mxu0 %vm49_vm8, %v6865_v29  ;;  %v472_v35 = vpop.permute.xlu1 %471  ;;  %v470_v36 = vpop.permute.xlu0 %469 }
  0x88   :  { %6870 = vmatpush1.msk.msra.mxu0 %vm7501_vm13, %v219_v30  ;;  %295 = vmatprep.mubr.f32.mxu0 %v7338_v2  ;;  %v475_v38 = vsel %vm8843_vm14, %v472_v35, %v470_v36  ;;  %v474_v42 = vsel %vm8843_vm14, %v470_v36, %v472_v35  ;;  %vm8848_vm14 = vcmp.lt.s32.totalorder %v7441_v10, 112  ;;  %v6901_v30 = vld [vmem:[%s8841_s1 + $0x88] sm:$0xff] }
  0x89   :  { %6873 = vmatprep.subr.msk.mxu0 %vm8870_vm6, %v309_v32 }
  0x8b   :  { %v559_v39 = vpop.permute.xlu1 %558  ;;  %v557_v40 = vpop.permute.xlu0 %556 }
  0x8c   :  { %v562_v43 = vsel %vm8845_vm15, %v559_v39, %v557_v40  ;;  %v561_v48 = vsel %vm8845_vm15, %v557_v40, %v559_v39  ;;  %vm7583_vm15 = vmand %vm8847_vm0, %vm8856_vm10 }
  0x8f   :  { %6871 = vmatmul.mubr.msk.f32.vlgmr.msra.gmra.mrb[0].mxu0 %vm49_vm8, %v6868_v33  ;;  %v650_v45 = vpop.permute.xlu1 %649  ;;  %v648_v46 = vpop.permute.xlu0 %647  ;;  %v6905_v33 = vld [vmem:[%s8841_s1 + $0x90] sm:$0xff] }
  0x90   :  { %6874 = vmatpush1.msk.msra.mxu0 %vm8864_vm3, %v310_v34  ;;  %382 = vmatprep.mubr.f32.mxu0 %v7338_v2  ;;  %v653_v49 = vsel %vm8848_vm14, %v650_v45, %v648_v46  ;;  %v652_v53 = vsel %vm8848_vm14, %v648_v46, %v650_v45 }
  0x91   :  { %396 = vmatprep.subr.mxu0 %v7408_v6 }
  0x93   :  { %v737_v50 = vpop.permute.xlu1 %736  ;;  %v735_v51 = vpop.permute.xlu0 %734 }
  0x94   :  { %v740_v54 = vsel %vm8846_vm12, %v737_v50, %v735_v51  ;;  %v739_v57 = vsel %vm8846_vm12, %v735_v51, %v737_v50 }
  0x97   :  { %6875 = vmatmul.mubr.msk.f32.vlgmr.msra.gmra.mrb[0].mxu0 %vm49_vm8, %v6872_v37  ;;  %v6909_v37 = vld [vmem:[%s8841_s1 + $0x98] sm:$0xff] }
  0x98   :  { %397 = vmatpush1.msra.mxu0 %v7401_v5  ;;  %460 = vmatprep.mubr.f32.mxu0 %v7338_v2 }
  0x99   :  { %6879 = vmatprep.subr.msk.mxu0 %vm8856_vm10, %v475_v38 }
  0x9f   :  { %6877 = vmatmul.mubr.msk.f32.vlgmr.msra.gmra.mrb[0].mxu0 %vm49_vm8, %v6876_v41 }
  0xa0   :  { %6880 = vmatpush1.msk.msra.mxu0 %vm8876_vm11, %v474_v42  ;;  %547 = vmatprep.mubr.f32.mxu0 %v7338_v2  ;;  %v6911_v42 = vld [vmem:[%s8841_s1 + $0xa0] sm:$0xff] }
  0xa1   :  { %6883 = vmatprep.subr.msk.mxu0 %vm7547_vm1, %v562_v43 }
  0xa4   :  { %v31_v59 = vpop.permute.xlu0 %30 }
  0xa7   :  { %6881 = vmatmul.mubr.msk.f32.vlgmr.msra.gmra.mrb[0].mxu0 %vm49_vm8, %v6878_v47 }
  0xa8   :  { %6884 = vmatpush1.msk.msra.mxu0 %vm8864_vm3, %v561_v48  ;;  %638 = vmatprep.mubr.f32.mxu0 %v7338_v2  ;;  %v6915_v48 = vld [vmem:[%s8841_s1 + $0xa8] sm:$0xff] }
  0xa9   :  { %6887 = vmatprep.subr.msk.mxu0 %vm8847_vm0, %v653_v49 }
  0xaf   :  { %6885 = vmatmul.mubr.msk.f32.vlgmr.msra.gmra.mrb[0].mxu0 %vm49_vm8, %v6882_v52 }
  0xb0   :  { %662 = vmatpush1.msra.mxu0 %v652_v53  ;;  %725 = vmatprep.mubr.f32.mxu0 %v7338_v2  ;;  %v6919_v53 = vld [vmem:[%s8841_s1 + $0xb0] sm:$0xff] }
  0xb1   :  { %6890 = vmatprep.subr.msk.mxu0 %vm7583_vm15, %v740_v54 }
  0xb7   :  { %6888 = vmatmul.mubr.msk.f32.vlgmr.msra.gmra.mrb[0].mxu0 %vm49_vm8, %v6886_v56  ;;  %v6922_v56 = vld [vmem:[%s8841_s1 + $0xb8] sm:$0xff] }
  0xb8   :  { %6891 = vmatpush1.msk.msra.mxu0 %vm8876_vm11, %v739_v57  ;;  %814 = vmatprep.mubr.f32.mxu0 %v7338_v2 }
  0xbf   :  { %6892 = vmatmul.mubr.msk.f32.vlgmr.msra.gmra.mrb[0].mxu0 %vm49_vm8, %v6889_v58 }
  0xc0   :  { %1701 = vmatprep.mubr.f32.mxu0 %v7338_v2 }
 0x192   :  { %v816_v60 = vpop.f32.mrb[0].mxu0 }
 0x193   :  { %v7154_v61 = vadd.f32 %v816_v60, %v31_v59  ;;  %v818_v62 = vpop.f32.mrb[1].mxu0 }
 0x194   :  { %v7155_v63 = vadd.f32 %v818_v62, %v31_v59 }
 0x195   :  { %vm823_vm12 = vcmp.gt.f32.partialorder %v7154_v61, 0.0  ;;  %v825_v3 = vmul.f32 0.1, %v7154_v61 }
 0x196   :  { %v826_v5 = vmul.f32 0.1, %v7155_v63  ;;  %vm824_vm0 = vcmp.gt.f32.partialorder %v7155_v63, 0.0 }
 0x197   :  { %v827_v4 = vsel %vm823_vm12, %v7154_v61, %v825_v3  ;;  %vm8885_vm12 = vcmp.lt.s32.totalorder %v7441_v10, 1 }
 0x198   :  { %922 = vrot.lane.b32.xlu0 %v827_v4, %s7339_s16  ;;  %836 = vrot.lane.b32.xlu1 %v827_v4, %s7340_s0  ;;  %v828_v6 = vsel %vm824_vm0, %v7155_v63, %v826_v5  ;;  %vm8886_vm0 = vmmov %vm8885_vm12 }
 0x19c   :  { %1008 = vrot.lane.b32.xlu0 %v827_v4, %s7341_s17  ;;  %838 = vrot.lane.b32.xlu1 %v828_v6, %s7340_s0 }
 0x1a0   :  { %1094 = vrot.lane.b32.xlu0 %v827_v4, %s7342_s18  ;;  %924 = vrot.lane.b32.xlu1 %v828_v6, %s7339_s16 }
 0x1a4   :  { %1258 = vrot.lane.b32.xlu0 %v827_v4, %s7343_s19  ;;  %1010 = vrot.lane.b32.xlu1 %v828_v6, %s7341_s17 }
 0x1a8   :  { %1344 = vrot.lane.b32.xlu0 %v827_v4, %s7344_s20  ;;  %1096 = vrot.lane.b32.xlu1 %v828_v6, %s7342_s18 }
 0x1ac   :  { %1430 = vrot.lane.b32.xlu0 %v827_v4, %s7345_s21  ;;  %1260 = vrot.lane.b32.xlu1 %v828_v6, %s7343_s19 }
 0x1b0   :  { %1516 = vrot.lane.b32.xlu0 %v827_v4, %s7346_s22  ;;  %1346 = vrot.lane.b32.xlu1 %v828_v6, %s7344_s20 }
 0x1b4   :  { %833 = vperm.xlu0 %7336, %v6893_v7   ;;  %1432 = vrot.lane.b32.xlu1 %v828_v6, %s7345_s21 }
 0x1b8   :  { %1518 = vrot.lane.b32.xlu1 %v828_v6, %s7346_s22 }
 0x20a   :  { %v837_v8 = vpop.permute.xlu1 %836  ;;  %v923_v9 = vpop.permute.xlu0 %922 }
 0x20e   :  { %v839_v14 = vpop.permute.xlu1 %838  ;;  %v1009_v22 = vpop.permute.xlu0 %1008 }
 0x20f   :  { %v840_v15 = vsel %vm8851_vm5, %v837_v8, %v839_v14  ;;  %v841_v16 = vsel %vm8851_vm5, %v839_v14, %v837_v8  ;;  %v6927_v14 = vld [vmem:[%s8841_s1 + $0xf0] sm:$0xff]  ;;  %vm8853_vm5 = vcmp.lt.s32.totalorder %v7441_v10, 49 }
 0x210   :  { %6895 = vmatprep.subr.msk.mxu1 %vm8870_vm6, %v840_v15 }
 0x211   :  { %6896 = vmatpush1.msk.msra.mxu1 %vm7461_vm7, %v841_v16 }
 0x212   :  { %6897 = vmatmul.mubr.msk.f32.vlgmr.msra.gmra.mrb[0].mxu1 %vm49_vm8, %v6894_v17  ;;  %v925_v19 = vpop.permute.xlu1 %924  ;;  %v1095_v26 = vpop.permute.xlu0 %1094 }
 0x213   :  { %v927_v20 = vsel %vm8850_vm4, %v925_v19, %v923_v9  ;;  %v926_v21 = vsel %vm8850_vm4, %v923_v9, %v925_v19  ;;  %999 = vmatprep.mubr.f32.mxu1 %v7338_v2 }
 0x214   :  { %935 = vmatprep.subr.mxu1 %v926_v21 }
 0x215   :  { %6899 = vmatpush1.msk.msra.mxu1 %vm8852_vm2, %v927_v20 }
 0x216   :  { %v1011_v23 = vpop.permute.xlu1 %1010  ;;  %v1259_v35 = vpop.permute.xlu0 %1258 }
 0x217   :  { %v1012_v24 = vsel %vm8849_vm9, %v1009_v22, %v1011_v23  ;;  %v1013_v27 = vsel %vm8849_vm9, %v1011_v23, %v1009_v22  ;;  %vm8860_vm9 = vcmp.ge.s32.totalorder %v7450_v13, 2  ;;  %v6931_v23 = vld [vmem:[%s8841_s1 + $0xf8] sm:$0xff] }
 0x218   :  { %6902 = vmatprep.subr.msk.mxu1 %vm8856_vm10, %v1012_v24 }
 0x21a   :  { %6900 = vmatmul.mubr.msk.f32.vlgmr.msra.gmra.mrb[0].mxu1 %vm49_vm8, %v6898_v25  ;;  %v1097_v28 = vpop.permute.xlu1 %1096  ;;  %v1345_v39 = vpop.permute.xlu0 %1344 }
 0x21b   :  { %6903 = vmatpush1.msk.msra.mxu1 %vm7501_vm13, %v1013_v27  ;;  %v1098_v29 = vsel %vm8885_vm12, %v1095_v26, %v1097_v28  ;;  %1085 = vmatprep.mubr.f32.mxu1 %v7338_v2  ;;  %v1099_v32 = vsel %vm8886_vm0, %v1097_v28, %v1095_v26  ;;  %vm8887_vm12 = vcmp.lt.s32.totalorder %v7441_v10, 127  ;;  %v6935_v28 = vld [vmem:[%s8841_s1 + $0x100] sm:$0xff] }
 0x21c   :  { %6906 = vmatprep.subr.msk.mxu1 %vm8870_vm6, %v1098_v29  ;;  %vm8888_vm0 = vmmov %vm8887_vm12 }
 0x21e   :  { %v1261_v34 = vpop.permute.xlu1 %1260  ;;  %v1431_v45 = vpop.permute.xlu0 %1430 }
 0x21f   :  { %v1263_v36 = vsel %vm8887_vm12, %v1261_v34, %v1259_v35  ;;  %v1262_v40 = vsel %vm8888_vm0, %v1259_v35, %v1261_v34  ;;  %vm8889_vm12 = vcmp.lt.s32.totalorder %v7441_v10, 113  ;;  %v6938_v34 = vld [vmem:[%s8841_s1 + $0x108] sm:$0xff] }
 0x220   :  { %vm8890_vm0 = vmmov %vm8889_vm12 }
 0x222   :  { %6904 = vmatmul.mubr.msk.f32.vlgmr.msra.gmra.mrb[0].mxu1 %vm49_vm8, %v6901_v30  ;;  %v1347_v38 = vpop.permute.xlu1 %1346  ;;  %v1517_v50 = vpop.permute.xlu0 %1516 }
 0x223   :  { %6907 = vmatpush1.msk.msra.mxu1 %vm8864_vm3, %v1099_v32  ;;  %1171 = vmatprep.mubr.f32.mxu1 %v7338_v2  ;;  %v1349_v41 = vsel %vm8889_vm12, %v1347_v38, %v1345_v39  ;;  %v1348_v46 = vsel %vm8890_vm0, %v1345_v39, %v1347_v38  ;;  %vm8891_vm12 = vcmp.lt.s32.totalorder %v7444_v11, 240  ;;  %vm8892_vm0 = vcmp.lt.s32.totalorder %v7441_v10, 111  ;;  %v6942_v39 = vld [vmem:[%s8841_s1 + $0x110] sm:$0xff] }
 0x224   :  { %1185 = vmatprep.subr.mxu1 %v828_v6 }
 0x226   :  { %v1433_v43 = vpop.permute.xlu1 %1432 }
 0x227   :  { %v1435_v47 = vsel %vm8848_vm14, %v1433_v43, %v1431_v45  ;;  %v1434_v51 = vsel %vm8848_vm14, %v1431_v45, %v1433_v43  ;;  %vm8855_vm14 = vcmp.lt.s32.totalorder %v7441_v10, 50  ;;  %v6946_v45 = vld [vmem:[%s8841_s1 + $0x118] sm:$0xff] }
 0x22a   :  { %6908 = vmatmul.mubr.msk.f32.vlgmr.msra.gmra.mrb[0].mxu1 %vm49_vm8, %v6905_v33  ;;  %v1519_v49 = vpop.permute.xlu1 %1518 }
 0x22b   :  { %1186 = vmatpush1.msra.mxu1 %v827_v4  ;;  %1249 = vmatprep.mubr.f32.mxu1 %v7338_v2  ;;  %v1521_v52 = vsel %vm8892_vm0, %v1519_v49, %v1517_v50 }
 0x22c   :  { %6912 = vmatprep.subr.msk.mxu1 %vm8856_vm10, %v1263_v36 }
 0x232   :  { %6910 = vmatmul.mubr.msk.f32.vlgmr.msra.gmra.mrb[0].mxu1 %vm49_vm8, %v6909_v37 }
 0x233   :  { %6913 = vmatpush1.msk.msra.mxu1 %vm8876_vm11, %v1262_v40  ;;  %1335 = vmatprep.mubr.f32.mxu1 %v7338_v2  ;;  %v834_v57 = vpop.permute.xlu0 %833 }
 0x234   :  { %6916 = vmatprep.subr.msk.mxu1 %vm7547_vm1, %v1349_v41 }
 0x23a   :  { %6914 = vmatmul.mubr.msk.f32.vlgmr.msra.gmra.mrb[0].mxu1 %vm49_vm8, %v6911_v42 }
 0x23b   :  { %6917 = vmatpush1.msk.msra.mxu1 %vm8864_vm3, %v1348_v46  ;;  %1421 = vmatprep.mubr.f32.mxu1 %v7338_v2 }
 0x23c   :  { %6920 = vmatprep.subr.msk.mxu1 %vm8891_vm12, %v1435_v47  ;;  %vm8893_vm12 = vmmov %vm8892_vm0  ;;  %v6950_v47 = vld [vmem:[%s8841_s1 + $0x120] sm:$0xff] }
 0x23d   :  { %v1520_v54 = vsel %vm8893_vm12, %v1517_v50, %v1519_v49 }
 0x242   :  { %6918 = vmatmul.mubr.msk.f32.vlgmr.msra.gmra.mrb[0].mxu1 %vm49_vm8, %v6915_v48 }
 0x243   :  { %1444 = vmatpush1.msra.mxu1 %v1434_v51  ;;  %1507 = vmatprep.mubr.f32.mxu1 %v7338_v2  ;;  %v6954_v51 = vld [vmem:[%s8841_s1 + $0x128] sm:$0xff] }
 0x244   :  { %6923 = vmatprep.subr.msk.mxu1 %vm7583_vm15, %v1521_v52 }
 0x24a   :  { %6921 = vmatmul.mubr.msk.f32.vlgmr.msra.gmra.mrb[0].mxu1 %vm49_vm8, %v6919_v53 }
 0x24b   :  { %6924 = vmatpush1.msk.msra.mxu1 %vm8876_vm11, %v1520_v54  ;;  %1593 = vmatprep.mubr.f32.mxu1 %v7338_v2 }
 0x252   :  { %6925 = vmatmul.mubr.msk.f32.vlgmr.msra.gmra.mrb[0].mxu1 %vm49_vm8, %v6922_v56 }
 0x253   :  { %3028 = vmatprep.mubr.f32.mxu1 %v7338_v2 }
 0x325   :  { %v1595_v58 = vpop.f32.mrb[0].mxu1 }
 0x326   :  { %v7156_v59 = vadd.f32 %v1595_v58, %v834_v57  ;;  %v1597_v60 = vpop.f32.mrb[1].mxu1 }
 0x327   :  { %v7157_v61 = vadd.f32 %v1597_v60, %v834_v57  ;;  %v6956_v57 = vld [vmem:[%s8841_s1 + $0x130] sm:$0xff] }
 0x328   :  { %v7730_v62 = vadd.f32 %v7156_v59, %v7387_v0  ;;  %v6926_v0 = vld [vmem:[%s8840_s2 + $0x10] sm:$0xff] }
 0x329   :  { %v7733_v63 = vadd.f32 %v7157_v61, %v7392_v1 }
 0x32a   :  { %vm1604_vm0 = vcmp.gt.f32.partialorder %v7730_v62, 0.0  ;;  %v1606_v3 = vmul.f32 0.1, %v7730_v62 }
 0x32b   :  { %vm1605_vm12 = vcmp.gt.f32.partialorder %v7733_v63, 0.0  ;;  %v1607_v4 = vmul.f32 0.1, %v7733_v63 }
 0x32c   :  { %v7740_v5 = vsel %vm1604_vm0, %v7730_v62, %v1606_v3  ;;  %vm1624_vm0 = vcmp.ge.s32.totalorder %v7441_v10, 48  ;;  %v6960_v3 = vld [vmem:[%s8841_s1 + $0x138] sm:$0xff] }
 0x32d   :  { %v7743_v6 = vsel %vm1605_vm12, %v7733_v63, %v1607_v4  ;;  %1617 = vrot.lane.b32.xlu1 %v7740_v5, %s7348_s23  ;;  %vm8875_vm12 = vcmp.ge.s32.totalorder %v7447_v12, 2  ;;  %vm1717_vm2 = vmand %vm1624_vm0, %vm8864_vm3 }
 0x32e   :  { %1619 = vrot.lane.b32.xlu0 %v7743_v6, %s7348_s23  ;;  %vm1628_vm4 = vmand %vm1624_vm0, %vm8875_vm12 }
 0x331   :  { %1710 = vrot.lane.b32.xlu1 %v7740_v5, %s7349_s24 }
 0x332   :  { %1712 = vrot.lane.b32.xlu0 %v7743_v6, %s7349_s24 }
 0x335   :  { %1799 = vrot.lane.b32.xlu1 %v7740_v5, %s7350_s25 }
 0x336   :  { %1801 = vrot.lane.b32.xlu0 %v7743_v6, %s7350_s25 }
 0x339   :  { %1886 = vrot.lane.b32.xlu1 %v7740_v5, %s7351_s26 }
 0x33a   :  { %1888 = vrot.lane.b32.xlu0 %v7743_v6, %s7351_s26 }
 0x33d   :  { %1975 = vrot.lane.b32.xlu1 %v7740_v5, %s7352_s27 }
 0x33e   :  { %1977 = vrot.lane.b32.xlu0 %v7743_v6, %s7352_s27 }
 0x341   :  { %2066 = vrot.lane.b32.xlu1 %v7740_v5, %s7353_s28 }
 0x342   :  { %2068 = vrot.lane.b32.xlu0 %v7743_v6, %s7353_s28 }
 0x345   :  { %2153 = vrot.lane.b32.xlu1 %v7740_v5, %s7342_s18 }
 0x346   :  { %2155 = vrot.lane.b32.xlu0 %v7743_v6, %s7342_s18 }
 0x349   :  { %2317 = vrot.lane.b32.xlu1 %v7740_v5, %s7343_s19 }
 0x34a   :  { %2319 = vrot.lane.b32.xlu0 %v7743_v6, %s7343_s19 }
 0x34d   :  { %2403 = vrot.lane.b32.xlu1 %v7740_v5, %s7354_s29 }
 0x34e   :  { %2405 = vrot.lane.b32.xlu0 %v7743_v6, %s7354_s29 }
 0x351   :  { %2490 = vrot.lane.b32.xlu1 %v7740_v5, %s7355_s30 }
 0x352   :  { %2492 = vrot.lane.b32.xlu0 %v7743_v6, %s7355_s30 }
 0x355   :  { %2581 = vrot.lane.b32.xlu1 %v7740_v5, %s7356_s4 }
 0x356   :  { %2583 = vrot.lane.b32.xlu0 %v7743_v6, %s7356_s4 }
 0x359   :  { %2670 = vrot.lane.b32.xlu1 %v7740_v5, %s7357_s5 }
 0x35a   :  { %2672 = vrot.lane.b32.xlu0 %v7743_v6, %s7357_s5 }
 0x35d   :  { %2757 = vrot.lane.b32.xlu1 %v7740_v5, %s7358_s6 }
 0x35e   :  { %2759 = vrot.lane.b32.xlu0 %v7743_v6, %s7358_s6 }
 0x361   :  { %2846 = vrot.lane.b32.xlu1 %v7740_v5, %s7359_s7 }
 0x362   :  { %2848 = vrot.lane.b32.xlu0 %v7743_v6, %s7359_s7 }
 0x365   :  { %1614 = vperm.xlu1 %7337, %v6926_v0  }
 0x39f   :  { %v1618_v1 = vpop.permute.xlu1 %1617 }
 0x3a0   :  { %v1620_v7 = vpop.permute.xlu0 %1619 }
 0x3a1   :  { %v1623_v8 = vsel %vm8855_vm14, %v1620_v7, %v1618_v1  ;;  %v1622_v9 = vsel %vm8855_vm14, %v1618_v1, %v1620_v7  ;;  %vm8874_vm14 = vcmp.lt.s32.totalorder %v7450_v13, 14  ;;  %v6964_v1 = vld [vmem:[%s8841_s1 + $0x140] sm:$0xff] }
 0x3a2   :  { %6928 = vmatprep.subr.msk.mxu0 %vm8860_vm9, %v1622_v9 }
 0x3a3   :  { %v1711_v15 = vpop.permute.xlu1 %1710  ;;  %6929 = vmatpush1.msk.msra.mxu0 %vm1628_vm4, %v1623_v8  ;;  %vm8854_vm4 = vcmp.lt.s32.totalorder %v7441_v10, 48 }
 0x3a4   :  { %6930 = vmatmul.mubr.msk.f32.vlgmr.msra.gmra.mrb[2].mxu0 %vm49_vm8, %v6927_v14  ;;  %v1713_v16 = vpop.permute.xlu0 %1712 }
 0x3a5   :  { %v1716_v17 = vsel %vm8853_vm5, %v1713_v16, %v1711_v15  ;;  %v1715_v19 = vsel %vm8853_vm5, %v1711_v15, %v1713_v16  ;;  %1790 = vmatprep.mubr.f32.mxu0 %v7338_v2  ;;  %vm8857_vm5 = vcmp.lt.s32.totalorder %v7441_v10, 47  ;;  %v6968_v15 = vld [vmem:[%s8841_s1 + $0x148] sm:$0xff] }
 0x3a6   :  { %6932 = vmatprep.subr.msk.mxu0 %vm8870_vm6, %v1715_v19 }
 0x3a7   :  { %v1800_v20 = vpop.permute.xlu1 %1799  ;;  %6933 = vmatpush1.msk.msra.mxu0 %vm1717_vm2, %v1716_v17  ;;  %vm8858_vm2 = vcmp.lt.s32.totalorder %v7441_v10, 46 }
 0x3a8   :  { %v1802_v21 = vpop.permute.xlu0 %1801 }
 0x3a9   :  { %v1804_v22 = vsel %vm8854_vm4, %v1800_v20, %v1802_v21  ;;  %v1805_v25 = vsel %vm8854_vm4, %v1802_v21, %v1800_v20  ;;  %vm1893_vm4 = vmand %vm1624_vm0, %vm8876_vm11  ;;  %v6972_v21 = vld [vmem:[%s8841_s1 + $0x150] sm:$0xff] }
 0x3aa   :  { %1813 = vmatprep.subr.mxu0 %v1804_v22 }
 0x3ab   :  { %v1887_v24 = vpop.permute.xlu1 %1886 }
 0x3ac   :  { %6934 = vmatmul.mubr.msk.f32.vlgmr.msra.gmra.mrb[2].mxu0 %vm49_vm8, %v6931_v23  ;;  %v1889_v26 = vpop.permute.xlu0 %1888 }
 0x3ad   :  { %6936 = vmatpush1.msk.msra.mxu0 %vm1624_vm0, %v1805_v25  ;;  %v1891_v27 = vsel %vm8857_vm5, %v1887_v24, %v1889_v26  ;;  %1877 = vmatprep.mubr.f32.mxu0 %v7338_v2  ;;  %v1892_v32 = vsel %vm8857_vm5, %v1889_v26, %v1887_v24  ;;  %vm8859_vm5 = vcmp.lt.s32.totalorder %v7441_v10, 2  ;;  %v6975_v26 = vld [vmem:[%s8841_s1 + $0x158] sm:$0xff] }
 0x3ae   :  { %6939 = vmatprep.subr.msk.mxu0 %vm8856_vm10, %v1891_v27  ;;  %vm8873_vm10 = vcmp.lt.s32.totalorder %v7447_v12, 14 }
 0x3af   :  { %v1976_v29 = vpop.permute.xlu1 %1975 }
 0x3b0   :  { %v1978_v30 = vpop.permute.xlu0 %1977 }
 0x3b1   :  { %v1980_v33 = vsel %vm8858_vm2, %v1976_v29, %v1978_v30  ;;  %v1981_v37 = vsel %vm8858_vm2, %v1978_v30, %v1976_v29  ;;  %vm8861_vm2 = vcmp.lt.s32.totalorder %v7441_v10, 126 }
 0x3b3   :  { %v2067_v35 = vpop.permute.xlu1 %2066 }
 0x3b4   :  { %6937 = vmatmul.mubr.msk.f32.vlgmr.msra.gmra.mrb[2].mxu0 %vm49_vm8, %v6935_v28  ;;  %v2069_v36 = vpop.permute.xlu0 %2068  ;;  %v6979_v28 = vld [vmem:[%s8841_s1 + $0x160] sm:$0xff] }
 0x3b5   :  { %6940 = vmatpush1.msk.msra.mxu0 %vm1893_vm4, %v1892_v32  ;;  %1966 = vmatprep.mubr.f32.mxu0 %v7338_v2  ;;  %vm1984_vm4 = vmand %vm1624_vm0, %vm8873_vm10  ;;  %v2071_v38 = vsel %vm8859_vm5, %v2067_v35, %v2069_v36  ;;  %v2072_v42 = vsel %vm8859_vm5, %v2069_v36, %v2067_v35  ;;  %vm8894_vm0 = vcmp.lt.s32.totalorder %v7441_v10, 1 }
 0x3b6   :  { %6943 = vmatprep.subr.msk.mxu0 %vm8874_vm14, %v1980_v33 }
 0x3b7   :  { %v2154_v40 = vpop.permute.xlu1 %2153 }
 0x3b8   :  { %v2156_v41 = vpop.permute.xlu0 %2155 }
 0x3b9   :  { %v2157_v43 = vsel %vm8894_vm0, %v2154_v40, %v2156_v41 }
 0x3bb   :  { %v2318_v48 = vpop.permute.xlu1 %2317 }
 0x3bc   :  { %6941 = vmatmul.mubr.msk.f32.vlgmr.msra.gmra.mrb[2].mxu0 %vm49_vm8, %v6938_v34  ;;  %v2320_v49 = vpop.permute.xlu0 %2319 }
 0x3bd   :  { %6944 = vmatpush1.msk.msra.mxu0 %vm1984_vm4, %v1981_v37  ;;  %2057 = vmatprep.mubr.f32.mxu0 %v7338_v2  ;;  %vm8895_vm4 = vmmov %vm8894_vm0  ;;  %vm8896_vm0 = vcmp.lt.s32.totalorder %v7441_v10, 127 }
 0x3be   :  { %6947 = vmatprep.subr.msk.mxu0 %vm8860_vm9, %v2071_v38  ;;  %v2158_v46 = vsel %vm8895_vm4, %v2156_v41, %v2154_v40  ;;  %v2322_v50 = vsel %vm8896_vm0, %v2320_v49, %v2318_v48  ;;  %vm8897_vm4 = vcmp.lt.s32.totalorder %v7450_v13, 15  ;;  %vm8898_vm5 = vmmov %vm8896_vm0  ;;  %vm2498_vm0 = vcmp.lt.s32.totalorder %v7444_v11, 208 }
 0x3bf   :  { %v2404_v52 = vpop.permute.xlu1 %2403  ;;  %v2321_v54 = vsel %vm8898_vm5, %v2318_v48, %v2320_v49  ;;  %vm8863_vm5 = vcmp.lt.s32.totalorder %v7441_v10, 82 }
 0x3c0   :  { %v2406_v53 = vpop.permute.xlu0 %2405 }
 0x3c1   :  { %v2409_v56 = vsel %vm8861_vm2, %v2406_v53, %v2404_v52  ;;  %v2408_v60 = vsel %vm8861_vm2, %v2404_v52, %v2406_v53  ;;  %vm2589_vm2 = vmand %vm2498_vm0, %vm8870_vm6 }
 0x3c3   :  { %v2491_v58 = vpop.permute.xlu1 %2490 }
 0x3c4   :  { %6945 = vmatmul.mubr.msk.f32.vlgmr.msra.gmra.mrb[2].mxu0 %vm49_vm8, %v6942_v39  ;;  %v2493_v59 = vpop.permute.xlu0 %2492  ;;  %v6983_v39 = vld [vmem:[%s8840_s2 + $0x18] sm:$0xff] }
 0x3c5   :  { %6948 = vmatpush1.msk.msra.mxu0 %vm8875_vm12, %v2072_v42  ;;  %2144 = vmatprep.mubr.f32.mxu0 %v7338_v2  ;;  %v2496_v61 = vsel %vm8863_vm5, %v2493_v59, %v2491_v58 }
 0x3c6   :  { %6951 = vmatprep.subr.msk.mxu0 %vm8870_vm6, %v2157_v43 }
 0x3c7   :  { %v2582_v4 = vpop.permute.xlu1 %2581 }
 0x3cb   :  { %v2671_v7 = vpop.permute.xlu1 %2670 }
 0x3cc   :  { %6949 = vmatmul.mubr.msk.f32.vlgmr.msra.gmra.mrb[2].mxu0 %vm49_vm8, %v6946_v45 }
 0x3cd   :  { %6952 = vmatpush1.msk.msra.mxu0 %vm8864_vm3, %v2158_v46  ;;  %2230 = vmatprep.mubr.f32.mxu0 %v7338_v2  ;;  %v6984_v46 = vld [vmem:[%s8841_s1 + $0x168] sm:$0xff] }
 0x3ce   :  { %2244 = vmatprep.subr.mxu0 %v7743_v6  ;;  %v2495_v6 = vsel %vm8863_vm5, %v2491_v58, %v2493_v59 }
 0x3cf   :  { %v2758_v16 = vpop.permute.xlu1 %2757 }
 0x3d3   :  { %v2847_v22 = vpop.permute.xlu1 %2846 }
 0x3d4   :  { %6953 = vmatmul.mubr.msk.f32.vlgmr.msra.gmra.mrb[2].mxu0 %vm49_vm8, %v6950_v47 }
 0x3d5   :  { %2245 = vmatpush1.msra.mxu0 %v7740_v5  ;;  %2308 = vmatprep.mubr.f32.mxu0 %v7338_v2  ;;  %v2584_v5 = vpop.permute.xlu0 %2583 }
 0x3d6   :  { %6957 = vmatprep.subr.msk.mxu0 %vm8897_vm4, %v2322_v50  ;;  %vm2500_vm4 = vmand %vm2498_vm0, %vm8860_vm9  ;;  %vm8862_vm9 = vcmp.lt.s32.totalorder %v7441_v10, 81 }
 0x3d7   :  { %v2587_v0 = vsel %vm8862_vm9, %v2584_v5, %v2582_v4  ;;  %v2586_v9 = vsel %vm8862_vm9, %v2582_v4, %v2584_v5  ;;  %vm8899_vm9 = vcmp.lt.s32.totalorder %v7450_v13, 15 }
 0x3d8   :  { %vm2765_vm5 = vmand %vm2498_vm0, %vm8899_vm9 }
 0x3d9   :  { %v2673_v8 = vpop.permute.xlu0 %2672  ;;  %vm2854_vm9 = vmand %vm2498_vm0, %vm8874_vm14 }
 0x3dc   :  { %6955 = vmatmul.mubr.msk.f32.vlgmr.msra.gmra.mrb[2].mxu0 %vm49_vm8, %v6954_v51 }
 0x3dd   :  { %6958 = vmatpush1.msk.msra.mxu0 %vm8876_vm11, %v2321_v54  ;;  %2394 = vmatprep.mubr.f32.mxu0 %v7338_v2  ;;  %v2760_v17 = vpop.permute.xlu0 %2759  ;;  %v6988_v54 = vld [vmem:[%s8841_s1 + $0x170] sm:$0xff] }
 0x3de   :  { %6961 = vmatprep.subr.msk.mxu0 %vm8874_vm14, %v2409_v56 }
 0x3e1   :  { %v2849_v23 = vpop.permute.xlu0 %2848 }
 0x3e4   :  { %6959 = vmatmul.mubr.msk.f32.vlgmr.msra.gmra.mrb[2].mxu0 %vm49_vm8, %v6956_v57  ;;  %v1615_v29 = vpop.permute.xlu1 %1614 }
 0x3e5   :  { %6962 = vmatpush1.msk.msra.mxu0 %vm8873_vm10, %v2408_v60  ;;  %2481 = vmatprep.mubr.f32.mxu0 %v7338_v2  ;;  %v6992_v60 = vld [vmem:[%s8841_s1 + $0x178] sm:$0xff] }
 0x3e6   :  { %6965 = vmatprep.subr.msk.mxu0 %vm2500_vm4, %v2496_v61  ;;  %vm8868_vm4 = vcmp.lt.s32.totalorder %v7441_v10, 80 }
 0x3e7   :  { %v2676_v14 = vsel %vm8868_vm4, %v2673_v8, %v2671_v7  ;;  %v2675_v19 = vsel %vm8868_vm4, %v2671_v7, %v2673_v8 }
 0x3ec   :  { %6963 = vmatmul.mubr.msk.f32.vlgmr.msra.gmra.mrb[2].mxu0 %vm49_vm8, %v6960_v3 }
 0x3ed   :  { %6966 = vmatpush1.msk.msra.mxu0 %vm8875_vm12, %v2495_v6  ;;  %2572 = vmatprep.mubr.f32.mxu0 %v7338_v2  ;;  %v6995_v6 = vld [vmem:[%s8841_s1 + $0x180] sm:$0xff] }
 0x3ee   :  { %6969 = vmatprep.subr.msk.mxu0 %vm2589_vm2, %v2587_v0  ;;  %vm8866_vm2 = vcmp.lt.s32.totalorder %v7441_v10, 79 }
 0x3ef   :  { %v2763_v20 = vsel %vm8866_vm2, %v2760_v17, %v2758_v16  ;;  %v2762_v24 = vsel %vm8866_vm2, %v2758_v16, %v2760_v17 }
 0x3f4   :  { %6967 = vmatmul.mubr.msk.f32.vlgmr.msra.gmra.mrb[2].mxu0 %vm49_vm8, %v6964_v1 }
 0x3f5   :  { %6970 = vmatpush1.msk.msra.mxu0 %vm8864_vm3, %v2586_v9  ;;  %2661 = vmatprep.mubr.f32.mxu0 %v7338_v2  ;;  %vm8865_vm3 = vcmp.lt.s32.totalorder %v7441_v10, 78 }
 0x3f6   :  { %6973 = vmatprep.subr.msk.mxu0 %vm2498_vm0, %v2676_v14  ;;  %v2852_v25 = vsel %vm8865_vm3, %v2849_v23, %v2847_v22  ;;  %v2851_v27 = vsel %vm8865_vm3, %v2847_v22, %v2849_v23  ;;  %vm8903_vm3 = vcmp.ge.s32.totalorder %v7450_v13, 2  ;;  %v6999_v14 = vld [vmem:[%s8841_s1 + $0x188] sm:$0xff]  ;;  %v7007_v22 = vld [vmem:[%s8841_s1 + $0x198] sm:$0xff] }
 0x3fc   :  { %6971 = vmatmul.mubr.msk.f32.vlgmr.msra.gmra.mrb[2].mxu0 %vm49_vm8, %v6968_v15 }
 0x3fd   :  { %2685 = vmatpush1.msra.mxu0 %v2675_v19  ;;  %2748 = vmatprep.mubr.f32.mxu0 %v7338_v2 }
 0x3fe   :  { %6976 = vmatprep.subr.msk.mxu0 %vm2765_vm5, %v2763_v20  ;;  %v7003_v20 = vld [vmem:[%s8841_s1 + $0x190] sm:$0xff] }
 0x404   :  { %6974 = vmatmul.mubr.msk.f32.vlgmr.msra.gmra.mrb[2].mxu0 %vm49_vm8, %v6972_v21 }
 0x405   :  { %6977 = vmatpush1.msk.msra.mxu0 %vm8876_vm11, %v2762_v24  ;;  %2837 = vmatprep.mubr.f32.mxu0 %v7338_v2 }
 0x406   :  { %6980 = vmatprep.subr.msk.mxu0 %vm2854_vm9, %v2852_v25  ;;  %vm8867_vm9 = vcmp.lt.s32.totalorder %v7441_v10, 18 }
 0x40c   :  { %6978 = vmatmul.mubr.msk.f32.vlgmr.msra.gmra.mrb[2].mxu0 %vm49_vm8, %v6975_v26  ;;  %v7011_v26 = vld [vmem:[%s8841_s1 + $0x1a0] sm:$0xff] }
 0x40d   :  { %6981 = vmatpush1.msk.msra.mxu0 %vm8873_vm10, %v2851_v27  ;;  %2926 = vmatprep.mubr.f32.mxu0 %v7338_v2 }
 0x414   :  { %6982 = vmatmul.mubr.msk.f32.vlgmr.msra.gmra.mrb[2].mxu0 %vm49_vm8, %v6979_v28 }
 0x415   :  { %4338 = vmatprep.mubr.f32.mxu0 %v7338_v2 }
 0x4e7   :  { %v2928_v30 = vpop.f32.mrb[2].mxu0 }
 0x4e8   :  { %v7158_v32 = vadd.f32 %v2928_v30, %v1615_v29  ;;  %v2930_v33 = vpop.f32.mrb[3].mxu0 }
 0x4e9   :  { %v7159_v34 = vadd.f32 %v2930_v33, %v1615_v29 }
 0x4ea   :  { %vm2935_vm0 = vcmp.gt.f32.partialorder %v7158_v32, 0.0  ;;  %v2937_v35 = vmul.f32 0.1, %v7158_v32 }
 0x4eb   :  { %vm2936_vm5 = vcmp.gt.f32.partialorder %v7159_v34, 0.0  ;;  %v2938_v36 = vmul.f32 0.1, %v7159_v34 }
 0x4ec   :  { %v8023_v37 = vsel %vm2935_vm0, %v7158_v32, %v2937_v35  ;;  %vm8900_vm0 = vcmp.ge.s32.totalorder %v7441_v10, 16  ;;  %v7013_v32 = vld [vmem:[%s8841_s1 + $0x1a8] sm:$0xff] }
 0x4ed   :  { %v8025_v38 = vsel %vm2936_vm5, %v7159_v34, %v2938_v36  ;;  %2948 = vrot.lane.b32.xlu0 %v8023_v37, %s7360_s8  ;;  %vm8091_vm5 = vmand %vm8900_vm0, %vm8875_vm12  ;;  %vm8904_vm0 = vcmp.lt.s32.totalorder %v7441_v10, 17  ;;  %v7135_v35 = vld [vmem:[%s8841_s1 + $0x2a8] sm:$0xff] }
 0x4ee   :  { %2950 = vrot.lane.b32.xlu1 %v8025_v38, %s7360_s8  ;;  %vm8905_vm2 = vmmov %vm8904_vm0 }
 0x4f1   :  { %3037 = vrot.lane.b32.xlu0 %v8023_v37, %s7340_s0 }
 0x4f2   :  { %3039 = vrot.lane.b32.xlu1 %v8025_v38, %s7340_s0 }
 0x4f5   :  { %3123 = vrot.lane.b32.xlu0 %v8023_v37, %s7339_s16 }
 0x4f6   :  { %3125 = vrot.lane.b32.xlu1 %v8025_v38, %s7339_s16 }
 0x4f9   :  { %3209 = vrot.lane.b32.xlu0 %v8023_v37, %s7341_s17 }
 0x4fa   :  { %3211 = vrot.lane.b32.xlu1 %v8025_v38, %s7341_s17 }
 0x4fd   :  { %3295 = vrot.lane.b32.xlu0 %v8023_v37, %s7361_s9 }
 0x4fe   :  { %3297 = vrot.lane.b32.xlu1 %v8025_v38, %s7361_s9 }
 0x501   :  { %3384 = vrot.lane.b32.xlu0 %v8023_v37, %s7353_s28 }
 0x502   :  { %3386 = vrot.lane.b32.xlu1 %v8025_v38, %s7353_s28 }
 0x505   :  { %3470 = vrot.lane.b32.xlu0 %v8023_v37, %s7342_s18 }
 0x506   :  { %3472 = vrot.lane.b32.xlu1 %v8025_v38, %s7342_s18 }
 0x509   :  { %3634 = vrot.lane.b32.xlu0 %v8023_v37, %s7343_s19 }
 0x50a   :  { %3636 = vrot.lane.b32.xlu1 %v8025_v38, %s7343_s19 }
 0x50d   :  { %3720 = vrot.lane.b32.xlu0 %v8023_v37, %s7354_s29 }
 0x50e   :  { %3722 = vrot.lane.b32.xlu1 %v8025_v38, %s7354_s29 }
 0x511   :  { %3806 = vrot.lane.b32.xlu0 %v8023_v37, %s7362_s10 }
 0x512   :  { %3808 = vrot.lane.b32.xlu1 %v8025_v38, %s7362_s10 }
 0x515   :  { %3895 = vrot.lane.b32.xlu0 %v8023_v37, %s7344_s20 }
 0x516   :  { %3897 = vrot.lane.b32.xlu1 %v8025_v38, %s7344_s20 }
 0x519   :  { %3981 = vrot.lane.b32.xlu0 %v8023_v37, %s7345_s21 }
 0x51a   :  { %3983 = vrot.lane.b32.xlu1 %v8025_v38, %s7345_s21 }
 0x51d   :  { %4067 = vrot.lane.b32.xlu0 %v8023_v37, %s7346_s22 }
 0x51e   :  { %4069 = vrot.lane.b32.xlu1 %v8025_v38, %s7346_s22 }
 0x521   :  { %4153 = vrot.lane.b32.xlu0 %v8023_v37, %s7363_s11 }
 0x522   :  { %4155 = vrot.lane.b32.xlu1 %v8025_v38, %s7363_s11 }
 0x525   :  { %2945 = vperm.xlu0 %7336, %v6983_v39  }
 0x55f   :  { %v2949_v40 = vpop.permute.xlu0 %2948 }
 0x560   :  { %v2951_v41 = vpop.permute.xlu1 %2950 }
 0x561   :  { %v2953_v43 = vsel %vm8867_vm9, %v2949_v40, %v2951_v41  ;;  %v2954_v45 = vsel %vm8867_vm9, %v2951_v41, %v2949_v40  ;;  %vm8909_vm9 = vcmp.lt.s32.totalorder %v7441_v10, 15 }
 0x562   :  { %6985 = vmatprep.subr.msk.mxu1 %vm8903_vm3, %v2953_v43  ;;  %vm8906_vm3 = vcmp.lt.s32.totalorder %v7441_v10, 16  ;;  %vm8911_vm4 = vmmov %vm8909_vm9 }
 0x563   :  { %v3038_v47 = vpop.permute.xlu0 %3037  ;;  %6986 = vmatpush1.msk.msra.mxu1 %vm8091_vm5, %v2954_v45  ;;  %v7021_v45 = vld [vmem:[%s8841_s1 + $0x1b8] sm:$0xff] }
 0x564   :  { %6987 = vmatmul.mubr.msk.f32.vlgmr.msra.gmra.mrb[2].mxu1 %vm49_vm8, %v6984_v46  ;;  %v3040_v48 = vpop.permute.xlu1 %3039 }
 0x565   :  { %v3041_v49 = vsel %vm8904_vm0, %v3038_v47, %v3040_v48  ;;  %v3042_v50 = vsel %vm8905_vm2, %v3040_v48, %v3038_v47  ;;  %3114 = vmatprep.mubr.f32.mxu1 %v7338_v2  ;;  %vm8907_vm2 = vmmov %vm8906_vm3  ;;  %vm8908_vm0 = vcmp.ge.s32.totalorder %v7441_v10, 16 }
 0x566   :  { %6989 = vmatprep.subr.msk.mxu1 %vm8870_vm6, %v3041_v49 }
 0x567   :  { %v3124_v51 = vpop.permute.xlu0 %3123  ;;  %6990 = vmatpush1.msk.msra.mxu1 %vm7461_vm7, %v3042_v50  ;;  %v7025_v50 = vld [vmem:[%s8841_s1 + $0x1c0] sm:$0xff] }
 0x568   :  { %v3126_v52 = vpop.permute.xlu1 %3125 }
 0x569   :  { %v3127_v53 = vsel %vm8906_vm3, %v3124_v51, %v3126_v52  ;;  %v3128_v57 = vsel %vm8907_vm2, %v3126_v52, %v3124_v51  ;;  %vm8910_vm3 = vcmp.lt.s32.totalorder %v7450_v13, 15  ;;  %vm8869_vm2 = vcmp.lt.s32.totalorder %v7441_v10, 14 }
 0x56a   :  { %3136 = vmatprep.subr.mxu1 %v3127_v53 }
 0x56b   :  { %v3210_v56 = vpop.permute.xlu0 %3209 }
 0x56c   :  { %6991 = vmatmul.mubr.msk.f32.vlgmr.msra.gmra.mrb[2].mxu1 %vm49_vm8, %v6988_v54  ;;  %v3212_v58 = vpop.permute.xlu1 %3211 }
 0x56d   :  { %6993 = vmatpush1.msk.msra.mxu1 %vm8908_vm0, %v3128_v57  ;;  %v3213_v59 = vsel %vm8909_vm9, %v3210_v56, %v3212_v58  ;;  %3200 = vmatprep.mubr.f32.mxu1 %v7338_v2  ;;  %v3214_v4 = vsel %vm8911_vm4, %v3212_v58, %v3210_v56  ;;  %vm8912_vm4 = vmmov %vm8908_vm0  ;;  %vm8915_vm0 = vcmp.lt.s32.totalorder %v7441_v10, 2  ;;  %v7029_v56 = vld [vmem:[%s8841_s1 + $0x1c8] sm:$0xff] }
 0x56e   :  { %6996 = vmatprep.subr.msk.mxu1 %vm8910_vm3, %v3213_v59  ;;  %vm8152_vm9 = vmand %vm8912_vm4, %vm8873_vm10  ;;  %vm8916_vm3 = vcmp.ge.s32.totalorder %v7450_v13, 2 }
 0x56f   :  { %v3296_v61 = vpop.permute.xlu0 %3295  ;;  %vm8917_vm4 = vmmov %vm8915_vm0 }
 0x570   :  { %v3298_v3 = vpop.permute.xlu1 %3297 }
 0x571   :  { %v3300_v5 = vsel %vm8869_vm2, %v3296_v61, %v3298_v3  ;;  %v3301_v8 = vsel %vm8869_vm2, %v3298_v3, %v3296_v61  ;;  %v7032_v3 = vld [vmem:[%s8841_s1 + $0x1d0] sm:$0xff] }
 0x573   :  { %v3385_v0 = vpop.permute.xlu0 %3384 }
 0x574   :  { %6994 = vmatmul.mubr.msk.f32.vlgmr.msra.gmra.mrb[2].mxu1 %vm49_vm8, %v6992_v60  ;;  %v3387_v1 = vpop.permute.xlu1 %3386 }
 0x575   :  { %6997 = vmatpush1.msk.msra.mxu1 %vm7501_vm13, %v3214_v4  ;;  %3286 = vmatprep.mubr.f32.mxu1 %v7338_v2  ;;  %v3388_v9 = vsel %vm8915_vm0, %v3385_v0, %v3387_v1  ;;  %v3389_v17 = vsel %vm8917_vm4, %v3387_v1, %v3385_v0  ;;  %vm8918_vm0 = vcmp.lt.s32.totalorder %v7441_v10, 1  ;;  %vm8920_vm4 = vcmp.ge.s32.totalorder %v7447_v12, 1 }
 0x576   :  { %7000 = vmatprep.subr.msk.mxu1 %vm8874_vm14, %v3300_v5  ;;  %v7036_v5 = vld [vmem:[%s8841_s1 + $0x1d8] sm:$0xff] }
 0x577   :  { %v3471_v15 = vpop.permute.xlu0 %3470 }
 0x578   :  { %v3473_v16 = vpop.permute.xlu1 %3472 }
 0x579   :  { %v3474_v19 = vsel %vm8918_vm0, %v3471_v15, %v3473_v16 }
 0x57b   :  { %v3635_v23 = vpop.permute.xlu0 %3634 }
 0x57c   :  { %6998 = vmatmul.mubr.msk.f32.vlgmr.msra.gmra.mrb[2].mxu1 %vm49_vm8, %v6995_v6  ;;  %v3637_v24 = vpop.permute.xlu1 %3636 }
 0x57d   :  { %7001 = vmatpush1.msk.msra.mxu1 %vm8152_vm9, %v3301_v8  ;;  %3375 = vmatprep.mubr.f32.mxu1 %v7338_v2 }
 0x57e   :  { %7004 = vmatprep.subr.msk.mxu1 %vm8916_vm3, %v3388_v9  ;;  %vm8919_vm3 = vmmov %vm8918_vm0  ;;  %vm8921_vm0 = vcmp.lt.s32.totalorder %v7441_v10, 127 }
 0x57f   :  { %v3475_v21 = vsel %vm8919_vm3, %v3473_v16, %v3471_v15  ;;  %v3639_v25 = vsel %vm8921_vm0, %v3637_v24, %v3635_v23  ;;  %vm8922_vm3 = vcmp.lt.s32.totalorder %v7450_v13, 15  ;;  %v3721_v27 = vpop.permute.xlu0 %3720 }
 0x580   :  { %v3723_v28 = vpop.permute.xlu1 %3722 }
 0x583   :  { %v3807_v33 = vpop.permute.xlu0 %3806 }
 0x584   :  { %7002 = vmatmul.mubr.msk.f32.vlgmr.msra.gmra.mrb[2].mxu1 %vm49_vm8, %v6999_v14  ;;  %v3809_v34 = vpop.permute.xlu1 %3808 }
 0x585   :  { %7005 = vmatpush1.msk.msra.mxu1 %vm8875_vm12, %v3389_v17  ;;  %3461 = vmatprep.mubr.f32.mxu1 %v7338_v2 }
 0x586   :  { %7008 = vmatprep.subr.msk.mxu1 %vm8870_vm6, %v3474_v19  ;;  %vm8929_vm6 = vcmp.lt.s32.totalorder %v7441_v10, 126 }
 0x587   :  { %v3724_v36 = vsel %vm8929_vm6, %v3721_v27, %v3723_v28  ;;  %v3896_v39 = vpop.permute.xlu0 %3895  ;;  %vm8930_vm6 = vcmp.lt.s32.totalorder %v7441_v10, 113 }
 0x588   :  { %v3898_v40 = vpop.permute.xlu1 %3897 }
 0x589   :  { %v3900_v43 = vsel %vm8930_vm6, %v3898_v40, %v3896_v39 }
 0x58b   :  { %v3982_v46 = vpop.permute.xlu0 %3981 }
 0x58c   :  { %7006 = vmatmul.mubr.msk.f32.vlgmr.msra.gmra.mrb[2].mxu1 %vm49_vm8, %v7003_v20  ;;  %v3984_v47 = vpop.permute.xlu1 %3983 }
 0x58d   :  { %7009 = vmatpush1.msk.msra.mxu1 %vm8920_vm4, %v3475_v21  ;;  %3547 = vmatprep.mubr.f32.mxu1 %v7338_v2  ;;  %vm8923_vm4 = vmmov %vm8921_vm0  ;;  %vm8924_vm0 = vcmp.lt.s32.totalorder %v7441_v10, 126 }
 0x58e   :  { %3561 = vmatprep.subr.mxu1 %v8025_v38  ;;  %v3638_v29 = vsel %vm8923_vm4, %v3635_v23, %v3637_v24  ;;  %v3725_v30 = vsel %vm8924_vm0, %v3723_v28, %v3721_v27  ;;  %vm8925_vm4 = vcmp.ge.s32.totalorder %v7450_v13, 2  ;;  %vm8926_vm0 = vcmp.lt.s32.totalorder %v7444_v11, 240  ;;  %v7017_v38 = vld [vmem:[%s8841_s1 + $0x1b0] sm:$0xff]  ;;  %v7041_v24 = vld [vmem:[%s8841_s1 + $0x1e0] sm:$0xff] }
 0x58f   :  { %vm8220_vm2 = vmand %vm8926_vm0, %vm8925_vm4  ;;  %vm8932_vm0 = vcmp.lt.s32.totalorder %v7441_v10, 112  ;;  %v4068_v51 = vpop.permute.xlu0 %4067 }
 0x590   :  { %vm8931_vm4 = vmmov %vm8930_vm6  ;;  %v3986_v49 = vsel %vm8932_vm0, %v3984_v47, %v3982_v46  ;;  %vm8933_vm6 = vcmp.ge.s32.totalorder %v7447_v12, 1  ;;  %v4070_v52 = vpop.permute.xlu1 %4069 }
 0x591   :  { %v3899_v48 = vsel %vm8931_vm4, %v3896_v39, %v3898_v40  ;;  %vm8935_vm4 = vmmov %vm8932_vm0  ;;  %vm8936_vm0 = vcmp.lt.s32.totalorder %v7441_v10, 111  ;;  %v7049_v39 = vld [vmem:[%s8841_s1 + $0x1f0] sm:$0xff] }
 0x592   :  { %v3985_v53 = vsel %vm8935_vm4, %v3982_v46, %v3984_v47  ;;  %v4072_v54 = vsel %vm8936_vm0, %v4070_v52, %v4068_v51  ;;  %v4071_v60 = vsel %vm8936_vm0, %v4068_v51, %v4070_v52  ;;  %v7052_v46 = vld [vmem:[%s8841_s1 + $0x1f8] sm:$0xff]  ;;  %v7056_v51 = vld [vmem:[%s8841_s1 + $0x200] sm:$0xff] }
 0x593   :  { %v4154_v57 = vpop.permute.xlu0 %4153 }
 0x594   :  { %7010 = vmatmul.mubr.msk.f32.vlgmr.msra.gmra.mrb[2].mxu1 %vm49_vm8, %v7007_v22  ;;  %v4156_v58 = vpop.permute.xlu1 %4155 }
 0x595   :  { %3562 = vmatpush1.msra.mxu1 %v8023_v37  ;;  %3625 = vmatprep.mubr.f32.mxu1 %v7338_v2 }
 0x596   :  { %7014 = vmatprep.subr.msk.mxu1 %vm8922_vm3, %v3639_v25  ;;  %vm8871_vm3 = vcmp.lt.s32.totalorder %v7441_v10, 114 }
 0x597   :  { %v3812_v37 = vsel %vm8871_vm3, %v3809_v34, %v3807_v33  ;;  %v3811_v41 = vsel %vm8871_vm3, %v3807_v33, %v3809_v34  ;;  %vm8934_vm3 = vcmp.lt.s32.totalorder %v7444_v11, 240  ;;  %v7045_v33 = vld [vmem:[%s8841_s1 + $0x1e8] sm:$0xff] }
 0x59c   :  { %7012 = vmatmul.mubr.msk.f32.vlgmr.msra.gmra.mrb[2].mxu1 %vm49_vm8, %v7011_v26 }
 0x59d   :  { %7015 = vmatpush1.msk.msra.mxu1 %vm8876_vm11, %v3638_v29  ;;  %3711 = vmatprep.mubr.f32.mxu1 %v7338_v2 }
 0x59e   :  { %7018 = vmatprep.subr.msk.mxu1 %vm8874_vm14, %v3725_v30 }
 0x5a4   :  { %7016 = vmatmul.mubr.msk.f32.vlgmr.msra.gmra.mrb[2].mxu1 %vm49_vm8, %v7013_v32  ;;  %v2946_v6 = vpop.permute.xlu0 %2945 }
 0x5a5   :  { %7019 = vmatpush1.msk.msra.mxu1 %vm8873_vm10, %v3724_v36  ;;  %3797 = vmatprep.mubr.f32.mxu1 %v7338_v2 }
 0x5a6   :  { %7022 = vmatprep.subr.msk.mxu1 %vm8220_vm2, %v3812_v37 }
 0x5ac   :  { %7020 = vmatmul.mubr.msk.f32.vlgmr.msra.gmra.mrb[2].mxu1 %vm49_vm8, %v7017_v38 }
 0x5ad   :  { %7023 = vmatpush1.msk.msra.mxu1 %vm8875_vm12, %v3811_v41  ;;  %3886 = vmatprep.mubr.f32.mxu1 %v7338_v2 }
 0x5ae   :  { %7026 = vmatprep.subr.msk.mxu1 %vm7547_vm1, %v3900_v43 }
 0x5b4   :  { %7024 = vmatmul.mubr.msk.f32.vlgmr.msra.gmra.mrb[2].mxu1 %vm49_vm8, %v7021_v45 }
 0x5b5   :  { %7027 = vmatpush1.msk.msra.mxu1 %vm8933_vm6, %v3899_v48  ;;  %3972 = vmatprep.mubr.f32.mxu1 %v7338_v2  ;;  %vm8937_vm6 = vcmp.lt.s32.totalorder %v7444_v11, 240 }
 0x5b6   :  { %7030 = vmatprep.subr.msk.mxu1 %vm8934_vm3, %v3986_v49  ;;  %vm8872_vm3 = vcmp.lt.s32.totalorder %v7441_v10, 110  ;;  %vm8279_vm4 = vmand %vm8937_vm6, %vm8874_vm14  ;;  %vm8942_vm14 = vcmp.ge.s32.totalorder %v7450_v13, 2 }
 0x5b7   :  { %v4159_v61 = vsel %vm8872_vm3, %v4156_v58, %v4154_v57  ;;  %v4158_v4 = vsel %vm8872_vm3, %v4154_v57, %v4156_v58  ;;  %vm8940_vm3 = vcmp.lt.s32.totalorder %v7441_v10, 82  ;;  %v7060_v57 = vld [vmem:[%s8841_s1 + $0x208] sm:$0xff] }
 0x5bc   :  { %7028 = vmatmul.mubr.msk.f32.vlgmr.msra.gmra.mrb[2].mxu1 %vm49_vm8, %v7025_v50 }
 0x5bd   :  { %3995 = vmatpush1.msra.mxu1 %v3985_v53  ;;  %4058 = vmatprep.mubr.f32.mxu1 %v7338_v2 }
 0x5be   :  { %7033 = vmatprep.subr.msk.mxu1 %vm7583_vm15, %v4072_v54 }
 0x5c4   :  { %7031 = vmatmul.mubr.msk.f32.vlgmr.msra.gmra.mrb[2].mxu1 %vm49_vm8, %v7029_v56 }
 0x5c5   :  { %7034 = vmatpush1.msk.msra.mxu1 %vm8876_vm11, %v4071_v60  ;;  %4144 = vmatprep.mubr.f32.mxu1 %v7338_v2  ;;  %vm8944_vm11 = vcmp.lt.s32.totalorder %v7441_v10, 81  ;;  %v7064_v60 = vld [vmem:[%s8841_s1 + $0x210] sm:$0xff] }
 0x5c6   :  { %7037 = vmatprep.subr.msk.mxu1 %vm8279_vm4, %v4159_v61 }
 0x5cc   :  { %7035 = vmatmul.mubr.msk.f32.vlgmr.msra.gmra.mrb[2].mxu1 %vm49_vm8, %v7032_v3 }
 0x5cd   :  { %7038 = vmatpush1.msk.msra.mxu1 %vm8873_vm10, %v4158_v4  ;;  %4233 = vmatprep.mubr.f32.mxu1 %v7338_v2  ;;  %vm8941_vm10 = vmmov %vm8940_vm3 }
 0x5d4   :  { %7039 = vmatmul.mubr.msk.f32.vlgmr.msra.gmra.mrb[2].mxu1 %vm49_vm8, %v7036_v5  ;;  %v7068_v5 = vld [vmem:[%s8841_s1 + $0x218] sm:$0xff] }
 0x5d5   :  { %5649 = vmatprep.mubr.f32.mxu1 %v7338_v2 }
 0x6a7   :  { %v4235_v0 = vpop.f32.mrb[2].mxu1 }
 0x6a8   :  { %v7160_v1 = vadd.f32 %v4235_v0, %v2946_v6  ;;  %v4237_v8 = vpop.f32.mrb[3].mxu1 }
 0x6a9   :  { %v7161_v9 = vadd.f32 %v4237_v8, %v2946_v6 }
 0x6aa   :  { %v8308_v14 = vadd.f32 %v7160_v1, %v7730_v62  ;;  %v7040_v62 = vld [vmem:[%s8840_s2 + $0x20] sm:$0xff] }
 0x6ab   :  { %v8311_v15 = vadd.f32 %v7161_v9, %v7733_v63  ;;  %v7070_v9 = vld [vmem:[%s8841_s1 + $0x220] sm:$0xff] }
 0x6ac   :  { %vm4244_vm6 = vcmp.gt.f32.partialorder %v8308_v14, 0.0  ;;  %v4246_v16 = vmul.f32 0.1, %v8308_v14 }
 0x6ad   :  { %vm4245_vm0 = vcmp.gt.f32.partialorder %v8311_v15, 0.0  ;;  %v4247_v17 = vmul.f32 0.1, %v8311_v15 }
 0x6ae   :  { %v8318_v19 = vsel %vm4244_vm6, %v8308_v14, %v4246_v16  ;;  %vm4263_vm6 = vcmp.ge.s32.totalorder %v7441_v10, 80 }
 0x6af   :  { %v8321_v20 = vsel %vm4245_vm0, %v8311_v15, %v4247_v17  ;;  %4257 = vrot.lane.b32.xlu1 %v8318_v19, %s7355_s30  ;;  %vm4265_vm0 = vmand %vm4263_vm6, %vm8875_vm12  ;;  %vm8943_vm12 = vcmp.ge.s32.totalorder %v7447_v12, 1 }
 0x6b0   :  { %4259 = vrot.lane.b32.xlu0 %v8321_v20, %s7355_s30 }
 0x6b3   :  { %4347 = vrot.lane.b32.xlu1 %v8318_v19, %s7356_s4 }
 0x6b4   :  { %4349 = vrot.lane.b32.xlu0 %v8321_v20, %s7356_s4 }
 0x6b7   :  { %4435 = vrot.lane.b32.xlu1 %v8318_v19, %s7357_s5 }
 0x6b8   :  { %4437 = vrot.lane.b32.xlu0 %v8321_v20, %s7357_s5 }
 0x6bb   :  { %4521 = vrot.lane.b32.xlu1 %v8318_v19, %s7358_s6 }
 0x6bc   :  { %4523 = vrot.lane.b32.xlu0 %v8321_v20, %s7358_s6 }
 0x6bf   :  { %4609 = vrot.lane.b32.xlu1 %v8318_v19, %s7359_s7 }
 0x6c0   :  { %4611 = vrot.lane.b32.xlu0 %v8321_v20, %s7359_s7 }
 0x6c3   :  { %4697 = vrot.lane.b32.xlu1 %v8318_v19, %s7353_s28 }
 0x6c4   :  { %4699 = vrot.lane.b32.xlu0 %v8321_v20, %s7353_s28 }
 0x6c7   :  { %4783 = vrot.lane.b32.xlu1 %v8318_v19, %s7342_s18 }
 0x6c8   :  { %4785 = vrot.lane.b32.xlu0 %v8321_v20, %s7342_s18 }
 0x6cb   :  { %4947 = vrot.lane.b32.xlu1 %v8318_v19, %s7343_s19 }
 0x6cc   :  { %4949 = vrot.lane.b32.xlu0 %v8321_v20, %s7343_s19 }
 0x6cf   :  { %5033 = vrot.lane.b32.xlu1 %v8318_v19, %s7354_s29 }
 0x6d0   :  { %5035 = vrot.lane.b32.xlu0 %v8321_v20, %s7354_s29 }
 0x6d3   :  { %5119 = vrot.lane.b32.xlu1 %v8318_v19, %s7348_s23 }
 0x6d4   :  { %5121 = vrot.lane.b32.xlu0 %v8321_v20, %s7348_s23 }
 0x6d7   :  { %5209 = vrot.lane.b32.xlu1 %v8318_v19, %s7349_s24 }
 0x6d8   :  { %5211 = vrot.lane.b32.xlu0 %v8321_v20, %s7349_s24 }
 0x6db   :  { %5297 = vrot.lane.b32.xlu1 %v8318_v19, %s7350_s25 }
 0x6dc   :  { %5299 = vrot.lane.b32.xlu0 %v8321_v20, %s7350_s25 }
 0x6df   :  { %5383 = vrot.lane.b32.xlu1 %v8318_v19, %s7351_s26 }
 0x6e0   :  { %5385 = vrot.lane.b32.xlu0 %v8321_v20, %s7351_s26 }
 0x6e3   :  { %5471 = vrot.lane.b32.xlu1 %v8318_v19, %s7352_s27 }
 0x6e4   :  { %5473 = vrot.lane.b32.xlu0 %v8321_v20, %s7352_s27 }
 0x6e7   :  { %4254 = vperm.xlu1 %7337, %v7040_v62   ;;  %v7074_v62 = vld [vmem:[%s8841_s1 + $0x228] sm:$0xff] }
 0x721   :  { %v4258_v63 = vpop.permute.xlu1 %4257 }
 0x722   :  { %v4260_v21 = vpop.permute.xlu0 %4259 }
 0x723   :  { %v4261_v22 = vsel %vm8940_vm3, %v4258_v63, %v4260_v21  ;;  %v4262_v23 = vsel %vm8941_vm10, %v4260_v21, %v4258_v63  ;;  %vm4353_vm3 = vmand %vm4263_vm6, %vm8943_vm12  ;;  %vm8949_vm12 = vcmp.lt.s32.totalorder %v7441_v10, 79 }
 0x724   :  { %7042 = vmatprep.subr.msk.mxu0 %vm8942_vm14, %v4261_v22  ;;  %vm8945_vm10 = vmmov %vm8944_vm11  ;;  %vm8946_vm14 = vcmp.ge.s32.totalorder %v7450_v13, 1 }
 0x725   :  { %v4348_v25 = vpop.permute.xlu1 %4347  ;;  %7043 = vmatpush1.msk.msra.mxu0 %vm4265_vm0, %v4262_v23  ;;  %vm8947_vm0 = vcmp.lt.s32.totalorder %v7441_v10, 80 }
 0x726   :  { %7044 = vmatmul.mubr.msk.f32.vlgmr.msra.gmra.mrb[4].mxu0 %vm49_vm8, %v7041_v24  ;;  %v4350_v26 = vpop.permute.xlu0 %4349  ;;  %v7078_v24 = vld [vmem:[%s8841_s1 + $0x230] sm:$0xff] }
 0x727   :  { %v4351_v27 = vsel %vm8944_vm11, %v4348_v25, %v4350_v26  ;;  %v4352_v28 = vsel %vm8945_vm10, %v4350_v26, %v4348_v25  ;;  %4426 = vmatprep.mubr.f32.mxu0 %v7338_v2  ;;  %vm8948_vm11 = vmmov %vm8947_vm0  ;;  %vm8951_vm10 = vcmp.lt.s32.totalorder %v7447_v12, 15 }
 0x728   :  { %7046 = vmatprep.subr.msk.mxu0 %vm8946_vm14, %v4351_v27  ;;  %vm4527_vm14 = vmand %vm4263_vm6, %vm8951_vm10 }
 0x729   :  { %v4436_v29 = vpop.permute.xlu1 %4435  ;;  %7047 = vmatpush1.msk.msra.mxu0 %vm4353_vm3, %v4352_v28  ;;  %vm8950_vm3 = vcmp.lt.s32.totalorder %v7450_v13, 15 }
 0x72a   :  { %v4438_v30 = vpop.permute.xlu0 %4437 }
 0x72b   :  { %v4439_v32 = vsel %vm8947_vm0, %v4436_v29, %v4438_v30  ;;  %v4440_v36 = vsel %vm8948_vm11, %v4438_v30, %v4436_v29  ;;  %vm8952_vm0 = vmmov %vm8949_vm12  ;;  %vm8953_vm11 = vcmp.lt.s32.totalorder %v7441_v10, 78  ;;  %v7082_v29 = vld [vmem:[%s8841_s1 + $0x238] sm:$0xff] }
 0x72c   :  { %4448 = vmatprep.subr.mxu0 %v4439_v32 }
 0x72d   :  { %v4522_v34 = vpop.permute.xlu1 %4521 }
 0x72e   :  { %7048 = vmatmul.mubr.msk.f32.vlgmr.msra.gmra.mrb[4].mxu0 %vm49_vm8, %v7045_v33  ;;  %v4524_v37 = vpop.permute.xlu0 %4523 }
 0x72f   :  { %7050 = vmatpush1.msk.msra.mxu0 %vm4263_vm6, %v4440_v36  ;;  %v4525_v38 = vsel %vm8949_vm12, %v4522_v34, %v4524_v37  ;;  %4512 = vmatprep.mubr.f32.mxu0 %v7338_v2  ;;  %v4526_v43 = vsel %vm8952_vm0, %v4524_v37, %v4522_v34  ;;  %vm8954_vm12 = vcmp.lt.s32.totalorder %v7450_v13, 14  ;;  %vm8956_vm0 = vmmov %vm8953_vm11  ;;  %v7086_v36 = vld [vmem:[%s8841_s1 + $0x240] sm:$0xff] }
 0x730   :  { %7053 = vmatprep.subr.msk.mxu0 %vm8950_vm3, %v4525_v38  ;;  %vm8955_vm3 = vcmp.lt.s32.totalorder %v7447_v12, 14 }
 0x731   :  { %v4610_v40 = vpop.permute.xlu1 %4609  ;;  %vm4615_vm10 = vmand %vm4263_vm6, %vm8955_vm3  ;;  %vm8961_vm3 = vcmp.ge.s32.totalorder %v7447_v12, 2 }
 0x732   :  { %v4612_v41 = vpop.permute.xlu0 %4611 }
 0x733   :  { %v4613_v45 = vsel %vm8953_vm11, %v4610_v40, %v4612_v41  ;;  %v4614_v49 = vsel %vm8956_vm0, %v4612_v41, %v4610_v40  ;;  %vm8958_vm11 = vcmp.ge.s32.totalorder %v7450_v13, 2  ;;  %v7089_v41 = vld [vmem:[%s8841_s1 + $0x248] sm:$0xff] }
 0x735   :  { %v4698_v47 = vpop.permute.xlu1 %4697 }
 0x736   :  { %7051 = vmatmul.mubr.msk.f32.vlgmr.msra.gmra.mrb[4].mxu0 %vm49_vm8, %v7049_v39  ;;  %v4700_v48 = vpop.permute.xlu0 %4699 }
 0x737   :  { %7054 = vmatpush1.msk.msra.mxu0 %vm4527_vm14, %v4526_v43  ;;  %4600 = vmatprep.mubr.f32.mxu0 %v7338_v2  ;;  %vm8957_vm14 = vcmp.lt.s32.totalorder %v7441_v10, 2 }
 0x738   :  { %7057 = vmatprep.subr.msk.mxu0 %vm8954_vm12, %v4613_v45  ;;  %v4701_v50 = vsel %vm8957_vm14, %v4698_v47, %v4700_v48  ;;  %vm8959_vm6 = vmmov %vm8957_vm14  ;;  %vm8960_vm12 = vcmp.lt.s32.totalorder %v7441_v10, 1  ;;  %vm8964_vm14 = vcmp.ge.s32.totalorder %v7447_v12, 1  ;;  %v7093_v45 = vld [vmem:[%s8841_s1 + $0x250] sm:$0xff] }
 0x739   :  { %v4784_v52 = vpop.permute.xlu1 %4783  ;;  %v4702_v54 = vsel %vm8959_vm6, %v4700_v48, %v4698_v47  ;;  %vm8963_vm0 = vmmov %vm8960_vm12  ;;  %vm8966_vm6 = vcmp.lt.s32.totalorder %v7450_v13, 15 }
 0x73a   :  { %v4786_v53 = vpop.permute.xlu0 %4785 }
 0x73b   :  { %v4787_v56 = vsel %vm8960_vm12, %v4784_v52, %v4786_v53  ;;  %v4788_v58 = vsel %vm8963_vm0, %v4786_v53, %v4784_v52  ;;  %vm8970_vm0 = vcmp.lt.s32.totalorder %v7450_v13, 14 }
 0x73d   :  { %v4948_v61 = vpop.permute.xlu1 %4947 }
 0x73e   :  { %7055 = vmatmul.mubr.msk.f32.vlgmr.msra.gmra.mrb[4].mxu0 %vm49_vm8, %v7052_v46  ;;  %v4950_v3 = vpop.permute.xlu0 %4949 }
 0x73f   :  { %7058 = vmatpush1.msk.msra.mxu0 %vm4615_vm10, %v4614_v49  ;;  %4688 = vmatprep.mubr.f32.mxu0 %v7338_v2  ;;  %vm8962_vm10 = vcmp.ge.s32.totalorder %v7450_v13, 1 }
 0x740   :  { %7061 = vmatprep.subr.msk.mxu0 %vm8958_vm11, %v4701_v50  ;;  %vm8965_vm11 = vcmp.lt.s32.totalorder %v7441_v10, 127 }
 0x741   :  { %v4952_v4 = vsel %vm8965_vm11, %v4950_v3, %v4948_v61  ;;  %v5034_v6 = vpop.permute.xlu1 %5033  ;;  %vm8967_vm12 = vmmov %vm8965_vm11  ;;  %vm8971_vm11 = vcmp.ge.s32.totalorder %v7450_v13, 2 }
 0x742   :  { %v5036_v0 = vpop.permute.xlu0 %5035  ;;  %v4951_v1 = vsel %vm8967_vm12, %v4948_v61, %v4950_v3  ;;  %v7098_v3 = vld [vmem:[%s8841_s1 + $0x258] sm:$0xff] }
 0x745   :  { %v5120_v16 = vpop.permute.xlu1 %5119 }
 0x746   :  { %7059 = vmatmul.mubr.msk.f32.vlgmr.msra.gmra.mrb[4].mxu0 %vm49_vm8, %v7056_v51  ;;  %v5122_v17 = vpop.permute.xlu0 %5121 }
 0x747   :  { %7062 = vmatpush1.msk.msra.mxu0 %vm8961_vm3, %v4702_v54  ;;  %4774 = vmatprep.mubr.f32.mxu0 %v7338_v2  ;;  %vm8968_vm3 = vcmp.lt.s32.totalorder %v7441_v10, 126 }
 0x748   :  { %7065 = vmatprep.subr.msk.mxu0 %vm8962_vm10, %v4787_v56  ;;  %v5038_v8 = vsel %vm8968_vm3, %v5036_v0, %v5034_v6  ;;  %vm8969_vm10 = vcmp.lt.s32.totalorder %v7447_v12, 15  ;;  %vm8972_vm12 = vmmov %vm8968_vm3  ;;  %vm8973_vm3 = vcmp.lt.s32.totalorder %v7441_v10, 50  ;;  %v7097_v56 = vld [vmem:[%s8840_s2 + $0x28] sm:$0xff] }
 0x749   :  { %v5210_v63 = vpop.permute.xlu1 %5209 }
 0x74a   :  { %v5212_v21 = vpop.permute.xlu0 %5211 }
 0x74d   :  { %v5298_v25 = vpop.permute.xlu1 %5297 }
 0x74e   :  { %7063 = vmatmul.mubr.msk.f32.vlgmr.msra.gmra.mrb[4].mxu0 %vm49_vm8, %v7060_v57  ;;  %v5300_v26 = vpop.permute.xlu0 %5299 }
 0x74f   :  { %7066 = vmatpush1.msk.msra.mxu0 %vm8964_vm14, %v4788_v58  ;;  %4860 = vmatprep.mubr.f32.mxu0 %v7338_v2  ;;  %vm5126_vm14 = vcmp.lt.s32.totalorder %v7444_v11, 176 }
 0x750   :  { %4874 = vmatprep.subr.mxu0 %v8321_v20  ;;  %v5124_v20 = vsel %vm8973_vm3, %v5122_v17, %v5120_v16 }
 0x751   :  { %v5384_v30 = vpop.permute.xlu1 %5383 }
 0x752   :  { %v5386_v32 = vpop.permute.xlu0 %5385 }
 0x755   :  { %v5472_v37 = vpop.permute.xlu1 %5471 }
 0x756   :  { %7067 = vmatmul.mubr.msk.f32.vlgmr.msra.gmra.mrb[4].mxu0 %vm49_vm8, %v7064_v60  ;;  %v5474_v38 = vpop.permute.xlu0 %5473 }
 0x757   :  { %4875 = vmatpush1.msra.mxu0 %v8318_v19  ;;  %4938 = vmatprep.mubr.f32.mxu0 %v7338_v2  ;;  %v5037_v19 = vsel %vm8972_vm12, %v5034_v6, %v5036_v0  ;;  %vm8976_vm12 = vmmov %vm8973_vm3  ;;  %vm8977_vm3 = vcmp.lt.s32.totalorder %v7441_v10, 49 }
 0x758   :  { %7071 = vmatprep.subr.msk.mxu0 %vm8966_vm6, %v4952_v4  ;;  %vm5128_vm6 = vmand %vm5126_vm14, %vm8971_vm11  ;;  %v5123_v22 = vsel %vm8976_vm12, %v5120_v16, %v5122_v17  ;;  %v5214_v23 = vsel %vm8977_vm3, %v5212_v21, %v5210_v63  ;;  %vm8981_vm12 = vcmp.ge.s32.totalorder %v7447_v12, 1 }
 0x75e   :  { %7069 = vmatmul.mubr.msk.f32.vlgmr.msra.gmra.mrb[4].mxu0 %vm49_vm8, %v7068_v5 }
 0x75f   :  { %7072 = vmatpush1.msk.msra.mxu0 %vm8969_vm10, %v4951_v1  ;;  %5024 = vmatprep.mubr.f32.mxu0 %v7338_v2  ;;  %vm8974_vm10 = vcmp.lt.s32.totalorder %v7447_v12, 14 }
 0x760   :  { %7075 = vmatprep.subr.msk.mxu0 %vm8970_vm0, %v5038_v8  ;;  %vm8975_vm0 = vcmp.ge.s32.totalorder %v7450_v13, 1 }
 0x761   :  { %vm5216_vm11 = vmand %vm5126_vm14, %vm8975_vm0  ;;  %vm8980_vm0 = vcmp.lt.s32.totalorder %v7441_v10, 48 }
 0x762   :  { %v5302_v28 = vsel %vm8980_vm0, %v5300_v26, %v5298_v25 }
 0x766   :  { %7073 = vmatmul.mubr.msk.f32.vlgmr.msra.gmra.mrb[4].mxu0 %vm49_vm8, %v7070_v9  ;;  %v4255_v46 = vpop.permute.xlu1 %4254  ;;  %v7102_v9 = vld [vmem:[%s8841_s1 + $0x260] sm:$0xff] }
 0x767   :  { %7076 = vmatpush1.msk.msra.mxu0 %vm8974_vm10, %v5037_v19  ;;  %5110 = vmatprep.mubr.f32.mxu0 %v7338_v2  ;;  %vm8979_vm10 = vmmov %vm8977_vm3 }
 0x768   :  { %7079 = vmatprep.subr.msk.mxu0 %vm5128_vm6, %v5124_v20  ;;  %vm8978_vm6 = vcmp.ge.s32.totalorder %v7447_v12, 2  ;;  %v5213_v27 = vsel %vm8979_vm10, %v5210_v63, %v5212_v21  ;;  %vm8984_vm10 = vcmp.lt.s32.totalorder %v7441_v10, 47  ;;  %v7106_v20 = vld [vmem:[%s8841_s1 + $0x268] sm:$0xff] }
 0x769   :  { %v5388_v34 = vsel %vm8984_vm10, %v5386_v32, %v5384_v30 }
 0x76e   :  { %7077 = vmatmul.mubr.msk.f32.vlgmr.msra.gmra.mrb[4].mxu0 %vm49_vm8, %v7074_v62 }
 0x76f   :  { %7080 = vmatpush1.msk.msra.mxu0 %vm8978_vm6, %v5123_v22  ;;  %5200 = vmatprep.mubr.f32.mxu0 %v7338_v2  ;;  %vm8983_vm6 = vmmov %vm8980_vm0  ;;  %vm8985_vm0 = vcmp.lt.s32.totalorder %v7450_v13, 14 }
 0x770   :  { %7083 = vmatprep.subr.msk.mxu0 %vm5216_vm11, %v5214_v23  ;;  %vm8982_vm11 = vcmp.lt.s32.totalorder %v7450_v13, 15  ;;  %v5301_v33 = vsel %vm8983_vm6, %v5298_v25, %v5300_v26  ;;  %vm8987_vm6 = vcmp.lt.s32.totalorder %v7441_v10, 46  ;;  %v7109_v23 = vld [vmem:[%s8841_s1 + $0x270] sm:$0xff] }
 0x771   :  { %vm5390_vm3 = vmand %vm5126_vm14, %vm8982_vm11  ;;  %v5476_v40 = vsel %vm8987_vm6, %v5474_v38, %v5472_v37 }
 0x772   :  { %vm8986_vm11 = vmmov %vm8984_vm10  ;;  %vm8990_vm10 = vcmp.lt.s32.totalorder %v7447_v12, 14 }
 0x773   :  { %v5387_v39 = vsel %vm8986_vm11, %v5384_v30, %v5386_v32  ;;  %vm8991_vm11 = vcmp.lt.s32.totalorder %v7441_v10, 18  ;;  %v7117_v32 = vld [vmem:[%s8841_s1 + $0x280] sm:$0xff] }
 0x776   :  { %7081 = vmatmul.mubr.msk.f32.vlgmr.msra.gmra.mrb[4].mxu0 %vm49_vm8, %v7078_v24 }
 0x777   :  { %7084 = vmatpush1.msk.msra.mxu0 %vm8981_vm12, %v5213_v27  ;;  %5288 = vmatprep.mubr.f32.mxu0 %v7338_v2  ;;  %vm5478_vm12 = vmand %vm5126_vm14, %vm8985_vm0  ;;  %v7113_v27 = vld [vmem:[%s8841_s1 + $0x278] sm:$0xff] }
 0x778   :  { %7087 = vmatprep.subr.msk.mxu0 %vm5126_vm14, %v5302_v28  ;;  %vm8989_vm14 = vmmov %vm8987_vm6 }
 0x779   :  { %v5475_v43 = vsel %vm8989_vm14, %v5472_v37, %v5474_v38  ;;  %vm8992_vm6 = vmmov %vm8991_vm11  ;;  %vm8994_vm14 = vcmp.lt.s32.totalorder %v7441_v10, 17 }
 0x77e   :  { %7085 = vmatmul.mubr.msk.f32.vlgmr.msra.gmra.mrb[4].mxu0 %vm49_vm8, %v7082_v29 }
 0x77f   :  { %5311 = vmatpush1.msra.mxu0 %v5301_v33  ;;  %5374 = vmatprep.mubr.f32.mxu0 %v7338_v2 }
 0x780   :  { %7090 = vmatprep.subr.msk.mxu0 %vm5390_vm3, %v5388_v34  ;;  %vm8988_vm3 = vcmp.lt.s32.totalorder %v7447_v12, 15  ;;  %v7121_v34 = vld [vmem:[%s8841_s1 + $0x288] sm:$0xff] }
 0x786   :  { %7088 = vmatmul.mubr.msk.f32.vlgmr.msra.gmra.mrb[4].mxu0 %vm49_vm8, %v7086_v36 }
 0x787   :  { %7091 = vmatpush1.msk.msra.mxu0 %vm8988_vm3, %v5387_v39  ;;  %5462 = vmatprep.mubr.f32.mxu0 %v7338_v2  ;;  %vm8993_vm3 = vcmp.ge.s32.totalorder %v7450_v13, 2  ;;  %v7125_v39 = vld [vmem:[%s8841_s1 + $0x290] sm:$0xff] }
 0x788   :  { %7094 = vmatprep.subr.msk.mxu0 %vm5478_vm12, %v5476_v40 }
 0x78e   :  { %7092 = vmatmul.mubr.msk.f32.vlgmr.msra.gmra.mrb[4].mxu0 %vm49_vm8, %v7089_v41 }
 0x78f   :  { %7095 = vmatpush1.msk.msra.mxu0 %vm8990_vm10, %v5475_v43  ;;  %5550 = vmatprep.mubr.f32.mxu0 %v7338_v2  ;;  %vm8995_vm10 = vmmov %vm8994_vm14 }
 0x796   :  { %7096 = vmatmul.mubr.msk.f32.vlgmr.msra.gmra.mrb[4].mxu0 %vm49_vm8, %v7093_v45 }
 0x869   :  { %v5552_v47 = vpop.f32.mrb[4].mxu0 }
 0x86a   :  { %v7162_v48 = vadd.f32 %v5552_v47, %v4255_v46  ;;  %v5554_v49 = vpop.f32.mrb[5].mxu0 }
 0x86b   :  { %v7163_v50 = vadd.f32 %v5554_v49, %v4255_v46  ;;  %v7127_v46 = vld [vmem:[%s8841_s1 + $0x298] sm:$0xff] }
 0x86c   :  { %vm5559_vm0 = vcmp.gt.f32.partialorder %v7162_v48, 0.0  ;;  %v5561_v51 = vmul.f32 0.1, %v7162_v48 }
 0x86d   :  { %vm5560_vm12 = vcmp.gt.f32.partialorder %v7163_v50, 0.0  ;;  %v5562_v52 = vmul.f32 0.1, %v7163_v50 }
 0x86e   :  { %v8584_v53 = vsel %vm5559_vm0, %v7162_v48, %v5561_v51  ;;  %vm8996_vm0 = vcmp.ge.s32.totalorder %v7450_v13, 1 }
 0x86f   :  { %v8586_v54 = vsel %vm5560_vm12, %v7163_v50, %v5562_v52  ;;  %5572 = vrot.lane.b32.xlu0 %v8584_v53, %s7360_s8 }
 0x870   :  { %5574 = vrot.lane.b32.xlu1 %v8586_v54, %s7360_s8 }
 0x873   :  { %5658 = vrot.lane.b32.xlu0 %v8584_v53, %s7340_s0 }
 0x874   :  { %5660 = vrot.lane.b32.xlu1 %v8586_v54, %s7340_s0 }
 0x877   :  { %5744 = vrot.lane.b32.xlu0 %v8584_v53, %s7339_s16 }
 0x878   :  { %5746 = vrot.lane.b32.xlu1 %v8586_v54, %s7339_s16 }
 0x87b   :  { %5830 = vrot.lane.b32.xlu0 %v8584_v53, %s7341_s17 }
 0x87c   :  { %5832 = vrot.lane.b32.xlu1 %v8586_v54, %s7341_s17 }
 0x87f   :  { %5916 = vrot.lane.b32.xlu0 %v8584_v53, %s7361_s9 }
 0x880   :  { %5918 = vrot.lane.b32.xlu1 %v8586_v54, %s7361_s9 }
 0x883   :  { %6002 = vrot.lane.b32.xlu0 %v8584_v53, %s7353_s28 }
 0x884   :  { %6004 = vrot.lane.b32.xlu1 %v8586_v54, %s7353_s28 }
 0x887   :  { %6088 = vrot.lane.b32.xlu0 %v8584_v53, %s7342_s18 }
 0x888   :  { %6090 = vrot.lane.b32.xlu1 %v8586_v54, %s7342_s18 }
 0x88b   :  { %6252 = vrot.lane.b32.xlu0 %v8584_v53, %s7343_s19 }
 0x88c   :  { %6254 = vrot.lane.b32.xlu1 %v8586_v54, %s7343_s19 }
 0x88f   :  { %6338 = vrot.lane.b32.xlu0 %v8584_v53, %s7354_s29 }
 0x890   :  { %6340 = vrot.lane.b32.xlu1 %v8586_v54, %s7354_s29 }
 0x893   :  { %6424 = vrot.lane.b32.xlu0 %v8584_v53, %s7362_s10 }
 0x894   :  { %6426 = vrot.lane.b32.xlu1 %v8586_v54, %s7362_s10 }
 0x897   :  { %6510 = vrot.lane.b32.xlu0 %v8584_v53, %s7344_s20 }
 0x898   :  { %6512 = vrot.lane.b32.xlu1 %v8586_v54, %s7344_s20 }
 0x89b   :  { %6596 = vrot.lane.b32.xlu0 %v8584_v53, %s7345_s21 }
 0x89c   :  { %6598 = vrot.lane.b32.xlu1 %v8586_v54, %s7345_s21 }
 0x89f   :  { %6682 = vrot.lane.b32.xlu0 %v8584_v53, %s7346_s22 }
 0x8a0   :  { %6684 = vrot.lane.b32.xlu1 %v8586_v54, %s7346_s22 }
 0x8a3   :  { %6768 = vrot.lane.b32.xlu0 %v8584_v53, %s7363_s11 }
 0x8a4   :  { %6770 = vrot.lane.b32.xlu1 %v8586_v54, %s7363_s11 }
 0x8a7   :  { %5569 = vperm.xlu0 %7336, %v7097_v56  }
 0x8e1   :  { %v5573_v57 = vpop.permute.xlu0 %5572 }
 0x8e2   :  { %v5575_v58 = vpop.permute.xlu1 %5574 }
 0x8e3   :  { %v5576_v60 = vsel %vm8991_vm11, %v5573_v57, %v5575_v58  ;;  %v5577_v61 = vsel %vm8992_vm6, %v5575_v58, %v5573_v57  ;;  %vm8999_vm11 = vcmp.ge.s32.totalorder %v7441_v10, 16  ;;  %vm9001_vm6 = vcmp.lt.s32.totalorder %v7450_v13, 15 }
 0x8e4   :  { %7099 = vmatprep.subr.msk.mxu1 %vm8993_vm3, %v5576_v60 }
 0x8e5   :  { %v5659_v4 = vpop.permute.xlu0 %5658  ;;  %7100 = vmatpush1.msk.msra.mxu1 %vm8091_vm5, %v5577_v61  ;;  %vm8997_vm5 = vcmp.lt.s32.totalorder %v7441_v10, 16 }
 0x8e6   :  { %7101 = vmatmul.mubr.msk.f32.vlgmr.msra.gmra.mrb[4].mxu1 %vm49_vm8, %v7098_v3  ;;  %v5661_v5 = vpop.permute.xlu1 %5660  ;;  %vm8998_vm12 = vmmov %vm8997_vm5 }
 0x8e7   :  { %v5662_v6 = vsel %vm8994_vm14, %v5659_v4, %v5661_v5  ;;  %v5663_v0 = vsel %vm8995_vm10, %v5661_v5, %v5659_v4  ;;  %5735 = vmatprep.mubr.f32.mxu1 %v7338_v2  ;;  %vm9003_vm14 = vcmp.lt.s32.totalorder %v7441_v10, 14  ;;  %vm9004_vm10 = vcmp.lt.s32.totalorder %v7450_v13, 14 }
 0x8e8   :  { %7103 = vmatprep.subr.msk.mxu1 %vm8996_vm0, %v5662_v6  ;;  %vm9005_vm0 = vmmov %vm9003_vm14 }
 0x8e9   :  { %v5745_v1 = vpop.permute.xlu0 %5744  ;;  %7104 = vmatpush1.msk.msra.mxu1 %vm7461_vm7, %v5663_v0  ;;  %vm9000_vm7 = vcmp.lt.s32.totalorder %v7441_v10, 15 }
 0x8ea   :  { %v5747_v42 = vpop.permute.xlu1 %5746  ;;  %vm9002_vm3 = vmmov %vm9000_vm7 }
 0x8eb   :  { %v5748_v8 = vsel %vm8997_vm5, %v5745_v1, %v5747_v42  ;;  %v5749_v17 = vsel %vm8998_vm12, %v5747_v42, %v5745_v1  ;;  %vm9006_vm5 = vcmp.lt.s32.totalorder %v7441_v10, 2 }
 0x8ec   :  { %5757 = vmatprep.subr.mxu1 %v5748_v8  ;;  %vm9008_vm12 = vmmov %vm9006_vm5 }
 0x8ed   :  { %v5831_v16 = vpop.permute.xlu0 %5830 }
 0x8ee   :  { %7105 = vmatmul.mubr.msk.f32.vlgmr.msra.gmra.mrb[4].mxu1 %vm49_vm8, %v7102_v9  ;;  %v5833_v19 = vpop.permute.xlu1 %5832  ;;  %v7150_v9 = vld [vmem:[%s8841_s1 + $0x2c8] sm:$0xff] }
 0x8ef   :  { %7107 = vmatpush1.msk.msra.mxu1 %vm8999_vm11, %v5749_v17  ;;  %v5834_v18 = vsel %vm9000_vm7, %v5831_v16, %v5833_v19  ;;  %5821 = vmatprep.mubr.f32.mxu1 %v7338_v2  ;;  %v5835_v21 = vsel %vm9002_vm3, %v5833_v19, %v5831_v16  ;;  %vm9009_vm11 = vcmp.lt.s32.totalorder %v7441_v10, 1  ;;  %vm9011_vm7 = vcmp.ge.s32.totalorder %v7450_v13, 1 }
 0x8f0   :  { %7110 = vmatprep.subr.msk.mxu1 %vm9001_vm6, %v5834_v18  ;;  %vm9012_vm6 = vmmov %vm9009_vm11  ;;  %vm9013_vm3 = vcmp.ge.s32.totalorder %v7447_v12, 1 }
 0x8f1   :  { %v5917_v62 = vpop.permute.xlu0 %5916 }
 0x8f2   :  { %v5919_v63 = vpop.permute.xlu1 %5918 }
 0x8f3   :  { %v5920_v22 = vsel %vm9003_vm14, %v5917_v62, %v5919_v63  ;;  %v5921_v26 = vsel %vm9005_vm0, %v5919_v63, %v5917_v62  ;;  %vm9014_vm14 = vcmp.lt.s32.totalorder %v7441_v10, 127 }
 0x8f4   :  { %vm9016_vm0 = vmmov %vm9014_vm14 }
 0x8f5   :  { %v6003_v24 = vpop.permute.xlu0 %6002 }
 0x8f6   :  { %7108 = vmatmul.mubr.msk.f32.vlgmr.msra.gmra.mrb[4].mxu1 %vm49_vm8, %v7106_v20  ;;  %v6005_v25 = vpop.permute.xlu1 %6004 }
 0x8f7   :  { %7111 = vmatpush1.msk.msra.mxu1 %vm7501_vm13, %v5835_v21  ;;  %5907 = vmatprep.mubr.f32.mxu1 %v7338_v2  ;;  %v6006_v31 = vsel %vm9006_vm5, %v6003_v24, %v6005_v25  ;;  %vm9007_vm13 = vcmp.ge.s32.totalorder %v7450_v13, 2  ;;  %v6007_v30 = vsel %vm9008_vm12, %v6005_v25, %v6003_v24  ;;  %vm9017_vm5 = vcmp.lt.s32.totalorder %v7441_v10, 126 }
 0x8f8   :  { %7114 = vmatprep.subr.msk.mxu1 %vm9004_vm10, %v5920_v22  ;;  %vm9015_vm10 = vcmp.lt.s32.totalorder %v7450_v13, 15  ;;  %vm9019_vm12 = vcmp.lt.s32.totalorder %v7450_v13, 14  ;;  %v7131_v13 = vld [vmem:[%s8841_s1 + $0x2a0] sm:$0xff] }
 0x8f9   :  { %v6089_v28 = vpop.permute.xlu0 %6088 }
 0x8fa   :  { %v6091_v29 = vpop.permute.xlu1 %6090 }
 0x8fb   :  { %v6092_v7 = vsel %vm9009_vm11, %v6089_v28, %v6091_v29  ;;  %v6093_v33 = vsel %vm9012_vm6, %v6091_v29, %v6089_v28  ;;  %vm9020_vm11 = vmmov %vm9017_vm5 }
 0x8fd   :  { %v6253_v36 = vpop.permute.xlu0 %6252 }
 0x8fe   :  { %7112 = vmatmul.mubr.msk.f32.vlgmr.msra.gmra.mrb[4].mxu1 %vm49_vm8, %v7109_v23  ;;  %v6255_v37 = vpop.permute.xlu1 %6254 }
 0x8ff   :  { %7115 = vmatpush1.msk.msra.mxu1 %vm8152_vm9, %v5921_v26  ;;  %5993 = vmatprep.mubr.f32.mxu1 %v7338_v2  ;;  %vm9010_vm9 = vcmp.ge.s32.totalorder %v7447_v12, 2  ;;  %v6257_v38 = vsel %vm9014_vm14, %v6255_v37, %v6253_v36  ;;  %v6256_v43 = vsel %vm9016_vm0, %v6253_v36, %v6255_v37  ;;  %vm9025_vm14 = vcmp.ge.s32.totalorder %v7447_v12, 2 }
 0x900   :  { %7118 = vmatprep.subr.msk.mxu1 %vm9007_vm13, %v6006_v31  ;;  %vm9018_vm13 = vcmp.lt.s32.totalorder %v7447_v12, 15  ;;  %vm9028_vm0 = vcmp.ge.s32.totalorder %v7447_v12, 1 }
 0x901   :  { %v6339_v40 = vpop.permute.xlu0 %6338 }
 0x902   :  { %v6341_v41 = vpop.permute.xlu1 %6340 }
 0x903   :  { %v6343_v45 = vsel %vm9017_vm5, %v6341_v41, %v6339_v40  ;;  %v6342_v49 = vsel %vm9020_vm11, %v6339_v40, %v6341_v41  ;;  %vm9033_vm11 = vcmp.lt.s32.totalorder %v7441_v10, 110 }
 0x905   :  { %v6425_v47 = vpop.permute.xlu0 %6424 }
 0x906   :  { %7116 = vmatmul.mubr.msk.f32.vlgmr.msra.gmra.mrb[4].mxu1 %vm49_vm8, %v7113_v27  ;;  %v6427_v48 = vpop.permute.xlu1 %6426 }
 0x907   :  { %7119 = vmatpush1.msk.msra.mxu1 %vm9010_vm9, %v6007_v30  ;;  %6079 = vmatprep.mubr.f32.mxu1 %v7338_v2  ;;  %vm9021_vm9 = vcmp.lt.s32.totalorder %v7441_v10, 114 }
 0x908   :  { %7122 = vmatprep.subr.msk.mxu1 %vm9011_vm7, %v6092_v7  ;;  %v6429_v50 = vsel %vm9021_vm9, %v6427_v48, %v6425_v47  ;;  %vm9022_vm7 = vcmp.lt.s32.totalorder %v7447_v12, 14  ;;  %vm9023_vm6 = vmmov %vm9021_vm9  ;;  %vm9034_vm9 = vcmp.lt.s32.totalorder %v7447_v12, 15 }
 0x909   :  { %v6511_v51 = vpop.permute.xlu0 %6510 }
 0x90a   :  { %v6513_v52 = vpop.permute.xlu1 %6512 }
 0x90d   :  { %v6597_v56 = vpop.permute.xlu0 %6596 }
 0x90e   :  { %7120 = vmatmul.mubr.msk.f32.vlgmr.msra.gmra.mrb[4].mxu1 %vm49_vm8, %v7117_v32  ;;  %v6599_v57 = vpop.permute.xlu1 %6598 }
 0x90f   :  { %7123 = vmatpush1.msk.msra.mxu1 %vm9013_vm3, %v6093_v33  ;;  %6165 = vmatprep.mubr.f32.mxu1 %v7338_v2  ;;  %vm9024_vm3 = vcmp.lt.s32.totalorder %v7441_v10, 113 }
 0x910   :  { %6179 = vmatprep.subr.mxu1 %v8586_v54  ;;  %v6515_v54 = vsel %vm9024_vm3, %v6513_v52, %v6511_v51 }
 0x911   :  { %v6683_v61 = vpop.permute.xlu0 %6682 }
 0x912   :  { %v6685_v3 = vpop.permute.xlu1 %6684 }
 0x915   :  { %v6769_v6 = vpop.permute.xlu0 %6768 }
 0x916   :  { %7124 = vmatmul.mubr.msk.f32.vlgmr.msra.gmra.mrb[4].mxu1 %vm49_vm8, %v7121_v34  ;;  %v6771_v0 = vpop.permute.xlu1 %6770 }
 0x917   :  { %6180 = vmatpush1.msra.mxu1 %v8584_v53  ;;  %6243 = vmatprep.mubr.f32.mxu1 %v7338_v2  ;;  %v6428_v53 = vsel %vm9023_vm6, %v6425_v47, %v6427_v48  ;;  %v6773_v42 = vsel %vm9033_vm11, %v6771_v0, %v6769_v6 }
 0x918   :  { %7128 = vmatprep.subr.msk.mxu1 %vm9015_vm10, %v6257_v38  ;;  %vm9027_vm10 = vcmp.lt.s32.totalorder %v7441_v10, 112 }
 0x919   :  { %v6601_v60 = vsel %vm9027_vm10, %v6599_v57, %v6597_v56  ;;  %vm9030_vm5 = vmmov %vm9027_vm10 }
 0x91a   :  { %v6600_v4 = vsel %vm9030_vm5, %v6597_v56, %v6599_v57 }
 0x91e   :  { %7126 = vmatmul.mubr.msk.f32.vlgmr.msra.gmra.mrb[4].mxu1 %vm49_vm8, %v7125_v39 }
 0x91f   :  { %7129 = vmatpush1.msk.msra.mxu1 %vm9018_vm13, %v6256_v43  ;;  %6329 = vmatprep.mubr.f32.mxu1 %v7338_v2  ;;  %vm9031_vm13 = vcmp.lt.s32.totalorder %v7441_v10, 111 }
 0x920   :  { %7132 = vmatprep.subr.msk.mxu1 %vm9019_vm12, %v6343_v45  ;;  %v6687_v5 = vsel %vm9031_vm13, %v6685_v3, %v6683_v61  ;;  %vm9032_vm12 = vmmov %vm9031_vm13 }
 0x921   :  { %v6686_v1 = vsel %vm9032_vm12, %v6683_v61, %v6685_v3 }
 0x926   :  { %7130 = vmatmul.mubr.msk.f32.vlgmr.msra.gmra.mrb[4].mxu1 %vm49_vm8, %v7127_v46  ;;  %v5570_v59 = vpop.permute.xlu0 %5569 }
 0x927   :  { %7133 = vmatpush1.msk.msra.mxu1 %vm9022_vm7, %v6342_v49  ;;  %6415 = vmatprep.mubr.f32.mxu1 %v7338_v2 }
 0x928   :  { %7136 = vmatprep.subr.msk.mxu1 %vm8220_vm2, %v6429_v50  ;;  %vm9026_vm2 = vmmov %vm9024_vm3 }
 0x929   :  { %v6514_v58 = vsel %vm9026_vm2, %v6511_v51, %v6513_v52 }
 0x92e   :  { %7134 = vmatmul.mubr.msk.f32.vlgmr.msra.gmra.mrb[4].mxu1 %vm49_vm8, %v7131_v13 }
 0x92f   :  { %7137 = vmatpush1.msk.msra.mxu1 %vm9025_vm14, %v6428_v53  ;;  %6501 = vmatprep.mubr.f32.mxu1 %v7338_v2 }
 0x930   :  { %7140 = vmatprep.subr.msk.mxu1 %vm7547_vm1, %v6515_v54  ;;  %vm9029_vm1 = vcmp.lt.s32.totalorder %v7444_v11, 240  ;;  %v7143_v11 = vld [vmem:[%s8841_s1 + $0x2b8] sm:$0xff] }
 0x936   :  { %7138 = vmatmul.mubr.msk.f32.vlgmr.msra.gmra.mrb[4].mxu1 %vm49_vm8, %v7135_v35 }
 0x937   :  { %7141 = vmatpush1.msk.msra.mxu1 %vm9028_vm0, %v6514_v58  ;;  %6587 = vmatprep.mubr.f32.mxu1 %v7338_v2 }
 0x938   :  { %7144 = vmatprep.subr.msk.mxu1 %vm9029_vm1, %v6601_v60 }
 0x93e   :  { %7142 = vmatmul.mubr.msk.f32.vlgmr.msra.gmra.mrb[4].mxu1 %vm49_vm8, %v7139_v44 }
 0x93f   :  { %6610 = vmatpush1.msra.mxu1 %v6600_v4  ;;  %6673 = vmatprep.mubr.f32.mxu1 %v7338_v2 }
 0x940   :  { %7147 = vmatprep.subr.msk.mxu1 %vm7583_vm15, %v6687_v5  ;;  %vm9035_vm15 = vmmov %vm9033_vm11 }
 0x941   :  { %v6772_v8 = vsel %vm9035_vm15, %v6769_v6, %v6771_v0 }
 0x946   :  { %7145 = vmatmul.mubr.msk.f32.vlgmr.msra.gmra.mrb[4].mxu1 %vm49_vm8, %v7143_v11 }
 0x947   :  { %7148 = vmatpush1.msk.msra.mxu1 %vm9034_vm9, %v6686_v1  ;;  %6759 = vmatprep.mubr.f32.mxu1 %v7338_v2 }
 0x948   :  { %7151 = vmatprep.subr.msk.mxu1 %vm8279_vm4, %v6773_v42 }
 0x94e   :  { %7149 = vmatmul.mubr.msk.f32.vlgmr.msra.gmra.mrb[4].mxu1 %vm49_vm8, %v7146_v55 }
 0x94f   :  { %7152 = vmatpush1.msk.msra.mxu1 %vm9022_vm7, %v6772_v8  ;;  %6845 = vmatprep.mubr.f32.mxu1 %v7338_v2 }
 0x956   :  { %7153 = vmatmul.mubr.msk.f32.vlgmr.msra.gmra.mrb[4].mxu1 %vm49_vm8, %v7150_v9 }
 0xa29   :  { %v6847_v16 = vpop.f32.mrb[4].mxu1 }
 0xa2a   :  { %v7164_v17 = vadd.f32 %v6847_v16, %v5570_v59  ;;  %v6849_v19 = vpop.f32.mrb[5].mxu1 }
 0xa2b   :  { %v7165_v18 = vadd.f32 %v6849_v19, %v5570_v59 }
 0xa2c   :  { %v6854_v10 = vadd.f32 %v7164_v17, %v8308_v14 }
 0xa2d   :  { %v6855_v20 = vadd.f32 %v7165_v18, %v8311_v15 }
 0xa2e   :  { %6856 = vst [vmem:[%s8842_s3] sm:$0xff] %v6854_v10 }
 0xa2f   :  { %6857 = vst [vmem:[%s8842_s3 + $0x8] sm:$0xff] %v6855_v20 }

</bundles_post_ra>
